<compile_context>
chip_gen: v5e
topology: v5e:2x2
jax: 0.10.0
libtpu: 0.0.40
codegen_flags: <defaults>
</compile_context>

<pallas_src>
import numpy as np

import jax
import jax.numpy as jnp
from jax import lax
from jax.experimental import pallas as pl
from jax.experimental.pallas import tpu as pltpu

NEG_SLOPE = 0.01  # F.leaky_relu default negative_slope


# ----------------------------- fused Pallas kernel ------------------------- #
def _make_fused_kernel(padded_dims):
    """padded_dims = (K0, N1, N2, ..., N6): padded feature width of every layer I/O."""
    n_layers = len(padded_dims) - 1

    def kernel(x_ref, *refs):
        w_refs = refs[:n_layers]          # bf16 (K_i, N_i) VMEM weights
        b_ref = refs[n_layers]            # f32  (8, max_N) packed biases
        o_ref = refs[n_layers + 1]        # f32  (M, N_last) output

        h = x_ref[...]                    # (M, K0) bf16
        for i in range(n_layers):
            n = padded_dims[i + 1]
            acc = jnp.dot(h, w_refs[i][...], preferred_element_type=jnp.float32)
            acc = acc + b_ref[i:i + 1, 0:n]                  # static (1, n) slice
            act = jnp.where(acc >= 0, acc, NEG_SLOPE * acc)  # f32 epilogue
            h = act.astype(jnp.bfloat16) if i + 1 < n_layers else act
        o_ref[...] = h                    # lane-dense (N_last = 128) unmasked store

    return kernel


# ----------------------- conv -> Toeplitz GEMM (pack time) ------------------ #
def _conv_toeplitz(w_oihw, H, W, stride=2, pad=2):
    """Exact dense matrix T such that  nhwc_flat(conv(x)) = nhwc_flat(x) @ T."""
    Cout, Cin, KH, KW = w_oihw.shape
    OH = (H + 2 * pad - KH) // stride + 1
    OW = (W + 2 * pad - KW) // stride + 1
    T = np.zeros((H * W * Cin, OH * OW * Cout), dtype=np.float32)
    w = np.asarray(w_oihw, dtype=np.float32)
    cin_idx = np.arange(Cin)
    cout_idx = np.arange(Cout)
    for kh in range(KH):
        for kw in range(KW):
            tap = w[:, :, kh, kw].T        # (Cin, Cout)
            for oh in range(OH):
                h = oh * stride + kh - pad
                if h < 0 or h >= H:
                    continue
                for ow in range(OW):
                    wc = ow * stride + kw - pad
                    if wc < 0 or wc >= W:
                        continue
                    rows = (h * W + wc) * Cin + cin_idx
                    cols = (oh * OW + ow) * Cout + cout_idx
                    T[np.ix_(rows, cols)] += tap
    return T, OH, OW


# ------------------------------ parameters --------------------------------- #
def init_params(key, input_dims=(16, 16), output_dims=1,
                conv_channels=(16, 32, 64), hidden_layers=(64, 8)):
    """Torch-layout params: conv weights OIHW, fc weights stored as (in, out)."""
    ks = jax.random.split(key, 12)
    scale = 0.05

    def nrm(k, shape):
        return (scale * jax.random.normal(k, shape)).astype(jnp.float32)

    H, W = input_dims
    flat = conv_channels[2] * (H // 8) * (W // 8)   # NCHW flatten order (torch)
    params = {
        "conv1": (nrm(ks[0], (conv_channels[0], 1, 5, 5)),
                  nrm(ks[1], (conv_channels[0],))),
        "conv2": (nrm(ks[2], (conv_channels[1], conv_channels[0], 5, 5)),
                  nrm(ks[3], (conv_channels[1],))),
        "conv3": (nrm(ks[4], (conv_channels[2], conv_channels[1], 5, 5)),
                  nrm(ks[5], (conv_channels[2],))),
        "fc1": (nrm(ks[6], (flat, hidden_layers[0])),
                nrm(ks[7], (hidden_layers[0],))),
        "fc2": (nrm(ks[8], (hidden_layers[0], hidden_layers[1])),
                nrm(ks[9], (hidden_layers[1],))),
        "fc3": (nrm(ks[10], (hidden_layers[1], output_dims)),
                nrm(ks[11], (output_dims,))),
    }
    return params


def pack_params(params, input_dims=(16, 16), output_dims=1):
    """One-time packing: convs -> Toeplitz GEMMs, fc1 row permutation, 128-padding,
    bf16 weights, single f32 bias slab."""
    H, W = input_dims
    np_params = {k: (np.asarray(w, np.float32), np.asarray(b, np.float32))
                 for k, (w, b) in params.items()}

    weights, biases = [], []

    # conv stack as GEMMs on NHWC-flattened activations
    h, w_sp = H, W
    for name in ("conv1", "conv2", "conv3"):
        cw, cb = np_params[name]
        T, oh, ow = _conv_toeplitz(cw, h, w_sp, stride=2, pad=2)
        weights.append(T)
        biases.append(np.tile(cb, oh * ow))      # broadcast bias over (oh, ow), NHWC-flat
        h, w_sp = oh, ow

    # fc1: permute input rows from torch's NCHW flatten to our NHWC flatten
    c2 = np_params["conv3"][0].shape[0]
    fw1, fb1 = np_params["fc1"]
    perm = np.empty(c2 * h * w_sp, dtype=np.int64)
    for r in range(h):
        for c in range(w_sp):
            for ch in range(c2):
                perm[(r * w_sp + c) * c2 + ch] = ch * (h * w_sp) + r * w_sp + c
    weights.append(fw1[perm, :]); biases.append(fb1)

    fw2, fb2 = np_params["fc2"]; weights.append(fw2); biases.append(fb2)
    fw3, fb3 = np_params["fc3"]; weights.append(fw3); biases.append(fb3)

    # pad to MXU / vreg friendly shapes (lane dims -> multiples of 128)
    def rup(n, m):
        return ((n + m - 1) // m) * m

    real_dims = [H * W] + [int(b.shape[0]) for b in biases]
    padded_dims = tuple(rup(d, 128) for d in real_dims)

    packed_w = []
    for i, wm in enumerate(weights):
        buf = np.zeros((padded_dims[i], padded_dims[i + 1]), np.float32)
        buf[:wm.shape[0], :wm.shape[1]] = wm
        packed_w.append(jnp.asarray(buf, dtype=jnp.bfloat16))

    max_n = max(padded_dims[1:])
    bias_slab = np.zeros((8, max_n), np.float32)   # all 6 biases in one DMA-able slab
    for i, bv in enumerate(biases):
        bias_slab[i, :bv.shape[0]] = bv

    return {
        "weights": tuple(packed_w),
        "biases": jnp.asarray(bias_slab),
        "padded_dims": padded_dims,
        "output_dims": int(output_dims),
    }


# ------------------------------ forward pass -------------------------------- #
def make_observer_forward(packed):
    pdims = packed["padded_dims"]
    out_dims = packed["output_dims"]
    weights = packed["weights"]
    biases = packed["biases"]
    kernel = _make_fused_kernel(pdims)
    n_in = 1 + len(weights) + 1

    @jax.jit
    def forward(img):
        squeeze = (img.ndim == 3)          # torch forward also accepts (C, H, W)
        if squeeze:
            img = img[None]
        B = img.shape[0]
        M = max(8, ((B + 7) // 8) * 8)     # pad batch rows to sublane multiple
        x = img.reshape(B, -1).astype(jnp.float32)       # Cin=1 -> NCHW flat == NHWC flat
        x = jnp.pad(x, ((0, M - B), (0, pdims[0] - x.shape[1])))
        x = x.astype(jnp.bfloat16)

        out = pl.pallas_call(
            kernel,
            out_shape=jax.ShapeDtypeStruct((M, pdims[-1]), jnp.float32),
            in_specs=[pl.BlockSpec(memory_space=pltpu.MemorySpace.VMEM)] * n_in,
            out_specs=pl.BlockSpec(memory_space=pltpu.MemorySpace.VMEM),
        )(x, *weights, biases)

        out = out[:B, :out_dims]
        return out[0] if squeeze else out

    return forward


# ------------------------------ pure-JAX reference -------------------------- #
def observer_forward_ref(params, img):
    def lrelu(v):
        return jnp.where(v >= 0, v, NEG_SLOPE * v)

    x = img.astype(jnp.float32)
    for name in ("conv1", "conv2", "conv3"):
        w, b = params[name]
        x = lax.conv_general_dilated(
            x, w, window_strides=(2, 2), padding=((2, 2), (2, 2)),
            dimension_numbers=("NCHW", "OIHW", "NCHW"),
            precision=lax.Precision.HIGHEST)
        x = lrelu(x + b[None, :, None, None])
    B = x.shape[0]
    x = x.reshape(B, -1)
    for name in ("fc1", "fc2", "fc3"):
        w, b = params[name]
        x = lrelu(x @ w + b)
    return x


if __name__ == "__main__":
    key = jax.random.PRNGKey(0)
    kp, kx = jax.random.split(key)

    input_dims = (16, 16)
    batch = 2
    params = init_params(kp, input_dims=input_dims, output_dims=1)
    packed = pack_params(params, input_dims=input_dims, output_dims=1)
    forward = make_observer_forward(packed)

    img = jax.random.normal(kx, (batch, 1, *input_dims), dtype=jnp.float32)

    out = jax.block_until_ready(forward(img))
    ref = jax.block_until_ready(observer_forward_ref(params, img))

    assert out.shape == (batch, 1), out.shape
    # bf16 MXU operands (f32 accumulation/epilogue) vs the f32 HIGHEST-precision
    # reference -> slightly relaxed tolerance.
    assert jnp.allclose(out, ref, rtol=5e-2, atol=5e-3), (out, ref)

    print("KERNEL_OK")
</pallas_src>

<mosaic_0001>
module attributes {stable_mosaic.version = 11 : i64} {
  func.func @kernel(%arg0: memref<8x256xbf16, #tpu.memory_space<vmem>>, %arg1: memref<256x1024xbf16, #tpu.memory_space<vmem>>, %arg2: memref<1024x512xbf16, #tpu.memory_space<vmem>>, %arg3: memref<512x256xbf16, #tpu.memory_space<vmem>>, %arg4: memref<256x128xbf16, #tpu.memory_space<vmem>>, %arg5: memref<128x128xbf16, #tpu.memory_space<vmem>>, %arg6: memref<128x128xbf16, #tpu.memory_space<vmem>>, %arg7: memref<8x1024xf32, #tpu.memory_space<vmem>>, %arg8: memref<8x128xf32, #tpu.memory_space<vmem>>) attributes {dimension_semantics = [], scalar_prefetch = 0 : i64, scratch_operands = 0 : i64, tpu.core_type = #tpu.core_type<tc>} {
    %c0 = arith.constant 0 : index
    %c0_0 = arith.constant 0 : index
    %0 = vector.load %arg0[%c0, %c0_0] : memref<8x256xbf16, #tpu.memory_space<vmem>>, vector<8x256xbf16>
    %c0_1 = arith.constant 0 : index
    %c0_2 = arith.constant 0 : index
    %1 = vector.load %arg1[%c0_1, %c0_2] : memref<256x1024xbf16, #tpu.memory_space<vmem>>, vector<256x1024xbf16>
    %cst = arith.constant dense<0.000000e+00> : vector<8x1024xf32>
    %2 = tpu.matmul %0, %1, %cst {dimension_numbers = #tpu.dot_dimension_numbers<[1], [0], [0], [1], [0, 0, 1, 1], [], []>} : vector<8x256xbf16>, vector<256x1024xbf16>, vector<8x1024xf32> -> vector<8x1024xf32>
    %c0_3 = arith.constant 0 : index
    %c0_4 = arith.constant 0 : index
    %3 = vector.load %arg7[%c0_3, %c0_4] : memref<8x1024xf32, #tpu.memory_space<vmem>>, vector<1x1024xf32>
    %4 = vector.broadcast %3 : vector<1x1024xf32> to vector<8x1024xf32>
    %5 = arith.addf %2, %4 : vector<8x1024xf32>
    %cst_5 = arith.constant 0.000000e+00 : f32
    %6 = vector.broadcast %cst_5 : f32 to vector<8x1024xf32>
    %7 = arith.cmpf oge, %5, %6 : vector<8x1024xf32>
    %cst_6 = arith.constant 0.00999999977 : f32
    %8 = vector.broadcast %cst_6 : f32 to vector<8x1024xf32>
    %9 = arith.mulf %8, %5 : vector<8x1024xf32>
    %10 = arith.select %7, %5, %9 : vector<8x1024xi1>, vector<8x1024xf32>
    %11 = arith.truncf %10 : vector<8x1024xf32> to vector<8x1024xbf16>
    %c0_7 = arith.constant 0 : index
    %c0_8 = arith.constant 0 : index
    %12 = vector.load %arg2[%c0_7, %c0_8] : memref<1024x512xbf16, #tpu.memory_space<vmem>>, vector<1024x512xbf16>
    %cst_9 = arith.constant dense<0.000000e+00> : vector<8x512xf32>
    %13 = tpu.matmul %11, %12, %cst_9 {dimension_numbers = #tpu.dot_dimension_numbers<[1], [0], [0], [1], [0, 0, 1, 1], [], []>} : vector<8x1024xbf16>, vector<1024x512xbf16>, vector<8x512xf32> -> vector<8x512xf32>
    %c1 = arith.constant 1 : index
    %c0_10 = arith.constant 0 : index
    %14 = vector.load %arg7[%c1, %c0_10] : memref<8x1024xf32, #tpu.memory_space<vmem>>, vector<1x512xf32>
    %15 = vector.broadcast %14 : vector<1x512xf32> to vector<8x512xf32>
    %16 = arith.addf %13, %15 : vector<8x512xf32>
    %cst_11 = arith.constant 0.000000e+00 : f32
    %17 = vector.broadcast %cst_11 : f32 to vector<8x512xf32>
    %18 = arith.cmpf oge, %16, %17 : vector<8x512xf32>
    %cst_12 = arith.constant 0.00999999977 : f32
    %19 = vector.broadcast %cst_12 : f32 to vector<8x512xf32>
    %20 = arith.mulf %19, %16 : vector<8x512xf32>
    %21 = arith.select %18, %16, %20 : vector<8x512xi1>, vector<8x512xf32>
    %22 = arith.truncf %21 : vector<8x512xf32> to vector<8x512xbf16>
    %c0_13 = arith.constant 0 : index
    %c0_14 = arith.constant 0 : index
    %23 = vector.load %arg3[%c0_13, %c0_14] : memref<512x256xbf16, #tpu.memory_space<vmem>>, vector<512x256xbf16>
    %cst_15 = arith.constant dense<0.000000e+00> : vector<8x256xf32>
    %24 = tpu.matmul %22, %23, %cst_15 {dimension_numbers = #tpu.dot_dimension_numbers<[1], [0], [0], [1], [0, 0, 1, 1], [], []>} : vector<8x512xbf16>, vector<512x256xbf16>, vector<8x256xf32> -> vector<8x256xf32>
    %c2 = arith.constant 2 : index
    %c0_16 = arith.constant 0 : index
    %25 = vector.load %arg7[%c2, %c0_16] : memref<8x1024xf32, #tpu.memory_space<vmem>>, vector<1x256xf32>
    %26 = vector.broadcast %25 : vector<1x256xf32> to vector<8x256xf32>
    %27 = arith.addf %24, %26 : vector<8x256xf32>
    %cst_17 = arith.constant 0.000000e+00 : f32
    %28 = vector.broadcast %cst_17 : f32 to vector<8x256xf32>
    %29 = arith.cmpf oge, %27, %28 : vector<8x256xf32>
    %cst_18 = arith.constant 0.00999999977 : f32
    %30 = vector.broadcast %cst_18 : f32 to vector<8x256xf32>
    %31 = arith.mulf %30, %27 : vector<8x256xf32>
    %32 = arith.select %29, %27, %31 : vector<8x256xi1>, vector<8x256xf32>
    %33 = arith.truncf %32 : vector<8x256xf32> to vector<8x256xbf16>
    %c0_19 = arith.constant 0 : index
    %c0_20 = arith.constant 0 : index
    %34 = vector.load %arg4[%c0_19, %c0_20] : memref<256x128xbf16, #tpu.memory_space<vmem>>, vector<256x128xbf16>
    %cst_21 = arith.constant dense<0.000000e+00> : vector<8x128xf32>
    %35 = tpu.matmul %33, %34, %cst_21 {dimension_numbers = #tpu.dot_dimension_numbers<[1], [0], [0], [1], [0, 0, 1, 1], [], []>} : vector<8x256xbf16>, vector<256x128xbf16>, vector<8x128xf32> -> vector<8x128xf32>
    %c3 = arith.constant 3 : index
    %c0_22 = arith.constant 0 : index
    %36 = vector.load %arg7[%c3, %c0_22] : memref<8x1024xf32, #tpu.memory_space<vmem>>, vector<1x128xf32>
    %37 = vector.broadcast %36 : vector<1x128xf32> to vector<8x128xf32>
    %38 = arith.addf %35, %37 : vector<8x128xf32>
    %cst_23 = arith.constant 0.000000e+00 : f32
    %39 = vector.broadcast %cst_23 : f32 to vector<8x128xf32>
    %40 = arith.cmpf oge, %38, %39 : vector<8x128xf32>
    %cst_24 = arith.constant 0.00999999977 : f32
    %41 = vector.broadcast %cst_24 : f32 to vector<8x128xf32>
    %42 = arith.mulf %41, %38 : vector<8x128xf32>
    %43 = arith.select %40, %38, %42 : vector<8x128xi1>, vector<8x128xf32>
    %44 = arith.truncf %43 : vector<8x128xf32> to vector<8x128xbf16>
    %c0_25 = arith.constant 0 : index
    %c0_26 = arith.constant 0 : index
    %45 = vector.load %arg5[%c0_25, %c0_26] : memref<128x128xbf16, #tpu.memory_space<vmem>>, vector<128x128xbf16>
    %cst_27 = arith.constant dense<0.000000e+00> : vector<8x128xf32>
    %46 = tpu.matmul %44, %45, %cst_27 {dimension_numbers = #tpu.dot_dimension_numbers<[1], [0], [0], [1], [0, 0, 1, 1], [], []>} : vector<8x128xbf16>, vector<128x128xbf16>, vector<8x128xf32> -> vector<8x128xf32>
    %c4 = arith.constant 4 : index
    %c0_28 = arith.constant 0 : index
    %47 = vector.load %arg7[%c4, %c0_28] : memref<8x1024xf32, #tpu.memory_space<vmem>>, vector<1x128xf32>
    %48 = vector.broadcast %47 : vector<1x128xf32> to vector<8x128xf32>
    %49 = arith.addf %46, %48 : vector<8x128xf32>
    %cst_29 = arith.constant 0.000000e+00 : f32
    %50 = vector.broadcast %cst_29 : f32 to vector<8x128xf32>
    %51 = arith.cmpf oge, %49, %50 : vector<8x128xf32>
    %cst_30 = arith.constant 0.00999999977 : f32
    %52 = vector.broadcast %cst_30 : f32 to vector<8x128xf32>
    %53 = arith.mulf %52, %49 : vector<8x128xf32>
    %54 = arith.select %51, %49, %53 : vector<8x128xi1>, vector<8x128xf32>
    %55 = arith.truncf %54 : vector<8x128xf32> to vector<8x128xbf16>
    %c0_31 = arith.constant 0 : index
    %c0_32 = arith.constant 0 : index
    %56 = vector.load %arg6[%c0_31, %c0_32] : memref<128x128xbf16, #tpu.memory_space<vmem>>, vector<128x128xbf16>
    %cst_33 = arith.constant dense<0.000000e+00> : vector<8x128xf32>
    %57 = tpu.matmul %55, %56, %cst_33 {dimension_numbers = #tpu.dot_dimension_numbers<[1], [0], [0], [1], [0, 0, 1, 1], [], []>} : vector<8x128xbf16>, vector<128x128xbf16>, vector<8x128xf32> -> vector<8x128xf32>
    %c5 = arith.constant 5 : index
    %c0_34 = arith.constant 0 : index
    %58 = vector.load %arg7[%c5, %c0_34] : memref<8x1024xf32, #tpu.memory_space<vmem>>, vector<1x128xf32>
    %59 = vector.broadcast %58 : vector<1x128xf32> to vector<8x128xf32>
    %60 = arith.addf %57, %59 : vector<8x128xf32>
    %cst_35 = arith.constant 0.000000e+00 : f32
    %61 = vector.broadcast %cst_35 : f32 to vector<8x128xf32>
    %62 = arith.cmpf oge, %60, %61 : vector<8x128xf32>
    %cst_36 = arith.constant 0.00999999977 : f32
    %63 = vector.broadcast %cst_36 : f32 to vector<8x128xf32>
    %64 = arith.mulf %63, %60 : vector<8x128xf32>
    %65 = arith.select %62, %60, %64 : vector<8x128xi1>, vector<8x128xf32>
    %c0_37 = arith.constant 0 : index
    %c0_38 = arith.constant 0 : index
    %66 = vector.load %arg8[%c0_37, %c0_38] : memref<8x128xf32, #tpu.memory_space<vmem>>, vector<8x128xf32>
    tpu.vector_store %arg8[%c0_37, %c0_38], %65 {strides = array<i32>} : memref<8x128xf32, #tpu.memory_space<vmem>>, vector<8x128xf32>,
    return
  }
}

</mosaic_0001>

<bundles_post_ra>
// kernel: forward.1
= control target key start
LH: loop header
LB: loop body
LE: loop exit
PB: predicated region body
PF: predicated region fallthrough
CT: control target
= control target key end

     0   :  { %13 = vsyncpa [#allocation3], 0  ;;  %s6783_s0 = inlined_call_operand.vmem [shape: bf16[8,256], index: 0, kind: input, shape index: {}]   ;;  %s6784_s1 = inlined_call_operand.hbm [shape: bf16[256,1024], index: 1, kind: input, shape index: {}]   ;;  %s6785_s2 = inlined_call_operand.hbm [shape: bf16[1024,512], index: 2, kind: input, shape index: {}]   ;;  %s6786_s3 = inlined_call_operand.hbm [shape: bf16[512,256], index: 3, kind: input, shape index: {}]   ;;  %s6787_s4 = inlined_call_operand.hbm [shape: bf16[256,128], index: 4, kind: input, shape index: {}]   ;;  %s6788_s5 = inlined_call_operand.hbm [shape: bf16[128,128], index: 5, kind: input, shape index: {}]   ;;  %s6789_s6 = inlined_call_operand.hbm [shape: bf16[128,128], index: 6, kind: input, shape index: {}]   ;;  %s6790_s7 = inlined_call_operand.vmem [shape: f32[8,1024], index: 7, kind: input, shape index: {}]   ;;  %s6791_s8 = inlined_call_operand.vmem [shape: f32[8,128], index: 8, kind: output, shape index: {}]  }
   0x1   :  { %14 = vsyncpa [#allocation5], 0 }
   0x2   :  { %15 = vsyncpa [#allocation8], 0  ;;  %s36_s29 = sshll.u32 %s6785_s2, 4  ;;  %s37_s29 = int_to_ptr.hbm [resolvable:$true] %s36_s29 }
   0x3   :  { %16 = vsyncpa [#allocation11], 0  ;;  %s6541_s30 = smov [#allocation4]   ;;  %s62_s12 = sshll.u32 %s6787_s4, 4  ;;  %s63_s12 = int_to_ptr.hbm [resolvable:$true] %s62_s12 }
   0x4   :  { %s38_s9 = sshll.u32 %s6541_s30, 4  ;;  %s6542_s13 = smov 256   ;;  %s39_s9 = int_to_ptr.vmem [resolvable:$true] %s38_s9 }
   0x5   :  { %s6543_s14 = smov 16   ;;  %s6544_s15 = smov [#allocation7]  }
   0x6   :  { %44 = dma.hbm_to_vmem [thread:$0]  %s37_s29, 32768, %s39_s9, [#allocation5], %s6542_s13, %s6542_s13, %s6543_s14  }
   0x7   :  { %s64_s16 = sshll.u32 %s6544_s15, 4  ;;  %s6545_s17 = smov 64   ;;  %s65_s16 = int_to_ptr.vmem [resolvable:$true] %s64_s16 }
   0x8   :  { %s6546_s18 = smov 4   ;;  %s23_s20 = sshll.u32 %s6784_s1, 4  ;;  %s24_s20 = int_to_ptr.hbm [resolvable:$true] %s23_s20 }
   0x9   :  { %70 = dma.hbm_to_vmem [thread:$0]  %s63_s12, 2048, %s65_s16, [#allocation8], %s6545_s17, %s6545_s17, %s6546_s18  }
   0xa   :  { %s6547_s21 = smov [#allocation2]   ;;  %s49_s24 = sshll.u32 %s6786_s3, 4  ;;  %s50_s24 = int_to_ptr.hbm [resolvable:$true] %s49_s24 }
   0xb   :  { %s25_s4 = sshll.u32 %s6547_s21, 4  ;;  %s6548_s25 = smov 512   ;;  %s26_s4 = int_to_ptr.vmem [resolvable:$true] %s25_s4 }
   0xc   :  { %s6549_s26 = smov 32   ;;  %s6550_s27 = smov [#allocation6]  }
   0xd   :  { %31 = dma.hbm_to_vmem [thread:$0]  %s24_s20, 16384, %s26_s4, [#allocation3], %s6548_s25, %s6548_s25, %s6549_s26  }
   0xe   :  { %s51_s28 = sshll.u32 %s6550_s27, 4  ;;  %s6551_s29 = smov 128   ;;  %s52_s28 = int_to_ptr.vmem [resolvable:$true] %s51_s28 }
   0xf   :  { %s6552_s30 = smov 8   ;;  %s75_s10 = sshll.u32 %s6788_s5, 4  ;;  %s76_s10 = int_to_ptr.hbm [resolvable:$true] %s75_s10 }
  0x10   :  { %57 = dma.hbm_to_vmem [thread:$0]  %s50_s24, 8192, %s52_s28, [#allocation5], %s6551_s29, %s6551_s29, %s6552_s30  }
  0x11   :  { %s6553_s11 = smov [#allocation9]   ;;  %s88_s14 = sshll.u32 %s6789_s6, 4  ;;  %s89_s14 = int_to_ptr.hbm [resolvable:$true] %s88_s14 }
  0x12   :  { %s77_s12 = sshll.u32 %s6553_s11, 4  ;;  %s6554_s15 = smov [#allocation10]   ;;  %s78_s12 = int_to_ptr.vmem [resolvable:$true] %s77_s12 }
  0x13   :  { %83 = dma.hbm_to_vmem [thread:$0]  %s76_s10, 1024, %s78_s12, [#allocation8], %s6545_s17, %s6545_s17, %s6546_s18  }
  0x14   :  { %s90_s16 = sshll.u32 %s6554_s15, 4  ;;  %s91_s16 = int_to_ptr.vmem [resolvable:$true] %s90_s16 }
  0x15   :  { %96 = dma.hbm_to_vmem [thread:$0]  %s89_s14, 1024, %s91_s16, [#allocation11], %s6545_s17, %s6545_s17, %s6546_s18  }
  0x16   :  { %6533 = dma.done.wait [#allocation3], 16384  }
  0x17   :  { %6534 = vsyncadd [#allocation3], 4294950912 }
  0x18   :  { %6535 = dma.done.wait [#allocation5], 40960  }
  0x19   :  { %6536 = vsyncadd [#allocation5], 4294926336 }
  0x1a   :  { %6537 = dma.done.wait [#allocation8], 3072  }
  0x1b   :  { %6538 = vsyncadd [#allocation8], 4294964224 }
  0x1c   :  { %6539 = dma.done.wait [#allocation11], 1024  }
  0x1d   :  { %6540 = vsyncadd [#allocation11], 4294966272  ;;  %v4198_v0 = vld [vmem:[#allocation2 + $0x1c0] sm:$0xf]  ;;  %v5950_v5 = vld [vmem:[#allocation2 + $0x1c4] sm:$0xf] }
  0x1e   :  { %v5954_v1 = vld [vmem:[#allocation2 + $0x1dc] sm:$0xf0]  ;;  %v4200_v6 = vld [vmem:[#allocation2 + $0x1e0] sm:$0xf0] }
  0x1f   :  { %v4454_v2 = vld [vmem:[#allocation2 + $0x3c0] sm:$0xf]  ;;  %v4199_v3 = vor.u32 %v5954_v1, %v4198_v0  ;;  %v4203_v8 = vor.u32 %v5950_v5, %v4200_v6  ;;  %v6014_v9 = vld [vmem:[#allocation2 + $0x3c4] sm:$0xf] }
  0x20   :  { %v6018_v4 = vld [vmem:[#allocation2 + $0x3dc] sm:$0xf0]  ;;  %v4456_v10 = vld [vmem:[#allocation2 + $0x3e0] sm:$0xf0] }
  0x21   :  { %v4455_v7 = vor.u32 %v6018_v4, %v4454_v2  ;;  %v4166_v11 = vld [vmem:[#allocation2 + $0x180] sm:$0xf]  ;;  %919 = vmatpush.bf16.msra.mxu0 %v4199_v3  ;;  %v4459_v12 = vor.u32 %v6014_v9, %v4456_v10  ;;  %945 = vmatpush.bf16.msra.mxu2 %v4203_v8  ;;  %v5942_v18 = vld [vmem:[#allocation2 + $0x184] sm:$0xf] }
  0x22   :  { %v5946_v13 = vld [vmem:[#allocation2 + $0x19c] sm:$0xf0]  ;;  %v4168_v19 = vld [vmem:[#allocation2 + $0x1a0] sm:$0xf0] }
  0x23   :  { %v4422_v14 = vld [vmem:[#allocation2 + $0x380] sm:$0xf]  ;;  %932 = vmatpush.bf16.msra.mxu1 %v4455_v7  ;;  %v4167_v16 = vor.u32 %v5946_v13, %v4166_v11  ;;  %v6006_v20 = vld [vmem:[#allocation2 + $0x384] sm:$0xf]  ;;  %958 = vmatpush.bf16.msra.mxu3 %v4459_v12  ;;  %v4171_v21 = vor.u32 %v5942_v18, %v4168_v19 }
  0x24   :  { %v6010_v15 = vld [vmem:[#allocation2 + $0x39c] sm:$0xf0]  ;;  %v4424_v22 = vld [vmem:[#allocation2 + $0x3a0] sm:$0xf0] }
  0x25   :  { %v4423_v17 = vor.u32 %v6010_v15, %v4422_v14  ;;  %v4134_v23 = vld [vmem:[#allocation2 + $0x140] sm:$0xf]  ;;  %v4427_v25 = vor.u32 %v6006_v20, %v4424_v22  ;;  %v5934_v28 = vld [vmem:[#allocation2 + $0x144] sm:$0xf]  ;;  %920 = vmatpush.bf16.msra.mxu0 %v4167_v16  ;;  %946 = vmatpush.bf16.msra.mxu2 %v4171_v21 }
  0x26   :  { %v5938_v24 = vld [vmem:[#allocation2 + $0x15c] sm:$0xf0]  ;;  %v4136_v30 = vld [vmem:[#allocation2 + $0x160] sm:$0xf0] }
  0x27   :  { %v4390_v26 = vld [vmem:[#allocation2 + $0x340] sm:$0xf]  ;;  %v4135_v29 = vor.u32 %v5938_v24, %v4134_v23  ;;  %v5998_v31 = vld [vmem:[#allocation2 + $0x344] sm:$0xf]  ;;  %933 = vmatpush.bf16.msra.mxu1 %v4423_v17  ;;  %v4139_v34 = vor.u32 %v5934_v28, %v4136_v30  ;;  %959 = vmatpush.bf16.msra.mxu3 %v4427_v25  ;;  %v4206_v28 = vld [vmem:[#allocation2 + $0x1c8] sm:$0xf] }
  0x28   :  { %v6002_v27 = vld [vmem:[#allocation2 + $0x35c] sm:$0xf0]  ;;  %v4392_v32 = vld [vmem:[#allocation2 + $0x360] sm:$0xf0]  ;;  %v4462_v30 = vld [vmem:[#allocation2 + $0x3c8] sm:$0xf] }
  0x29   :  { %v4391_v33 = vor.u32 %v6002_v27, %v4390_v26  ;;  %v4102_v35 = vld [vmem:[#allocation2 + $0x100] sm:$0xf]  ;;  %v4395_v38 = vor.u32 %v5998_v31, %v4392_v32  ;;  %v5926_v40 = vld [vmem:[#allocation2 + $0x104] sm:$0xf]  ;;  %921 = vmatpush.bf16.msra.mxu0 %v4135_v29  ;;  %947 = vmatpush.bf16.msra.mxu2 %v4139_v34  ;;  %v5955_v29 = vld [vmem:[#allocation2 + $0x1e4] sm:$0xf0] }
  0x2a   :  { %v5930_v36 = vld [vmem:[#allocation2 + $0x11c] sm:$0xf0]  ;;  %v4104_v41 = vld [vmem:[#allocation2 + $0x120] sm:$0xf0]  ;;  %v6019_v32 = vld [vmem:[#allocation2 + $0x3e4] sm:$0xf0] }
  0x2b   :  { %v4358_v37 = vld [vmem:[#allocation2 + $0x300] sm:$0xf]  ;;  %v5990_v42 = vld [vmem:[#allocation2 + $0x304] sm:$0xf]  ;;  %v4103_v44 = vor.u32 %v5930_v36, %v4102_v35  ;;  %934 = vmatpush.bf16.msra.mxu1 %v4391_v33  ;;  %v4107_v46 = vor.u32 %v5926_v40, %v4104_v41  ;;  %960 = vmatpush.bf16.msra.mxu3 %v4395_v38  ;;  %v5951_v33 = vld [vmem:[#allocation2 + $0x1cc] sm:$0xf]  ;;  %v4207_v40 = vor.u32 %v5955_v29, %v4206_v28 }
  0x2c   :  { %v5994_v39 = vld [vmem:[#allocation2 + $0x31c] sm:$0xf0]  ;;  %v4360_v43 = vld [vmem:[#allocation2 + $0x320] sm:$0xf0]  ;;  %v4208_v34 = vld [vmem:[#allocation2 + $0x1e8] sm:$0xf0]  ;;  %v4463_v41 = vor.u32 %v6019_v32, %v4462_v30 }
  0x2d   :  { %v4359_v45 = vor.u32 %v5994_v39, %v4358_v37  ;;  %v4070_v47 = vld [vmem:[#allocation2 + $0xc0] sm:$0xf]  ;;  %v4363_v50 = vor.u32 %v5990_v42, %v4360_v43  ;;  %v5918_v52 = vld [vmem:[#allocation2 + $0xc4] sm:$0xf]  ;;  %922 = vmatpush.bf16.msra.mxu0 %v4103_v44  ;;  %948 = vmatpush.bf16.msra.mxu2 %v4107_v46  ;;  %v6015_v37 = vld [vmem:[#allocation2 + $0x3cc] sm:$0xf]  ;;  %v4211_v42 = vor.u32 %v5951_v33, %v4208_v34 }
  0x2e   :  { %v5922_v48 = vld [vmem:[#allocation2 + $0xdc] sm:$0xf0]  ;;  %v4072_v53 = vld [vmem:[#allocation2 + $0xe0] sm:$0xf0]  ;;  %v4464_v38 = vld [vmem:[#allocation2 + $0x3e8] sm:$0xf0] }
  0x2f   :  { %v4326_v49 = vld [vmem:[#allocation2 + $0x2c0] sm:$0xf]  ;;  %v5982_v54 = vld [vmem:[#allocation2 + $0x2c4] sm:$0xf]  ;;  %v4071_v56 = vor.u32 %v5922_v48, %v4070_v47  ;;  %935 = vmatpush.bf16.msra.mxu1 %v4359_v45  ;;  %v4075_v58 = vor.u32 %v5918_v52, %v4072_v53  ;;  %961 = vmatpush.bf16.msra.mxu3 %v4363_v50  ;;  %v4174_v43 = vld [vmem:[#allocation2 + $0x188] sm:$0xf]  ;;  %v4467_v46 = vor.u32 %v6015_v37, %v4464_v38 }
  0x30   :  { %v5986_v51 = vld [vmem:[#allocation2 + $0x2dc] sm:$0xf0]  ;;  %v4328_v55 = vld [vmem:[#allocation2 + $0x2e0] sm:$0xf0]  ;;  %v5947_v44 = vld [vmem:[#allocation2 + $0x1a4] sm:$0xf0] }
  0x31   :  { %v4327_v57 = vor.u32 %v5986_v51, %v4326_v49  ;;  %v4038_v59 = vld [vmem:[#allocation2 + $0x80] sm:$0xf]  ;;  %v4331_v62 = vor.u32 %v5982_v54, %v4328_v55  ;;  %v5910_v0 = vld [vmem:[#allocation2 + $0x84] sm:$0xf]  ;;  %923 = vmatpush.bf16.msra.mxu0 %v4071_v56  ;;  %949 = vmatpush.bf16.msra.mxu2 %v4075_v58  ;;  %v4430_v45 = vld [vmem:[#allocation2 + $0x388] sm:$0xf]  ;;  %v4175_v53 = vor.u32 %v5947_v44, %v4174_v43 }
  0x32   :  { %v5914_v60 = vld [vmem:[#allocation2 + $0x9c] sm:$0xf0]  ;;  %v4040_v1 = vld [vmem:[#allocation2 + $0xa0] sm:$0xf0]  ;;  %v6011_v47 = vld [vmem:[#allocation2 + $0x3a4] sm:$0xf0] }
  0x33   :  { %v4294_v61 = vld [vmem:[#allocation2 + $0x280] sm:$0xf]  ;;  %v5974_v2 = vld [vmem:[#allocation2 + $0x284] sm:$0xf]  ;;  %v4039_v4 = vor.u32 %v5914_v60, %v4038_v59  ;;  %936 = vmatpush.bf16.msra.mxu1 %v4327_v57  ;;  %v4043_v6 = vor.u32 %v5910_v0, %v4040_v1  ;;  %962 = vmatpush.bf16.msra.mxu3 %v4331_v62  ;;  %v5943_v48 = vld [vmem:[#allocation2 + $0x18c] sm:$0xf]  ;;  %v4431_v56 = vor.u32 %v6011_v47, %v4430_v45 }
  0x34   :  { %v5978_v63 = vld [vmem:[#allocation2 + $0x29c] sm:$0xf0]  ;;  %v4296_v3 = vld [vmem:[#allocation2 + $0x2a0] sm:$0xf0]  ;;  %v4176_v49 = vld [vmem:[#allocation2 + $0x1a8] sm:$0xf0] }
  0x35   :  { %v4295_v5 = vor.u32 %v5978_v63, %v4294_v61  ;;  %v4006_v7 = vld [vmem:[#allocation2 + $0x40] sm:$0xf]  ;;  %v4299_v10 = vor.u32 %v5974_v2, %v4296_v3  ;;  %v5902_v12 = vld [vmem:[#allocation2 + $0x44] sm:$0xf]  ;;  %924 = vmatpush.bf16.msra.mxu0 %v4039_v4  ;;  %950 = vmatpush.bf16.msra.mxu2 %v4043_v6  ;;  %v6007_v50 = vld [vmem:[#allocation2 + $0x38c] sm:$0xf]  ;;  %v4179_v57 = vor.u32 %v5943_v48, %v4176_v49 }
  0x36   :  { %v5906_v8 = vld [vmem:[#allocation2 + $0x5c] sm:$0xf0]  ;;  %v4008_v13 = vld [vmem:[#allocation2 + $0x60] sm:$0xf0]  ;;  %v4432_v51 = vld [vmem:[#allocation2 + $0x3a8] sm:$0xf0] }
  0x37   :  { %v4262_v9 = vld [vmem:[#allocation2 + $0x240] sm:$0xf]  ;;  %v5966_v14 = vld [vmem:[#allocation2 + $0x244] sm:$0xf]  ;;  %v4007_v16 = vor.u32 %v5906_v8, %v4006_v7  ;;  %937 = vmatpush.bf16.msra.mxu1 %v4295_v5  ;;  %v4011_v20 = vor.u32 %v5902_v12, %v4008_v13  ;;  %963 = vmatpush.bf16.msra.mxu3 %v4299_v10  ;;  %v4142_v58 = vld [vmem:[#allocation2 + $0x148] sm:$0xf]  ;;  %v4435_v61 = vor.u32 %v6007_v50, %v4432_v51 }
  0x38   :  { %v5970_v11 = vld [vmem:[#allocation2 + $0x25c] sm:$0xf0]  ;;  %v4264_v15 = vld [vmem:[#allocation2 + $0x260] sm:$0xf0]  ;;  %v5939_v59 = vld [vmem:[#allocation2 + $0x164] sm:$0xf0] }
  0x39   :  { %v3974_v17 = vld [vmem:[#allocation2] sm:$0xf]  ;;  %v4263_v19 = vor.u32 %v5970_v11, %v4262_v9  ;;  %v5894_v23 = vld [vmem:[#allocation2 + $0x4] sm:$0xf]  ;;  %v4267_v24 = vor.u32 %v5966_v14, %v4264_v15  ;;  %925 = vmatpush.bf16.msra.mxu0 %v4007_v16  ;;  %951 = vmatpush.bf16.msra.mxu2 %v4011_v20  ;;  %v4398_v60 = vld [vmem:[#allocation2 + $0x348] sm:$0xf]  ;;  %v4143_v5 = vor.u32 %v5939_v59, %v4142_v58 }
  0x3a   :  { %v5898_v18 = vld [vmem:[#allocation2 + $0x1c] sm:$0xf0]  ;;  %v3976_v25 = vld [vmem:[#allocation2 + $0x20] sm:$0xf0]  ;;  %v6003_v62 = vld [vmem:[#allocation2 + $0x364] sm:$0xf0] }
  0x3b   :  { %v4230_v21 = vld [vmem:[#allocation2 + $0x200] sm:$0xf]  ;;  %v5958_v26 = vld [vmem:[#allocation2 + $0x204] sm:$0xf]  ;;  %v3975_v31 = vor.u32 %v5898_v18, %v3974_v17  ;;  %938 = vmatpush.bf16.msra.mxu1 %v4263_v19  ;;  %v3979_v36 = vor.u32 %v5894_v23, %v3976_v25  ;;  %964 = vmatpush.bf16.msra.mxu3 %v4267_v24  ;;  %v5935_v63 = vld [vmem:[#allocation2 + $0x14c] sm:$0xf]  ;;  %v4399_v6 = vor.u32 %v6003_v62, %v4398_v60 }
  0x3c   :  { %v5962_v22 = vld [vmem:[#allocation2 + $0x21c] sm:$0xf0]  ;;  %v4232_v27 = vld [vmem:[#allocation2 + $0x220] sm:$0xf0]  ;;  %v4144_v0 = vld [vmem:[#allocation2 + $0x168] sm:$0xf0] }
  0x3d   :  { %v4231_v35 = vor.u32 %v5962_v22, %v4230_v21  ;;  %v4235_v39 = vor.u32 %v5958_v26, %v4232_v27  ;;  %926 = vmatpush.bf16.msra.mxu0 %v3975_v31  ;;  %952 = vmatpush.bf16.msra.mxu2 %v3979_v36  ;;  %v123_v52 = vld [vmem:[%s6783_s0] sm:$0xff]  ;;  %v5999_v2 = vld [vmem:[#allocation2 + $0x34c] sm:$0xf]  ;;  %v4147_v7 = vor.u32 %v5935_v63, %v4144_v0  ;;  %v4110_v8 = vld [vmem:[#allocation2 + $0x108] sm:$0xf] }
  0x3e   :  { %v273_v54 = vunpack.c.l.b16 %v123_v52  ;;  %v274_v55 = vunpack.c.h.b16 %v123_v52  ;;  %v4400_v3 = vld [vmem:[#allocation2 + $0x368] sm:$0xf0]  ;;  %v5931_v9 = vld [vmem:[#allocation2 + $0x124] sm:$0xf0] }
  0x3f   :  { %939 = vmatpush.bf16.msra.mxu1 %v4231_v35  ;;  %965 = vmatpush.bf16.msra.mxu3 %v4235_v39  ;;  %v4366_v10 = vld [vmem:[#allocation2 + $0x308] sm:$0xf]  ;;  %v4403_v11 = vor.u32 %v5999_v2, %v4400_v3  ;;  %v5927_v13 = vld [vmem:[#allocation2 + $0x10c] sm:$0xf]  ;;  %v4111_v17 = vor.u32 %v5931_v9, %v4110_v8  ;;  %v4214_v2 = vld [vmem:[#allocation2 + $0x1d0] sm:$0xf] }
  0x40   :  { %v6630_v1 = vpack.c.b16 %v273_v54, %v273_v54  ;;  %v6632_v4 = vpack.c.b16 %v274_v55, %v274_v55  ;;  %v5995_v12 = vld [vmem:[#allocation2 + $0x324] sm:$0xf0]  ;;  %v4112_v14 = vld [vmem:[#allocation2 + $0x128] sm:$0xf0]  ;;  %v5956_v3 = vld [vmem:[#allocation2 + $0x1ec] sm:$0xf0] }
  0x41   :  { %971 = vmatpush.bf16.msrb.mxu0 %v4207_v40  ;;  %997 = vmatpush.bf16.msrb.mxu2 %v4211_v42  ;;  %v5991_v15 = vld [vmem:[#allocation2 + $0x30c] sm:$0xf]  ;;  %v4367_v18 = vor.u32 %v5995_v12, %v4366_v10  ;;  %v4115_v19 = vor.u32 %v5927_v13, %v4112_v14  ;;  %v4078_v20 = vld [vmem:[#allocation2 + $0xc8] sm:$0xf]  ;;  %v5952_v8 = vld [vmem:[#allocation2 + $0x1d4] sm:$0xf] }
  0x42   :  { %953 = vmatmul.bf16.vlgmr.msra.gmra.mxu2 %v6630_v1  ;;  %927 = vmatmul.bf16.vlgmr.msra.gmra.mxu0 %v6630_v1  ;;  %v4368_v16 = vld [vmem:[#allocation2 + $0x328] sm:$0xf0]  ;;  %v5923_v21 = vld [vmem:[#allocation2 + $0xe4] sm:$0xf0]  ;;  %v4216_v9 = vld [vmem:[#allocation2 + $0x1f0] sm:$0xf0] }
  0x43   :  { %984 = vmatpush.bf16.msrb.mxu1 %v4463_v41  ;;  %1010 = vmatpush.bf16.msrb.mxu3 %v4467_v46  ;;  %v4334_v22 = vld [vmem:[#allocation2 + $0x2c8] sm:$0xf]  ;;  %v4371_v23 = vor.u32 %v5991_v15, %v4368_v16  ;;  %v5919_v25 = vld [vmem:[#allocation2 + $0xcc] sm:$0xf]  ;;  %v4079_v29 = vor.u32 %v5923_v21, %v4078_v20  ;;  %v6016_v12 = vld [vmem:[#allocation2 + $0x3d4] sm:$0xf]  ;;  %v4215_v15 = vor.u32 %v5956_v3, %v4214_v2 }
  0x44   :  { %940 = vmatmul.bf16.vlgmr.msra.gmra.mxu1 %v6632_v4  ;;  %966 = vmatmul.bf16.vlgmr.msra.gmra.mxu3 %v6632_v4  ;;  %v5987_v24 = vld [vmem:[#allocation2 + $0x2e4] sm:$0xf0]  ;;  %v4080_v26 = vld [vmem:[#allocation2 + $0xe8] sm:$0xf0]  ;;  %v4472_v13 = vld [vmem:[#allocation2 + $0x3f0] sm:$0xf0] }
  0x45   :  { %972 = vmatpush.bf16.msrb.mxu0 %v4175_v53  ;;  %998 = vmatpush.bf16.msrb.mxu2 %v4179_v57  ;;  %v5983_v27 = vld [vmem:[#allocation2 + $0x2cc] sm:$0xf]  ;;  %v4335_v30 = vor.u32 %v5987_v24, %v4334_v22  ;;  %v4083_v31 = vor.u32 %v5919_v25, %v4080_v26  ;;  %v4046_v32 = vld [vmem:[#allocation2 + $0x88] sm:$0xf]  ;;  %v4438_v20 = vld [vmem:[#allocation2 + $0x390] sm:$0xf]  ;;  %v4475_v21 = vor.u32 %v6016_v12, %v4472_v13 }
  0x46   :  { %v4336_v28 = vld [vmem:[#allocation2 + $0x2e8] sm:$0xf0]  ;;  %v5915_v33 = vld [vmem:[#allocation2 + $0xa4] sm:$0xf0]  ;;  %v6012_v22 = vld [vmem:[#allocation2 + $0x3ac] sm:$0xf0] }
  0x47   :  { %985 = vmatpush.bf16.msrb.mxu1 %v4431_v56  ;;  %1011 = vmatpush.bf16.msrb.mxu3 %v4435_v61  ;;  %v4302_v34 = vld [vmem:[#allocation2 + $0x288] sm:$0xf]  ;;  %v4339_v35 = vor.u32 %v5983_v27, %v4336_v28  ;;  %v5911_v37 = vld [vmem:[#allocation2 + $0x8c] sm:$0xf]  ;;  %v4047_v41 = vor.u32 %v5915_v33, %v4046_v32  ;;  %v4184_v24 = vld [vmem:[#allocation2 + $0x1b0] sm:$0xf0]  ;;  %v4439_v28 = vor.u32 %v6012_v22, %v4438_v20 }
  0x48   :  { %v5979_v36 = vld [vmem:[#allocation2 + $0x2a4] sm:$0xf0]  ;;  %v4048_v38 = vld [vmem:[#allocation2 + $0xa8] sm:$0xf0]  ;;  %v6008_v25 = vld [vmem:[#allocation2 + $0x394] sm:$0xf] }
  0x49   :  { %973 = vmatpush.bf16.msrb.mxu0 %v4143_v5  ;;  %999 = vmatpush.bf16.msrb.mxu2 %v4147_v7  ;;  %v5975_v39 = vld [vmem:[#allocation2 + $0x28c] sm:$0xf]  ;;  %v4303_v42 = vor.u32 %v5979_v36, %v4302_v34  ;;  %v4051_v43 = vor.u32 %v5911_v37, %v4048_v38  ;;  %v4014_v44 = vld [vmem:[#allocation2 + $0x48] sm:$0xf]  ;;  %v4470_v5 = vld [vmem:[#allocation2 + $0x3d0] sm:$0xf] }
  0x4a   :  { %v4304_v40 = vld [vmem:[#allocation2 + $0x2a8] sm:$0xf0]  ;;  %v5907_v45 = vld [vmem:[#allocation2 + $0x64] sm:$0xf0]  ;;  %v6020_v7 = vld [vmem:[#allocation2 + $0x3ec] sm:$0xf0] }
  0x4b   :  { %986 = vmatpush.bf16.msrb.mxu1 %v4399_v6  ;;  %1012 = vmatpush.bf16.msrb.mxu3 %v4403_v11  ;;  %v4270_v46 = vld [vmem:[#allocation2 + $0x248] sm:$0xf]  ;;  %v4307_v47 = vor.u32 %v5975_v39, %v4304_v40  ;;  %v5903_v49 = vld [vmem:[#allocation2 + $0x4c] sm:$0xf]  ;;  %v4015_v53 = vor.u32 %v5907_v45, %v4014_v44  ;;  %v4471_v16 = vor.u32 %v6020_v7, %v4470_v5  ;;  %v4440_v26 = vld [vmem:[#allocation2 + $0x3b0] sm:$0xf0] }
  0x4c   :  { %v5971_v48 = vld [vmem:[#allocation2 + $0x264] sm:$0xf0]  ;;  %v4016_v50 = vld [vmem:[#allocation2 + $0x68] sm:$0xf0]  ;;  %v4406_v32 = vld [vmem:[#allocation2 + $0x350] sm:$0xf]  ;;  %v4443_v33 = vor.u32 %v6008_v25, %v4440_v26 }
  0x4d   :  { %974 = vmatpush.bf16.msrb.mxu0 %v4111_v17  ;;  %1000 = vmatpush.bf16.msrb.mxu2 %v4115_v19  ;;  %v5967_v51 = vld [vmem:[#allocation2 + $0x24c] sm:$0xf]  ;;  %v3982_v54 = vld [vmem:[#allocation2 + $0x8] sm:$0xf]  ;;  %v4271_v56 = vor.u32 %v5971_v48, %v4270_v46  ;;  %v4019_v57 = vor.u32 %v5903_v49, %v4016_v50  ;;  %v4219_v17 = vor.u32 %v5952_v8, %v4216_v9  ;;  %v5948_v19 = vld [vmem:[#allocation2 + $0x1ac] sm:$0xf0] }
  0x4e   :  { %v4272_v52 = vld [vmem:[#allocation2 + $0x268] sm:$0xf0]  ;;  %v5899_v55 = vld [vmem:[#allocation2 + $0x24] sm:$0xf0]  ;;  %v6004_v34 = vld [vmem:[#allocation2 + $0x36c] sm:$0xf0] }
  0x4f   :  { %987 = vmatpush.bf16.msrb.mxu1 %v4367_v18  ;;  %1013 = vmatpush.bf16.msrb.mxu3 %v4371_v23  ;;  %v4238_v58 = vld [vmem:[#allocation2 + $0x208] sm:$0xf]  ;;  %v5895_v60 = vld [vmem:[#allocation2 + $0xc] sm:$0xf]  ;;  %v4275_v61 = vor.u32 %v5967_v51, %v4272_v52  ;;  %v3983_v6 = vor.u32 %v5899_v55, %v3982_v54  ;;  %v4182_v18 = vld [vmem:[#allocation2 + $0x190] sm:$0xf]  ;;  %v4407_v40 = vor.u32 %v6004_v34, %v4406_v32 }
  0x50   :  { %v5963_v59 = vld [vmem:[#allocation2 + $0x224] sm:$0xf0]  ;;  %v3984_v62 = vld [vmem:[#allocation2 + $0x28] sm:$0xf0]  ;;  %v5944_v23 = vld [vmem:[#allocation2 + $0x194] sm:$0xf]  ;;  %v4183_v27 = vor.u32 %v5948_v19, %v4182_v18 }
  0x51   :  { %975 = vmatpush.bf16.msrb.mxu0 %v4079_v29  ;;  %1001 = vmatpush.bf16.msrb.mxu2 %v4083_v31  ;;  %v5959_v63 = vld [vmem:[#allocation2 + $0x20c] sm:$0xf]  ;;  %v4239_v10 = vor.u32 %v5963_v59, %v4238_v58  ;;  %v3987_v11 = vor.u32 %v5895_v60, %v3984_v62  ;;  %v4187_v29 = vor.u32 %v5944_v23, %v4184_v24  ;;  %v5940_v31 = vld [vmem:[#allocation2 + $0x16c] sm:$0xf0]  ;;  %v4152_v36 = vld [vmem:[#allocation2 + $0x170] sm:$0xf0] }
  0x52   :  { %v4240_v0 = vld [vmem:[#allocation2 + $0x228] sm:$0xf0]  ;;  %v6000_v37 = vld [vmem:[#allocation2 + $0x354] sm:$0xf]  ;;  %v4374_v44 = vld [vmem:[#allocation2 + $0x310] sm:$0xf] }
  0x53   :  { %988 = vmatpush.bf16.msrb.mxu1 %v4335_v30  ;;  %1014 = vmatpush.bf16.msrb.mxu3 %v4339_v35  ;;  %v4243_v14 = vor.u32 %v5959_v63, %v4240_v0  ;;  %v4150_v30 = vld [vmem:[#allocation2 + $0x150] sm:$0xf]  ;;  %v5936_v35 = vld [vmem:[#allocation2 + $0x154] sm:$0xf] }
  0x54   :  { %v4408_v38 = vld [vmem:[#allocation2 + $0x370] sm:$0xf0]  ;;  %v4151_v39 = vor.u32 %v5940_v31, %v4150_v30  ;;  %v5996_v46 = vld [vmem:[#allocation2 + $0x32c] sm:$0xf0] }
  0x55   :  { %976 = vmatpush.bf16.msrb.mxu0 %v4047_v41  ;;  %1002 = vmatpush.bf16.msrb.mxu2 %v4051_v43  ;;  %v4155_v41 = vor.u32 %v5936_v35, %v4152_v36  ;;  %v5932_v43 = vld [vmem:[#allocation2 + $0x12c] sm:$0xf0]  ;;  %v4411_v45 = vor.u32 %v6000_v37, %v4408_v38  ;;  %v4120_v48 = vld [vmem:[#allocation2 + $0x130] sm:$0xf0]  ;;  %v4375_v52 = vor.u32 %v5996_v46, %v4374_v44  ;;  %v4222_v37 = vld [vmem:[#allocation2 + $0x1d8] sm:$0xf] }
  0x56   :  { %v5992_v49 = vld [vmem:[#allocation2 + $0x314] sm:$0xf]  ;;  %v4086_v54 = vld [vmem:[#allocation2 + $0xd0] sm:$0xf]  ;;  %v5957_v38 = vld [vmem:[#allocation2 + $0x1f4] sm:$0xf0] }
  0x57   :  { %989 = vmatpush.bf16.msrb.mxu1 %v4303_v42  ;;  %1015 = vmatpush.bf16.msrb.mxu3 %v4307_v47  ;;  %v4118_v42 = vld [vmem:[#allocation2 + $0x110] sm:$0xf]  ;;  %v5928_v47 = vld [vmem:[#allocation2 + $0x114] sm:$0xf]  ;;  %v6017_v46 = vld [vmem:[#allocation2 + $0x3dc] sm:$0xf] }
  0x58   :  { %v4376_v50 = vld [vmem:[#allocation2 + $0x330] sm:$0xf0]  ;;  %v4119_v51 = vor.u32 %v5932_v43, %v4118_v42  ;;  %v5924_v55 = vld [vmem:[#allocation2 + $0xec] sm:$0xf0]  ;;  %v5953_v42 = vld [vmem:[#allocation2 + $0x1dc] sm:$0xf] }
  0x59   :  { %977 = vmatpush.bf16.msrb.mxu0 %v4015_v53  ;;  %1003 = vmatpush.bf16.msrb.mxu2 %v4019_v57  ;;  %v4123_v53 = vor.u32 %v5928_v47, %v4120_v48  ;;  %v4379_v57 = vor.u32 %v5992_v49, %v4376_v50  ;;  %v5988_v58 = vld [vmem:[#allocation2 + $0x2ec] sm:$0xf0]  ;;  %v5920_v59 = vld [vmem:[#allocation2 + $0xd4] sm:$0xf]  ;;  %v4087_v63 = vor.u32 %v5924_v55, %v4086_v54  ;;  %v4224_v43 = vld [vmem:[#allocation2 + $0x1f8] sm:$0xf0] }
  0x5a   :  { %v4088_v60 = vld [vmem:[#allocation2 + $0xf0] sm:$0xf0]  ;;  %v4054_v3 = vld [vmem:[#allocation2 + $0x90] sm:$0xf]  ;;  %v4480_v47 = vld [vmem:[#allocation2 + $0x3f8] sm:$0xf0]  ;;  %v4223_v49 = vor.u32 %v5957_v38, %v4222_v37 }
  0x5b   :  { %990 = vmatpush.bf16.msrb.mxu1 %v4271_v56  ;;  %1016 = vmatpush.bf16.msrb.mxu3 %v4275_v61  ;;  %v4342_v56 = vld [vmem:[#allocation2 + $0x2d0] sm:$0xf]  ;;  %v5984_v61 = vld [vmem:[#allocation2 + $0x2d4] sm:$0xf]  ;;  %v4091_v2 = vor.u32 %v5920_v59, %v4088_v60  ;;  %v4446_v54 = vld [vmem:[#allocation2 + $0x398] sm:$0xf]  ;;  %v4483_v55 = vor.u32 %v6017_v46, %v4480_v47 }
  0x5c   :  { %v4344_v62 = vld [vmem:[#allocation2 + $0x2f0] sm:$0xf0]  ;;  %v4343_v0 = vor.u32 %v5988_v58, %v4342_v56  ;;  %v5916_v5 = vld [vmem:[#allocation2 + $0xac] sm:$0xf0]  ;;  %v6013_v56 = vld [vmem:[#allocation2 + $0x3b4] sm:$0xf0] }
  0x5d   :  { %978 = vmatpush.bf16.msrb.mxu0 %v3983_v6  ;;  %1004 = vmatpush.bf16.msrb.mxu2 %v3987_v11  ;;  %v4310_v6 = vld [vmem:[#allocation2 + $0x290] sm:$0xf]  ;;  %v4347_v7 = vor.u32 %v5984_v61, %v4344_v62  ;;  %v5912_v9 = vld [vmem:[#allocation2 + $0x94] sm:$0xf]  ;;  %v4055_v13 = vor.u32 %v5916_v5, %v4054_v3  ;;  %v4192_v58 = vld [vmem:[#allocation2 + $0x1b8] sm:$0xf0]  ;;  %v4447_v62 = vor.u32 %v6013_v56, %v4446_v54 }
  0x5e   :  { %v5980_v8 = vld [vmem:[#allocation2 + $0x2ac] sm:$0xf0]  ;;  %v5976_v11 = vld [vmem:[#allocation2 + $0x294] sm:$0xf]  ;;  %v6009_v59 = vld [vmem:[#allocation2 + $0x39c] sm:$0xf] }
  0x5f   :  { %991 = vmatpush.bf16.msrb.mxu1 %v4239_v10  ;;  %1017 = vmatpush.bf16.msrb.mxu3 %v4243_v14  ;;  %v4056_v10 = vld [vmem:[#allocation2 + $0xb0] sm:$0xf0]  ;;  %v4311_v14 = vor.u32 %v5980_v8, %v4310_v6  ;;  %v4278_v18 = vld [vmem:[#allocation2 + $0x250] sm:$0xf]  ;;  %v4448_v60 = vld [vmem:[#allocation2 + $0x3b8] sm:$0xf0] }
  0x60   :  { %979 = vmatmul.bf16.vlgmr.msrb.gmra.mxu0 %v6630_v1  ;;  %1005 = vmatmul.bf16.vlgmr.msrb.gmra.mxu2 %v6630_v1  ;;  %v4312_v12 = vld [vmem:[#allocation2 + $0x2b0] sm:$0xf0]  ;;  %v5972_v20 = vld [vmem:[#allocation2 + $0x26c] sm:$0xf0]  ;;  %v4414_v3 = vld [vmem:[#allocation2 + $0x358] sm:$0xf]  ;;  %v4451_v5 = vor.u32 %v6009_v59, %v4448_v60 }
  0x61   :  { %1023 = vmatpush.bf16.msra.mxu0 %v4215_v15  ;;  %1049 = vmatpush.bf16.msra.mxu2 %v4219_v17  ;;  %v4059_v15 = vor.u32 %v5912_v9, %v4056_v10  ;;  %v5908_v17 = vld [vmem:[#allocation2 + $0x6c] sm:$0xf0]  ;;  %v4315_v19 = vor.u32 %v5976_v11, %v4312_v12  ;;  %v4024_v22 = vld [vmem:[#allocation2 + $0x70] sm:$0xf0]  ;;  %v6005_v6 = vld [vmem:[#allocation2 + $0x374] sm:$0xf0] }
  0x62   :  { %992 = vmatmul.bf16.vlgmr.msrb.gmra.mxu1 %v6632_v4  ;;  %1018 = vmatmul.bf16.vlgmr.msrb.gmra.mxu3 %v6632_v4  ;;  %v5968_v23 = vld [vmem:[#allocation2 + $0x254] sm:$0xf]  ;;  %v3990_v26 = vld [vmem:[#allocation2 + $0x10] sm:$0xf]  ;;  %v4160_v8 = vld [vmem:[#allocation2 + $0x178] sm:$0xf0]  ;;  %v4415_v12 = vor.u32 %v6005_v6, %v4414_v3 }
  0x63   :  { %1036 = vmatpush.bf16.msra.mxu1 %v4471_v16  ;;  %1062 = vmatpush.bf16.msra.mxu3 %v4475_v21  ;;  %v4022_v16 = vld [vmem:[#allocation2 + $0x50] sm:$0xf]  ;;  %v5904_v21 = vld [vmem:[#allocation2 + $0x54] sm:$0xf]  ;;  %v6001_v9 = vld [vmem:[#allocation2 + $0x35c] sm:$0xf] }
  0x64   :  { %v4280_v24 = vld [vmem:[#allocation2 + $0x270] sm:$0xf0]  ;;  %v4023_v25 = vor.u32 %v5908_v17, %v4022_v16  ;;  %v4246_v30 = vld [vmem:[#allocation2 + $0x210] sm:$0xf]  ;;  %v4416_v10 = vld [vmem:[#allocation2 + $0x378] sm:$0xf0] }
  0x65   :  { %1024 = vmatpush.bf16.msra.mxu0 %v4183_v27  ;;  %1050 = vmatpush.bf16.msra.mxu2 %v4187_v29  ;;  %v5900_v27 = vld [vmem:[#allocation2 + $0x2c] sm:$0xf0]  ;;  %v4027_v29 = vor.u32 %v5904_v21, %v4024_v22  ;;  %v5896_v32 = vld [vmem:[#allocation2 + $0x14] sm:$0xf]  ;;  %v4382_v16 = vld [vmem:[#allocation2 + $0x318] sm:$0xf]  ;;  %v4419_v17 = vor.u32 %v6001_v9, %v4416_v10 }
  0x66   :  { %v5964_v31 = vld [vmem:[#allocation2 + $0x22c] sm:$0xf0]  ;;  %v3992_v34 = vld [vmem:[#allocation2 + $0x30] sm:$0xf0]  ;;  %v5993_v21 = vld [vmem:[#allocation2 + $0x31c] sm:$0xf] }
  0x67   :  { %1037 = vmatpush.bf16.msra.mxu1 %v4439_v28  ;;  %1063 = vmatpush.bf16.msra.mxu3 %v4443_v33  ;;  %v4279_v28 = vor.u32 %v5972_v20, %v4278_v18  ;;  %v4283_v33 = vor.u32 %v5968_v23, %v4280_v24  ;;  %v5960_v35 = vld [vmem:[#allocation2 + $0x214] sm:$0xf]  ;;  %v4247_v44 = vor.u32 %v5964_v31, %v4246_v30  ;;  %v5997_v18 = vld [vmem:[#allocation2 + $0x334] sm:$0xf0]  ;;  %v4128_v20 = vld [vmem:[#allocation2 + $0x138] sm:$0xf0] }
  0x68   :  { %v4248_v36 = vld [vmem:[#allocation2 + $0x230] sm:$0xf0]  ;;  %v4384_v22 = vld [vmem:[#allocation2 + $0x338] sm:$0xf0]  ;;  %v4383_v24 = vor.u32 %v5997_v18, %v4382_v16  ;;  %v5989_v30 = vld [vmem:[#allocation2 + $0x2f4] sm:$0xf0] }
  0x69   :  { %1025 = vmatpush.bf16.msra.mxu0 %v4151_v39  ;;  %1051 = vmatpush.bf16.msra.mxu2 %v4155_v41  ;;  %v4478_v39 = vld [vmem:[#allocation2 + $0x3d8] sm:$0xf]  ;;  %v4251_v48 = vor.u32 %v5960_v35, %v4248_v36  ;;  %v5921_v31 = vld [vmem:[#allocation2 + $0xdc] sm:$0xf]  ;;  %v4599_v9 = vld [vmem:[#allocation4 + $0xe0] sm:$0xf] }
  0x6a   :  { %v6021_v41 = vld [vmem:[#allocation2 + $0x3f4] sm:$0xf0]  ;;  %v4320_v46 = vld [vmem:[#allocation2 + $0x2b8] sm:$0xf0]  ;;  %v6052_v10 = vld [vmem:[#allocation4 + $0xec] sm:$0xf0] }
  0x6b   :  { %1038 = vmatpush.bf16.msra.mxu1 %v4407_v40  ;;  %1064 = vmatpush.bf16.msra.mxu3 %v4411_v45  ;;  %v3991_v40 = vor.u32 %v5900_v27, %v3990_v26  ;;  %v3995_v45 = vor.u32 %v5896_v32, %v3992_v34  ;;  %v4479_v50 = vor.u32 %v6021_v41, %v4478_v39  ;;  %v4094_v26 = vld [vmem:[#allocation2 + $0xd8] sm:$0xf]  ;;  %v4096_v32 = vld [vmem:[#allocation2 + $0xf8] sm:$0xf0]  ;;  %v4855_v18 = vld [vmem:[#allocation4 + $0x2e0] sm:$0xf] }
  0x6c   :  { %v5925_v27 = vld [vmem:[#allocation2 + $0xf4] sm:$0xf0]  ;;  %v4352_v34 = vld [vmem:[#allocation2 + $0x2f8] sm:$0xf0]  ;;  %v4099_v37 = vor.u32 %v5921_v31, %v4096_v32  ;;  %v4695_v32 = vld [vmem:[#allocation4 + $0x1a0] sm:$0xf] }
  0x6d   :  { %1026 = vmatpush.bf16.msra.mxu0 %v4119_v51  ;;  %1052 = vmatpush.bf16.msra.mxu2 %v4123_v53  ;;  %v4227_v51 = vor.u32 %v5953_v42, %v4224_v43  ;;  %v5949_v53 = vld [vmem:[#allocation2 + $0x1b4] sm:$0xf0]  ;;  %v4095_v35 = vor.u32 %v5925_v27, %v4094_v26  ;;  %v5913_v43 = vld [vmem:[#allocation2 + $0x9c] sm:$0xf]  ;;  %v4839_v27 = vld [vmem:[#allocation4 + $0x2c0] sm:$0xf] }
  0x6e   :  { %v4062_v38 = vld [vmem:[#allocation2 + $0x98] sm:$0xf]  ;;  %v4032_v56 = vld [vmem:[#allocation2 + $0x78] sm:$0xf0] }
  0x6f   :  { %1039 = vmatpush.bf16.msra.mxu1 %v4375_v52  ;;  %1065 = vmatpush.bf16.msra.mxu3 %v4379_v57  ;;  %v4190_v52 = vld [vmem:[#allocation2 + $0x198] sm:$0xf]  ;;  %v5945_v57 = vld [vmem:[#allocation2 + $0x19c] sm:$0xf] }
  0x70   :  { %v4191_v61 = vor.u32 %v5949_v53, %v4190_v52  ;;  %v5917_v39 = vld [vmem:[#allocation2 + $0xb4] sm:$0xf0]  ;;  %v4000_v6 = vld [vmem:[#allocation2 + $0x38] sm:$0xf0] }
  0x71   :  { %1027 = vmatpush.bf16.msra.mxu0 %v4087_v63  ;;  %1053 = vmatpush.bf16.msra.mxu2 %v4091_v2  ;;  %v4195_v63 = vor.u32 %v5945_v57, %v4192_v58  ;;  %v5941_v2 = vld [vmem:[#allocation2 + $0x174] sm:$0xf0]  ;;  %v4063_v47 = vor.u32 %v5917_v39, %v4062_v38  ;;  %v5969_v57 = vld [vmem:[#allocation2 + $0x25c] sm:$0xf]  ;;  %v4679_v39 = vld [vmem:[#allocation4 + $0x180] sm:$0xf] }
  0x72   :  { %v5981_v42 = vld [vmem:[#allocation2 + $0x2b4] sm:$0xf0]  ;;  %v4288_v58 = vld [vmem:[#allocation2 + $0x278] sm:$0xf0] }
  0x73   :  { %1040 = vmatpush.bf16.msra.mxu1 %v4343_v0  ;;  %1066 = vmatpush.bf16.msra.mxu3 %v4347_v7  ;;  %v4158_v0 = vld [vmem:[#allocation2 + $0x158] sm:$0xf]  ;;  %v5937_v7 = vld [vmem:[#allocation2 + $0x15c] sm:$0xf]  ;;  %v4291_v3 = vor.u32 %v5969_v57, %v4288_v58  ;;  %v4823_v58 = vld [vmem:[#allocation4 + $0x2a0] sm:$0xf] }
  0x74   :  { %v4159_v11 = vor.u32 %v5941_v2, %v4158_v0  ;;  %v4286_v52 = vld [vmem:[#allocation2 + $0x258] sm:$0xf] }
  0x75   :  { %1028 = vmatpush.bf16.msra.mxu0 %v4055_v13  ;;  %1054 = vmatpush.bf16.msra.mxu2 %v4059_v15  ;;  %v4163_v13 = vor.u32 %v5937_v7, %v4160_v8  ;;  %v5933_v15 = vld [vmem:[#allocation2 + $0x134] sm:$0xf0]  ;;  %v5961_v7 = vld [vmem:[#allocation2 + $0x21c] sm:$0xf] }
  0x76   :  { %v5973_v54 = vld [vmem:[#allocation2 + $0x274] sm:$0xf0]  ;;  %v4256_v8 = vld [vmem:[#allocation2 + $0x238] sm:$0xf0] }
  0x77   :  { %1041 = vmatpush.bf16.msra.mxu1 %v4311_v14  ;;  %1067 = vmatpush.bf16.msra.mxu3 %v4315_v19  ;;  %v4126_v14 = vld [vmem:[#allocation2 + $0x118] sm:$0xf]  ;;  %v5929_v19 = vld [vmem:[#allocation2 + $0x11c] sm:$0xf]  ;;  %v4259_v16 = vor.u32 %v5961_v7, %v4256_v8  ;;  %v6180_v7 = vld [vmem:[#allocation4 + $0x4ec] sm:$0xf0] }
  0x78   :  { %v4127_v23 = vor.u32 %v5933_v15, %v4126_v14  ;;  %v3998_v60 = vld [vmem:[#allocation2 + $0x18] sm:$0xf] }
  0x79   :  { %1029 = vmatpush.bf16.msra.mxu0 %v4023_v25  ;;  %1055 = vmatpush.bf16.msra.mxu2 %v4027_v29  ;;  %v4131_v25 = vor.u32 %v5929_v19, %v4128_v20  ;;  %v4387_v29 = vor.u32 %v5993_v21, %v4384_v22  ;;  %v4254_v0 = vld [vmem:[#allocation2 + $0x218] sm:$0xf]  ;;  %v6116_v19 = vld [vmem:[#allocation4 + $0x2ec] sm:$0xf0]  ;;  %v4583_v20 = vld [vmem:[#allocation4 + $0xc0] sm:$0xf] }
  0x7a   :  { %v5965_v2 = vld [vmem:[#allocation2 + $0x234] sm:$0xf0]  ;;  %v6048_v21 = vld [vmem:[#allocation4 + $0xcc] sm:$0xf0] }
  0x7b   :  { %1042 = vmatpush.bf16.msra.mxu1 %v4279_v28  ;;  %1068 = vmatpush.bf16.msra.mxu3 %v4283_v33  ;;  %v4350_v28 = vld [vmem:[#allocation2 + $0x2d8] sm:$0xf]  ;;  %v5985_v33 = vld [vmem:[#allocation2 + $0x2dc] sm:$0xf]  ;;  %v4255_v14 = vor.u32 %v5965_v2, %v4254_v0  ;;  %v4584_v26 = vor.u32 %v6048_v21, %v4583_v20  ;;  %v4967_v2 = vld [vmem:[#allocation4 + $0x3c0] sm:$0xf] }
  0x7c   :  { %v4351_v36 = vor.u32 %v5989_v30, %v4350_v28  ;;  %v4355_v41 = vor.u32 %v5985_v33, %v4352_v34  ;;  %v6112_v28 = vld [vmem:[#allocation4 + $0x2cc] sm:$0xf0]  ;;  %v4791_v20 = vld [vmem:[#allocation4 + $0x260] sm:$0xf] }
  0x7d   :  { %1030 = vmatpush.bf16.msra.mxu0 %v3991_v40  ;;  %1056 = vmatpush.bf16.msra.mxu2 %v3995_v45  ;;  %v4318_v40 = vld [vmem:[#allocation2 + $0x298] sm:$0xf]  ;;  %v5977_v45 = vld [vmem:[#allocation2 + $0x29c] sm:$0xf]  ;;  %v6044_v30 = vld [vmem:[#allocation4 + $0xac] sm:$0xf0]  ;;  %v4840_v34 = vor.u32 %v6112_v28, %v4839_v27 }
  0x7e   :  { %v4323_v53 = vor.u32 %v5977_v45, %v4320_v46  ;;  %v6076_v33 = vld [vmem:[#allocation4 + $0x1ac] sm:$0xf0]  ;;  %v5095_v27 = vld [vmem:[#allocation4 + $0x4c0] sm:$0xf] }
  0x7f   :  { %1043 = vmatpush.bf16.msra.mxu1 %v4247_v44  ;;  %1069 = vmatpush.bf16.msra.mxu3 %v4251_v48  ;;  %v4064_v44 = vld [vmem:[#allocation2 + $0xb8] sm:$0xf0]  ;;  %v4319_v48 = vor.u32 %v5981_v42, %v4318_v40  ;;  %v4696_v38 = vor.u32 %v6076_v33, %v4695_v32  ;;  %v6072_v40 = vld [vmem:[#allocation4 + $0x18c] sm:$0xf0]  ;;  %v4535_v42 = vld [vmem:[#allocation4 + $0x60] sm:$0xf] }
  0x80   :  { %1031 = vmatmul.bf16.vlgmr.msra.gmra.mxu0 %v6630_v1  ;;  %1057 = vmatmul.bf16.vlgmr.msra.gmra.mxu2 %v6630_v1  ;;  %v6068_v45 = vld [vmem:[#allocation4 + $0x16c] sm:$0xf0] }
  0x81   :  { %1075 = vmatpush.bf16.msrb.mxu0 %v4223_v49  ;;  %1101 = vmatpush.bf16.msrb.mxu2 %v4227_v51  ;;  %v4067_v49 = vor.u32 %v5913_v43, %v4064_v44  ;;  %v5909_v51 = vld [vmem:[#allocation2 + $0x74] sm:$0xf0]  ;;  %v4680_v43 = vor.u32 %v6072_v40, %v4679_v39  ;;  %v4663_v44 = vld [vmem:[#allocation4 + $0x160] sm:$0xf]  ;;  %v6148_v46 = vld [vmem:[#allocation4 + $0x3ec] sm:$0xf0] }
  0x82   :  { %1044 = vmatmul.bf16.vlgmr.msra.gmra.mxu1 %v6632_v4  ;;  %1070 = vmatmul.bf16.vlgmr.msra.gmra.mxu3 %v6632_v4  ;;  %v6100_v21 = vld [vmem:[#allocation4 + $0x26c] sm:$0xf0]  ;;  %v5079_v39 = vld [vmem:[#allocation4 + $0x4a0] sm:$0xf] }
  0x83   :  { %1088 = vmatpush.bf16.msrb.mxu1 %v4479_v50  ;;  %1114 = vmatpush.bf16.msrb.mxu3 %v4483_v55  ;;  %v4030_v50 = vld [vmem:[#allocation2 + $0x58] sm:$0xf]  ;;  %v5905_v55 = vld [vmem:[#allocation2 + $0x5c] sm:$0xf]  ;;  %v6176_v28 = vld [vmem:[#allocation4 + $0x4cc] sm:$0xf0] }
  0x84   :  { %v4031_v59 = vor.u32 %v5909_v51, %v4030_v50  ;;  %v6032_v50 = vld [vmem:[#allocation4 + $0x4c] sm:$0xf0]  ;;  %v4664_v51 = vor.u32 %v6068_v45, %v4663_v44 }
  0x85   :  { %1076 = vmatpush.bf16.msrb.mxu0 %v4191_v61  ;;  %1102 = vmatpush.bf16.msrb.mxu2 %v4195_v63  ;;  %v4287_v61 = vor.u32 %v5973_v54, %v4286_v52  ;;  %v5901_v63 = vld [vmem:[#allocation2 + $0x34] sm:$0xf0]  ;;  %v4647_v52 = vld [vmem:[#allocation4 + $0x140] sm:$0xf]  ;;  %v6208_v32 = vld [vmem:[#allocation4 + $0x5cc] sm:$0xf0] }
  0x86   :  { %v6172_v40 = vld [vmem:[#allocation4 + $0x4ac] sm:$0xf0] }
  0x87   :  { %1089 = vmatpush.bf16.msrb.mxu1 %v4447_v62  ;;  %1115 = vmatpush.bf16.msrb.mxu3 %v4451_v5  ;;  %v4035_v62 = vor.u32 %v5905_v55, %v4032_v56  ;;  %v5897_v5 = vld [vmem:[#allocation2 + $0x1c] sm:$0xf]  ;;  %v4503_v55 = vld [vmem:[#allocation4 + $0x20] sm:$0xf]  ;;  %v6028_v56 = vld [vmem:[#allocation4 + $0x2c] sm:$0xf0]  ;;  %v5080_v45 = vor.u32 %v6172_v40, %v5079_v39 }
  0x88   :  { %v4003_v15 = vor.u32 %v5897_v5, %v4000_v6  ;;  %v4504_v5 = vor.u32 %v6028_v56, %v4503_v55  ;;  %v5111_v6 = vld [vmem:[#allocation4 + $0x4e0] sm:$0xf]  ;;  %v6164_v56 = vld [vmem:[#allocation4 + $0x46c] sm:$0xf0] }
  0x89   :  { %1077 = vmatpush.bf16.msrb.mxu0 %v4159_v11  ;;  %1103 = vmatpush.bf16.msrb.mxu2 %v4163_v13  ;;  %v3999_v11 = vor.u32 %v5901_v63, %v3998_v60  ;;  %v6084_v13 = vld [vmem:[#allocation4 + $0x1ec] sm:$0xf0] }
  0x8a   :  { %v6060_v60 = vld [vmem:[#allocation4 + $0x12c] sm:$0xf0] }
  0x8b   :  { %1090 = vmatpush.bf16.msrb.mxu1 %v4415_v12  ;;  %1116 = vmatpush.bf16.msrb.mxu3 %v4419_v17  ;;  %v4727_v12 = vld [vmem:[#allocation4 + $0x1e0] sm:$0xf]  ;;  %v4600_v17 = vor.u32 %v6052_v10, %v4599_v9  ;;  %v6024_v63 = vld [vmem:[#allocation4 + $0xc] sm:$0xf0] }
  0x8c   :  { %v4728_v22 = vor.u32 %v6084_v13, %v4727_v12  ;;  %v4807_v9 = vld [vmem:[#allocation4 + $0x280] sm:$0xf]  ;;  %v6056_v12 = vld [vmem:[#allocation4 + $0x10c] sm:$0xf0] }
  0x8d   :  { %1078 = vmatpush.bf16.msrb.mxu0 %v4127_v23  ;;  %1104 = vmatpush.bf16.msrb.mxu2 %v4131_v25  ;;  %v4711_v23 = vld [vmem:[#allocation4 + $0x1c0] sm:$0xf]  ;;  %v4856_v25 = vor.u32 %v6116_v19, %v4855_v18  ;;  %v6104_v13 = vld [vmem:[#allocation4 + $0x28c] sm:$0xf0] }
  0x8e   :  { %v6212_v18 = vld [vmem:[#allocation4 + $0x5ec] sm:$0xf0] }
  0x8f   :  { %1091 = vmatpush.bf16.msrb.mxu1 %v4383_v24  ;;  %1117 = vmatpush.bf16.msrb.mxu3 %v4387_v29  ;;  %v6080_v24 = vld [vmem:[#allocation4 + $0x1cc] sm:$0xf0]  ;;  %v4567_v29 = vld [vmem:[#allocation4 + $0xa0] sm:$0xf] }
  0x90   :  { %v4712_v31 = vor.u32 %v6080_v24, %v4711_v23  ;;  %v4935_v23 = vld [vmem:[#allocation4 + $0x380] sm:$0xf]  ;;  %v5112_v24 = vor.u32 %v6180_v7, %v5111_v6  ;;  %v6120_v39 = vld [vmem:[#allocation4 + $0x30c] sm:$0xf0] }
  0x91   :  { %1079 = vmatpush.bf16.msrb.mxu0 %v4095_v35  ;;  %1105 = vmatpush.bf16.msrb.mxu2 %v4099_v37  ;;  %v4568_v35 = vor.u32 %v6044_v30, %v4567_v29  ;;  %v6040_v37 = vld [vmem:[#allocation4 + $0x8c] sm:$0xf0]  ;;  %v5223_v30 = vld [vmem:[#allocation4 + $0x5c0] sm:$0xf] }
  0x92   :  { %v5031_v6 = vld [vmem:[#allocation4 + $0x440] sm:$0xf] }
  0x93   :  { %1092 = vmatpush.bf16.msrb.mxu1 %v4351_v36  ;;  %1118 = vmatpush.bf16.msrb.mxu3 %v4355_v41  ;;  %v4551_v36 = vld [vmem:[#allocation4 + $0x80] sm:$0xf] }
  0x94   :  { %v4552_v41 = vor.u32 %v6040_v37, %v4551_v36  ;;  %v252_v36 = vld [vmem:[%s6790_s7] ss:$8 sm:$0xf] }
  0x95   :  { %1080 = vmatpush.bf16.msrb.mxu0 %v4063_v47  ;;  %1106 = vmatpush.bf16.msrb.mxu2 %v4067_v49  ;;  %v4519_v49 = vld [vmem:[#allocation4 + $0x40] sm:$0xf] }
  0x96   :  { %v4520_v54 = vor.u32 %v6032_v50, %v4519_v49  ;;  %v253_v37 = vld [vmem:[%s6790_s7] ss:$8 sm:$0xf0] }
  0x97   :  { %1093 = vmatpush.bf16.msrb.mxu1 %v4319_v48  ;;  %1119 = vmatpush.bf16.msrb.mxu3 %v4323_v53  ;;  %v6064_v53 = vld [vmem:[#allocation4 + $0x14c] sm:$0xf0]  ;;  %v6656_v44 = vor.u32 %v253_v37, %v252_v36  ;;  %v4919_v50 = vld [vmem:[#allocation4 + $0x360] sm:$0xf] }
  0x98   :  { %v4648_v57 = vor.u32 %v6064_v53, %v4647_v52  ;;  %v6200_v49 = vld [vmem:[#allocation4 + $0x58c] sm:$0xf0]  ;;  %v4999_v36 = vld [vmem:[#allocation4 + $0x400] sm:$0xf] }
  0x99   :  { %1081 = vmatpush.bf16.msrb.mxu0 %v4031_v59  ;;  %1107 = vmatpush.bf16.msrb.mxu2 %v4035_v62  ;;  %v4631_v59 = vld [vmem:[#allocation4 + $0x120] sm:$0xf]  ;;  %v256_v52 = vperm.slane %v6656_v44, 0  ;;  %v6152_v37 = vld [vmem:[#allocation4 + $0x40c] sm:$0xf0] }
  0x9a   :  { %v4487_v62 = vld [vmem:[#allocation4] sm:$0xf]  ;;  %v4632_v10 = vor.u32 %v6060_v60, %v4631_v59  ;;  %v6092_v59 = vld [vmem:[#allocation4 + $0x22c] sm:$0xf0] }
  0x9b   :  { %1094 = vmatpush.bf16.msrb.mxu1 %v4287_v61  ;;  %1120 = vmatpush.bf16.msrb.mxu3 %v4291_v3  ;;  %v6108_v61 = vld [vmem:[#allocation4 + $0x2ac] sm:$0xf0] }
  0x9c   :  { %v4824_v0 = vor.u32 %v6108_v61, %v4823_v58  ;;  %v6144_v3 = vld [vmem:[#allocation4 + $0x3cc] sm:$0xf0]  ;;  %v4759_v58 = vld [vmem:[#allocation4 + $0x220] sm:$0xf] }
  0x9d   :  { %1082 = vmatpush.bf16.msrb.mxu0 %v3999_v11  ;;  %1108 = vmatpush.bf16.msrb.mxu2 %v4003_v15  ;;  %v4968_v8 = vor.u32 %v6144_v3, %v4967_v2  ;;  %v4615_v11 = vld [vmem:[#allocation4 + $0x100] sm:$0xf]  ;;  %v4808_v15 = vor.u32 %v6104_v13, %v4807_v9  ;;  %v4760_v60 = vor.u32 %v6092_v59, %v4759_v58  ;;  %v257_v3 = vperm.slane %v6656_v44, 1  ;;  %v6088_v13 = vld [vmem:[#allocation4 + $0x20c] sm:$0xf0] }
  0x9e   :  { %v5175_v61 = vld [vmem:[#allocation4 + $0x560] sm:$0xf]  ;;  %v5000_v59 = vor.u32 %v6152_v37, %v4999_v36  ;;  %v258_v36 = vperm.slane %v6656_v44, 2  ;;  %v6070_v37 = vld [vmem:[#allocation4 + $0x184] sm:$0xf] }
  0x9f   :  { %1095 = vmatpush.bf16.msrb.mxu1 %v4255_v14  ;;  %1121 = vmatpush.bf16.msrb.mxu3 %v4259_v16  ;;  %v5239_v14 = vld [vmem:[#allocation4 + $0x5e0] sm:$0xf] }
  0xa0   :  { %1083 = vmatmul.bf16.vlgmr.msrb.gmra.mxu0 %v6630_v1  ;;  %1109 = vmatmul.bf16.vlgmr.msrb.gmra.mxu2 %v6630_v1  ;;  %v6036_v1 = vld [vmem:[#allocation4 + $0x6c] sm:$0xf0]  ;;  %v4951_v16 = vld [vmem:[#allocation4 + $0x3a0] sm:$0xf]  ;;  %v5240_v29 = vor.u32 %v6212_v18, %v5239_v14 }
  0xa1   :  { %2706 = vmatpush.bf16.msra.mxu0 %v4600_v17  ;;  %2732 = vmatpush.bf16.msra.mxu2 %v4856_v25  ;;  %v4536_v48 = vor.u32 %v6036_v1, %v4535_v42  ;;  %v6140_v17 = vld [vmem:[#allocation4 + $0x3ac] sm:$0xf0]  ;;  %v4616_v25 = vor.u32 %v6056_v12, %v4615_v11  ;;  %v5207_v1 = vld [vmem:[#allocation4 + $0x5a0] sm:$0xf] }
  0xa2   :  { %1096 = vmatmul.bf16.vlgmr.msrb.gmra.mxu1 %v6632_v4  ;;  %1122 = vmatmul.bf16.vlgmr.msrb.gmra.mxu3 %v6632_v4  ;;  %v4983_v4 = vld [vmem:[#allocation4 + $0x3e0] sm:$0xf]  ;;  %v4952_v19 = vor.u32 %v6140_v17, %v4951_v16  ;;  %v6192_v16 = vld [vmem:[#allocation4 + $0x54c] sm:$0xf0] }
  0xa3   :  { %2719 = vmatpush.bf16.msra.mxu1 %v4728_v22  ;;  %v4984_v47 = vor.u32 %v6148_v46, %v4983_v4  ;;  %v4488_v22 = vor.u32 %v6024_v63, %v4487_v62  ;;  %v5063_v4 = vld [vmem:[#allocation4 + $0x480] sm:$0xf]  ;;  %v6168_v46 = vld [vmem:[#allocation4 + $0x48c] sm:$0xf0] }
  0xa4   :  { %v5064_v53 = vor.u32 %v6168_v46, %v5063_v4  ;;  %v6196_v62 = vld [vmem:[#allocation4 + $0x56c] sm:$0xf0]  ;;  %v4903_v63 = vld [vmem:[#allocation4 + $0x340] sm:$0xf] }
  0xa5   :  { %2707 = vmatpush.bf16.msra.mxu0 %v4584_v26  ;;  %2733 = vmatpush.bf16.msra.mxu2 %v4840_v34  ;;  %v6136_v26 = vld [vmem:[#allocation4 + $0x38c] sm:$0xf0]  ;;  %v4775_v34 = vld [vmem:[#allocation4 + $0x240] sm:$0xf]  ;;  %v5176_v11 = vor.u32 %v6196_v62, %v5175_v61 }
  0xa6   :  { %2745 = vmatpush.bf16.msra.mxu3 %v4984_v47  ;;  %v4936_v33 = vor.u32 %v6136_v26, %v4935_v23  ;;  %v4743_v12 = vld [vmem:[#allocation4 + $0x200] sm:$0xf]  ;;  %v6156_v23 = vld [vmem:[#allocation4 + $0x42c] sm:$0xf0] }
  0xa7   :  { %2720 = vmatpush.bf16.msra.mxu1 %v4712_v31  ;;  %v4792_v31 = vor.u32 %v6100_v21, %v4791_v20  ;;  %v4744_v14 = vor.u32 %v6088_v13, %v4743_v12  ;;  %v5015_v18 = vld [vmem:[#allocation4 + $0x420] sm:$0xf]  ;;  %v6124_v20 = vld [vmem:[#allocation4 + $0x32c] sm:$0xf0]  ;;  %v6078_v13 = vld [vmem:[#allocation4 + $0x1c4] sm:$0xf] }
  0xa8   :  { %v6244_v26 = vld [vmem:[#allocation4 + $0x6ec] sm:$0xf0]  ;;  %v5335_v61 = vld [vmem:[#allocation4 + $0x6a0] sm:$0xf] }
  0xa9   :  { %2708 = vmatpush.bf16.msra.mxu0 %v4568_v35  ;;  %2734 = vmatpush.bf16.msra.mxu2 %v4824_v0  ;;  %v6096_v35 = vld [vmem:[#allocation4 + $0x24c] sm:$0xf0] }
  0xaa   :  { %2746 = vmatpush.bf16.msra.mxu3 %v4968_v8  ;;  %v4776_v42 = vor.u32 %v6096_v35, %v4775_v34  ;;  %v6128_v0 = vld [vmem:[#allocation4 + $0x34c] sm:$0xf0]  ;;  %v5016_v35 = vor.u32 %v6156_v23, %v5015_v18  ;;  %v4569_v23 = vld [vmem:[#allocation4 + $0xb0] sm:$0xf0] }
  0xab   :  { %2721 = vmatpush.bf16.msra.mxu1 %v4696_v38  ;;  %v5096_v38 = vor.u32 %v6176_v28, %v5095_v27  ;;  %v4904_v7 = vor.u32 %v6128_v0, %v4903_v63  ;;  %v6240_v4 = vld [vmem:[#allocation4 + $0x6cc] sm:$0xf0] }
  0xac   :  { %v6236_v62 = vld [vmem:[#allocation4 + $0x6ac] sm:$0xf0] }
  0xad   :  { %2709 = vmatpush.bf16.msra.mxu0 %v4552_v41  ;;  %2735 = vmatpush.bf16.msra.mxu2 %v4808_v15  ;;  %v5224_v41 = vor.u32 %v6208_v32, %v5223_v30  ;;  %v5159_v15 = vld [vmem:[#allocation4 + $0x540] sm:$0xf]  ;;  %v6188_v32 = vld [vmem:[#allocation4 + $0x52c] sm:$0xf0] }
  0xae   :  { %2747 = vmatpush.bf16.msra.mxu3 %v4952_v19  ;;  %v4887_v19 = vld [vmem:[#allocation4 + $0x320] sm:$0xf]  ;;  %v6268_v18 = vld [vmem:[#allocation4 + $0x7ac] sm:$0xf0] }
  0xaf   :  { %2722 = vmatpush.bf16.msra.mxu1 %v4680_v43  ;;  %v6204_v43 = vld [vmem:[#allocation4 + $0x5ac] sm:$0xf0] }
  0xb0   :  { %v5208_v47 = vor.u32 %v6204_v43, %v5207_v1  ;;  %v6050_v1 = vld [vmem:[#allocation4 + $0xe4] sm:$0xf] }
  0xb1   :  { %2710 = vmatpush.bf16.msra.mxu0 %v4536_v48  ;;  %2736 = vmatpush.bf16.msra.mxu2 %v4792_v31  ;;  %v5191_v48 = vld [vmem:[#allocation4 + $0x580] sm:$0xf] }
  0xb2   :  { %2748 = vmatpush.bf16.msra.mxu3 %v4936_v33  ;;  %v5143_v31 = vld [vmem:[#allocation4 + $0x520] sm:$0xf] }
  0xb3   :  { %2723 = vmatpush.bf16.msra.mxu1 %v4664_v51  ;;  %v6132_v51 = vld [vmem:[#allocation4 + $0x36c] sm:$0xf0] }
  0xb4   :  { %v4920_v55 = vor.u32 %v6132_v51, %v4919_v50  ;;  %v5127_v50 = vld [vmem:[#allocation4 + $0x500] sm:$0xf]  ;;  %v6184_v51 = vld [vmem:[#allocation4 + $0x50c] sm:$0xf0] }
  0xb5   :  { %2711 = vmatpush.bf16.msra.mxu0 %v4520_v54  ;;  %2737 = vmatpush.bf16.msra.mxu2 %v4776_v42  ;;  %v5047_v54 = vld [vmem:[#allocation4 + $0x460] sm:$0xf] }
  0xb6   :  { %2749 = vmatpush.bf16.msra.mxu3 %v4920_v55  ;;  %v6082_v55 = vld [vmem:[#allocation4 + $0x1e4] sm:$0xf] }
  0xb7   :  { %2724 = vmatpush.bf16.msra.mxu1 %v4648_v57  ;;  %v5192_v57 = vor.u32 %v6200_v49, %v5191_v48  ;;  %v5144_v48 = vor.u32 %v6188_v32, %v5143_v31  ;;  %v6038_v32 = vld [vmem:[#allocation4 + $0x84] sm:$0xf] }
  0xb9   :  { %2712 = vmatpush.bf16.msra.mxu0 %v4504_v5  ;;  %v5048_v5 = vor.u32 %v6164_v56, %v5047_v54  ;;  %2738 = vmatpush.bf16.msra.mxu2 %v4760_v60  ;;  %v6276_v54 = vld [vmem:[#allocation4 + $0x7ec] sm:$0xf0]  ;;  %v4729_v56 = vld [vmem:[#allocation4 + $0x1f0] sm:$0xf0] }
  0xba   :  { %2750 = vmatpush.bf16.msra.mxu3 %v4904_v7  ;;  %v6046_v7 = vld [vmem:[#allocation4 + $0xc4] sm:$0xf] }
  0xbb   :  { %2725 = vmatpush.bf16.msra.mxu1 %v4632_v10  ;;  %v6160_v10 = vld [vmem:[#allocation4 + $0x44c] sm:$0xf0] }
  0xbd   :  { %2713 = vmatpush.bf16.msra.mxu0 %v4488_v22  ;;  %v5032_v22 = vor.u32 %v6160_v10, %v5031_v6  ;;  %2739 = vmatpush.bf16.msra.mxu2 %v4744_v14  ;;  %v6272_v6 = vld [vmem:[#allocation4 + $0x7cc] sm:$0xf0]  ;;  %v4713_v14 = vld [vmem:[#allocation4 + $0x1d0] sm:$0xf0] }
  0xbf   :  { %2726 = vmatpush.bf16.msra.mxu1 %v4616_v25  ;;  %v928_v2 = vpop.f32.mrf.mxu0  ;;  %v5367_v25 = vld [vmem:[#allocation4 + $0x6e0] sm:$0xf] }
  0xc0   :  { %v929_v8 = vadd.f32 %v928_v2, %v256_v52  ;;  %v5368_v30 = vor.u32 %v6244_v26, %v5367_v25  ;;  %v5128_v2 = vor.u32 %v6184_v51, %v5127_v50  ;;  %v6074_v26 = vld [vmem:[#allocation4 + $0x1a4] sm:$0xf] }
  0xc1   :  { %2758 = vmatpush.bf16.msrb.mxu0 %v5112_v24  ;;  %v941_v9 = vpop.f32.mrf.mxu1  ;;  %v4888_v24 = vor.u32 %v6124_v20, %v4887_v19  ;;  %v5303_v20 = vld [vmem:[#allocation4 + $0x660] sm:$0xf] }
  0xc2   :  { %v942_v17 = vadd.f32 %v941_v9, %v929_v8  ;;  %2784 = vmatpush.bf16.msrb.mxu2 %v5368_v30  ;;  %v4585_v8 = vld [vmem:[#allocation4 + $0xd0] sm:$0xf0]  ;;  %v4732_v9 = vor.u32 %v6082_v55, %v4729_v56  ;;  %v6220_v55 = vld [vmem:[#allocation4 + $0x62c] sm:$0xf0] }
  0xc3   :  { %2771 = vmatpush.bf16.msrb.mxu1 %v5240_v29  ;;  %v5160_v29 = vor.u32 %v6192_v16, %v5159_v15  ;;  %2751 = vmatpush.bf16.msra.mxu3 %v4888_v24  ;;  %v6232_v15 = vld [vmem:[#allocation4 + $0x68c] sm:$0xf0]  ;;  %v4588_v19 = vor.u32 %v6046_v7, %v4585_v8  ;;  %v4716_v24 = vor.u32 %v6078_v13, %v4713_v14  ;;  %v4649_v7 = vld [vmem:[#allocation4 + $0x150] sm:$0xf0]  ;;  %v5255_v8 = vld [vmem:[#allocation4 + $0x600] sm:$0xf] }
  0xc4   :  { %vm1127_vm0 = vcmp.ge.f32.partialorder %v942_v17, 0.0  ;;  %v1135_v27 = vmul.f32 0.01, %v942_v17  ;;  %v6114_v14 = vld [vmem:[#allocation4 + $0x2e4] sm:$0xf] }
  0xc5   :  { %2759 = vmatpush.bf16.msrb.mxu0 %v5096_v38  ;;  %v954_v21 = vpop.f32.mrf.mxu2  ;;  %v4871_v38 = vld [vmem:[#allocation4 + $0x300] sm:$0xf] }
  0xc6   :  { %v955_v28 = vadd.f32 %v954_v21, %v257_v3  ;;  %v1143_v33 = vsel %vm1127_vm0, %v942_v17, %v1135_v27  ;;  %v4872_v43 = vor.u32 %v6120_v39, %v4871_v38  ;;  %v5336_v3 = vor.u32 %v6236_v62, %v5335_v61  ;;  %v5463_v17 = vld [vmem:[#allocation4 + $0x7a0] sm:$0xf]  ;;  %v6228_v21 = vld [vmem:[#allocation4 + $0x66c] sm:$0xf0]  ;;  %v4697_v27 = vld [vmem:[#allocation4 + $0x1b0] sm:$0xf0] }
  0xc7   :  { %2772 = vmatpush.bf16.msrb.mxu1 %v5224_v41  ;;  %v967_v34 = vpop.f32.mrf.mxu3  ;;  %v6660_v40 = vpack.c.bf16 %v1143_v33, %v1143_v33  ;;  %v930_v41 = vpop.f32.mrf.mxu0  ;;  %v5464_v25 = vor.u32 %v6268_v18, %v5463_v17  ;;  %v5304_v30 = vor.u32 %v6228_v21, %v5303_v20  ;;  %v4553_v33 = vld [vmem:[#allocation4 + $0x90] sm:$0xf0]  ;;  %v5287_v39 = vld [vmem:[#allocation4 + $0x640] sm:$0xf]  ;;  %v6026_v20 = vld [vmem:[#allocation4 + $0x24] sm:$0xf] }
  0xc8   :  { %v968_v42 = vadd.f32 %v967_v34, %v955_v28  ;;  %2752 = vmatpush.bf16.msra.mxu3 %v4872_v43  ;;  %v5447_v28 = vld [vmem:[#allocation4 + $0x780] sm:$0xf]  ;;  %v4700_v34 = vor.u32 %v6074_v26, %v4697_v27  ;;  %v4681_v38 = vld [vmem:[#allocation4 + $0x190] sm:$0xf0]  ;;  %v6224_v41 = vld [vmem:[#allocation4 + $0x64c] sm:$0xf0] }
  0xc9   :  { %2760 = vmatpush.bf16.msrb.mxu0 %v5080_v45  ;;  %v5351_v45 = vld [vmem:[#allocation4 + $0x6c0] sm:$0xf]  ;;  %v943_v46 = vpop.f32.mrf.mxu1  ;;  %v5288_v43 = vor.u32 %v6224_v41, %v5287_v39  ;;  %v4505_v21 = vld [vmem:[#allocation4 + $0x30] sm:$0xf0]  ;;  %v6252_v26 = vld [vmem:[#allocation4 + $0x72c] sm:$0xf0] }
  0xca   :  { %v5352_v49 = vor.u32 %v6240_v4, %v5351_v45  ;;  %vm1128_vm1 = vcmp.ge.f32.partialorder %v968_v42, 0.0  ;;  %v1136_v52 = vmul.f32 0.01, %v968_v42  ;;  %2714 = vmatmul.bf16.vlgmr.msra.gmra.mxu0 %v6660_v40  ;;  %v4537_v4 = vld [vmem:[#allocation4 + $0x70] sm:$0xf0]  ;;  %v4684_v46 = vor.u32 %v6070_v37, %v4681_v38 }
  0xcb   :  { %2773 = vmatpush.bf16.msrb.mxu1 %v5208_v47  ;;  %v4601_v47 = vld [vmem:[#allocation4 + $0xf0] sm:$0xf0]  ;;  %v6058_v27 = vld [vmem:[#allocation4 + $0x124] sm:$0xf]  ;;  %v5383_v39 = vld [vmem:[#allocation4 + $0x700] sm:$0xf] }
  0xcc   :  { %2785 = vmatpush.bf16.msrb.mxu2 %v5352_v49  ;;  %v4604_v0 = vor.u32 %v6050_v1, %v4601_v47  ;;  %v6034_v1 = vld [vmem:[#allocation4 + $0x64] sm:$0xf]  ;;  %v5431_v47 = vld [vmem:[#allocation4 + $0x760] sm:$0xf]  ;;  %v6248_v41 = vld [vmem:[#allocation4 + $0x70c] sm:$0xf0] }
  0xcd   :  { %2761 = vmatpush.bf16.msrb.mxu0 %v5064_v53  ;;  %v5495_v53 = vld [vmem:[#allocation4 + $0x7e0] sm:$0xf]  ;;  %v956_v58 = vpop.f32.mrf.mxu2 }
  0xce   :  { %v5496_v60 = vor.u32 %v6276_v54, %v5495_v53  ;;  %v4665_v53 = vld [vmem:[#allocation4 + $0x170] sm:$0xf0]  ;;  %v5271_v54 = vld [vmem:[#allocation4 + $0x620] sm:$0xf]  ;;  %v4540_v58 = vor.u32 %v6034_v1, %v4537_v4  ;;  %v6146_v4 = vld [vmem:[#allocation4 + $0x3e4] sm:$0xf] }
  0xcf   :  { %2774 = vmatpush.bf16.msrb.mxu1 %v5192_v57  ;;  %v1144_v57 = vsel %vm1128_vm1, %v968_v42, %v1136_v52  ;;  %v969_v12 = vpop.f32.mrf.mxu3  ;;  %v4556_v42 = vor.u32 %v6038_v32, %v4553_v33  ;;  %v6066_v52 = vld [vmem:[#allocation4 + $0x164] sm:$0xf]  ;;  %v5272_v61 = vor.u32 %v6220_v55, %v5271_v54  ;;  %v4825_v54 = vld [vmem:[#allocation4 + $0x2b0] sm:$0xf0] }
  0xd0   :  { %v6663_v63 = vpack.c.bf16 %v1144_v57, %v1144_v57  ;;  %2797 = vmatpush.bf16.msrb.mxu3 %v5496_v60  ;;  %2786 = vmatpush.bf16.msrb.mxu2 %v5336_v3  ;;  %v259_v57 = vperm.slane %v6656_v44, 3  ;;  %v4521_v60 = vld [vmem:[#allocation4 + $0x50] sm:$0xf0]  ;;  %v4668_v62 = vor.u32 %v6066_v52, %v4665_v53  ;;  %v6062_v3 = vld [vmem:[#allocation4 + $0x144] sm:$0xf] }
  0xd1   :  { %2762 = vmatpush.bf16.msrb.mxu0 %v5048_v5  ;;  %v5479_v5 = vld [vmem:[#allocation4 + $0x7c0] sm:$0xf]  ;;  %v6022_v32 = vld [vmem:[#allocation4 + $0x4] sm:$0xf] }
  0xd2   :  { %v5480_v10 = vor.u32 %v6272_v6, %v5479_v5  ;;  %2727 = vmatmul.bf16.vlgmr.msra.gmra.mxu1 %v6663_v63  ;;  %v6110_v33 = vld [vmem:[#allocation4 + $0x2c4] sm:$0xf] }
  0xd3   :  { %2775 = vmatpush.bf16.msrb.mxu1 %v5176_v11  ;;  %v5319_v11 = vld [vmem:[#allocation4 + $0x680] sm:$0xf] }
  0xd4   :  { %v5320_v16 = vor.u32 %v6232_v15, %v5319_v11  ;;  %2798 = vmatpush.bf16.msrb.mxu3 %v5480_v10  ;;  %v4857_v15 = vld [vmem:[#allocation4 + $0x2f0] sm:$0xf0] }
  0xd5   :  { %2763 = vmatpush.bf16.msrb.mxu0 %v5032_v22  ;;  %v6042_v22 = vld [vmem:[#allocation4 + $0xa4] sm:$0xf] }
  0xd6   :  { %2787 = vmatpush.bf16.msrb.mxu2 %v5320_v16  ;;  %v4572_v31 = vor.u32 %v6042_v22, %v4569_v23  ;;  %v4652_v22 = vor.u32 %v6062_v3, %v4649_v7  ;;  %v5399_v23 = vld [vmem:[#allocation4 + $0x720] sm:$0xf]  ;;  %v6098_v3 = vld [vmem:[#allocation4 + $0x264] sm:$0xf] }
  0xd7   :  { %2776 = vmatpush.bf16.msrb.mxu1 %v5160_v29  ;;  %v6264_v29 = vld [vmem:[#allocation4 + $0x78c] sm:$0xf0]  ;;  %v6134_v7 = vld [vmem:[#allocation4 + $0x384] sm:$0xf] }
  0xd8   :  { %2799 = vmatpush.bf16.msrb.mxu3 %v5464_v25  ;;  %v4860_v25 = vor.u32 %v6114_v14, %v4857_v15  ;;  %v6130_v14 = vld [vmem:[#allocation4 + $0x364] sm:$0xf]  ;;  %v4921_v15 = vld [vmem:[#allocation4 + $0x370] sm:$0xf0] }
  0xd9   :  { %2764 = vmatpush.bf16.msrb.mxu0 %v5016_v35  ;;  %v5448_v35 = vor.u32 %v6264_v29, %v5447_v28  ;;  %v4633_v28 = vld [vmem:[#allocation4 + $0x130] sm:$0xf0] }
  0xda   :  { %2788 = vmatpush.bf16.msrb.mxu2 %v5304_v30  ;;  %v5400_v30 = vor.u32 %v6252_v26, %v5399_v23  ;;  %v4636_v37 = vor.u32 %v6058_v27, %v4633_v28  ;;  %v4905_v26 = vld [vmem:[#allocation4 + $0x350] sm:$0xf0]  ;;  %v261_v27 = vperm.slane %v6656_v44, 5  ;;  %v6178_v28 = vld [vmem:[#allocation4 + $0x4e4] sm:$0xf] }
  0xdb   :  { %2777 = vmatpush.bf16.msrb.mxu1 %v5144_v48  ;;  %v6260_v48 = vld [vmem:[#allocation4 + $0x76c] sm:$0xf0] }
  0xdc   :  { %2800 = vmatpush.bf16.msrb.mxu3 %v5448_v35  ;;  %v5432_v51 = vor.u32 %v6260_v48, %v5431_v47 }
  0xdd   :  { %2765 = vmatpush.bf16.msrb.mxu0 %v5000_v59  ;;  %v980_v45 = vpop.f32.mrf.mxu0  ;;  %v6030_v59 = vld [vmem:[#allocation4 + $0x44] sm:$0xf] }
  0xde   :  { %v981_v49 = vadd.f32 %v980_v45, %v258_v36  ;;  %2789 = vmatpush.bf16.msrb.mxu2 %v5288_v43  ;;  %v4524_v12 = vor.u32 %v6030_v59, %v4521_v60  ;;  %v4489_v36 = vld [vmem:[#allocation4 + $0x10] sm:$0xf0]  ;;  %v5384_v43 = vor.u32 %v6248_v41, %v5383_v39  ;;  %v6102_v59 = vld [vmem:[#allocation4 + $0x284] sm:$0xf] }
  0xdf   :  { %2778 = vmatpush.bf16.msrb.mxu1 %v5128_v2  ;;  %v993_v50 = vpop.f32.mrf.mxu1  ;;  %v6256_v2 = vld [vmem:[#allocation4 + $0x74c] sm:$0xf0]  ;;  %v4617_v45 = vld [vmem:[#allocation4 + $0x110] sm:$0xf0] }
  0xe0   :  { %v994_v56 = vadd.f32 %v993_v50, %v981_v49  ;;  %2801 = vmatpush.bf16.msrb.mxu3 %v5432_v51  ;;  %v4492_v49 = vor.u32 %v6022_v32, %v4489_v36  ;;  %v6106_v51 = vld [vmem:[#allocation4 + $0x2a4] sm:$0xf]  ;;  %v4809_v60 = vld [vmem:[#allocation4 + $0x290] sm:$0xf0] }
  0xe1   :  { %2810 = vmatpush.bf16.msra.mxu0 %v4604_v0  ;;  %v5415_v0 = vld [vmem:[#allocation4 + $0x740] sm:$0xf]  ;;  %v4828_v55 = vor.u32 %v6106_v51, %v4825_v54  ;;  %v6086_v32 = vld [vmem:[#allocation4 + $0x204] sm:$0xf]  ;;  %v5241_v51 = vld [vmem:[#allocation4 + $0x5f0] sm:$0xf0] }
  0xe2   :  { %vm1129_vm2 = vcmp.ge.f32.partialorder %v994_v56, 0.0  ;;  %v1137_v5 = vmul.f32 0.01, %v994_v56  ;;  %v5416_v6 = vor.u32 %v6256_v2, %v5415_v0  ;;  %2790 = vmatpush.bf16.msrb.mxu2 %v5272_v61  ;;  %v4812_v61 = vor.u32 %v6102_v59, %v4809_v60  ;;  %v4953_v0 = vld [vmem:[#allocation4 + $0x3b0] sm:$0xf0] }
  0xe3   :  { %2823 = vmatpush.bf16.msra.mxu1 %v4732_v9  ;;  %v6216_v9 = vld [vmem:[#allocation4 + $0x60c] sm:$0xf0]  ;;  %v1006_v11 = vpop.f32.mrf.mxu2  ;;  %v6118_v54 = vld [vmem:[#allocation4 + $0x304] sm:$0xf] }
  0xe4   :  { %v1145_v10 = vsel %vm1129_vm2, %v994_v56, %v1137_v5  ;;  %v5256_v13 = vor.u32 %v6216_v9, %v5255_v8  ;;  %v1007_v17 = vadd.f32 %v1006_v11, %v259_v57  ;;  %2802 = vmatpush.bf16.msrb.mxu3 %v5416_v6  ;;  %v6142_v56 = vld [vmem:[#allocation4 + $0x3c4] sm:$0xf]  ;;  %v4969_v57 = vld [vmem:[#allocation4 + $0x3d0] sm:$0xf0]  ;;  %v260_v9 = vperm.slane %v6656_v44, 4 }
  0xe5   :  { %2811 = vmatpush.bf16.msra.mxu0 %v4588_v19  ;;  %v6668_v16 = vpack.c.bf16 %v1145_v10, %v1145_v10  ;;  %v1019_v18 = vpop.f32.mrf.mxu3  ;;  %v982_v19 = vpop.f32.mrf.mxu0  ;;  %v4793_v5 = vld [vmem:[#allocation4 + $0x270] sm:$0xf0]  ;;  %v6094_v11 = vld [vmem:[#allocation4 + $0x244] sm:$0xf] }
  0xe6   :  { %v1020_v29 = vadd.f32 %v1019_v18, %v1007_v17  ;;  %2791 = vmatpush.bf16.msrb.mxu2 %v5256_v13  ;;  %v4796_v6 = vor.u32 %v6098_v3, %v4793_v5  ;;  %v4937_v8 = vld [vmem:[#allocation4 + $0x390] sm:$0xf0] }
  0xe7   :  { %2824 = vmatpush.bf16.msra.mxu1 %v4716_v24  ;;  %v995_v24 = vpop.f32.mrf.mxu1  ;;  %2740 = vmatmul.bf16.vlgmr.msra.gmra.mxu2 %v6668_v16  ;;  %v4940_v10 = vor.u32 %v6134_v7, %v4937_v8  ;;  %v5225_v3 = vld [vmem:[#allocation4 + $0x5d0] sm:$0xf0] }
  0xe8   :  { %vm1130_vm3 = vcmp.ge.f32.partialorder %v1020_v29, 0.0  ;;  %v1138_v35 = vmul.f32 0.01, %v1020_v29  ;;  %2803 = vmatpush.bf16.msrb.mxu3 %v5400_v30  ;;  %v5065_v7 = vld [vmem:[#allocation4 + $0x490] sm:$0xf0] }
  0xe9   :  { %2812 = vmatpush.bf16.msra.mxu0 %v4572_v31  ;;  %v4508_v31 = vor.u32 %v6026_v20, %v4505_v21  ;;  %v4924_v20 = vor.u32 %v6130_v14, %v4921_v15  ;;  %v6090_v21 = vld [vmem:[#allocation4 + $0x224] sm:$0xf] }
  0xea   :  { %2836 = vmatpush.bf16.msra.mxu2 %v4860_v25  ;;  %v1146_v1 = vsel %vm1130_vm3, %v1020_v29, %v1138_v35  ;;  %v6126_v25 = vld [vmem:[#allocation4 + $0x344] sm:$0xf]  ;;  %v5113_v29 = vld [vmem:[#allocation4 + $0x4f0] sm:$0xf0] }
  0xeb   :  { %2825 = vmatpush.bf16.msra.mxu1 %v4700_v34  ;;  %v4841_v34 = vld [vmem:[#allocation4 + $0x2d0] sm:$0xf0]  ;;  %v6671_v47 = vpack.c.bf16 %v1146_v1, %v1146_v1  ;;  %v1008_v48 = vpop.f32.mrf.mxu2  ;;  %v5116_v36 = vor.u32 %v6178_v28, %v5113_v29 }
  0xec   :  { %v4844_v38 = vor.u32 %v6110_v33, %v4841_v34  ;;  %2804 = vmatpush.bf16.msrb.mxu3 %v5384_v43  ;;  %v4745_v33 = vld [vmem:[#allocation4 + $0x210] sm:$0xf0] }
  0xed   :  { %2813 = vmatpush.bf16.msra.mxu0 %v4556_v42  ;;  %v6054_v42 = vld [vmem:[#allocation4 + $0x104] sm:$0xf]  ;;  %v1021_v52 = vpop.f32.mrf.mxu3  ;;  %2753 = vmatmul.bf16.vlgmr.msra.gmra.mxu3 %v6671_v47  ;;  %v5097_v1 = vld [vmem:[#allocation4 + $0x4d0] sm:$0xf0] }
  0xee   :  { %2837 = vmatpush.bf16.msra.mxu2 %v4844_v38  ;;  %v4620_v53 = vor.u32 %v6054_v42, %v4617_v45  ;;  %v4748_v38 = vor.u32 %v6086_v32, %v4745_v33  ;;  %v6122_v45 = vld [vmem:[#allocation4 + $0x324] sm:$0xf]  ;;  %v263_v33 = vperm.slane %v6656_v44, 7 }
  0xef   :  { %2826 = vmatpush.bf16.msra.mxu1 %v4684_v46  ;;  %v4985_v46 = vld [vmem:[#allocation4 + $0x3f0] sm:$0xf0] }
  0xf0   :  { %v4988_v50 = vor.u32 %v6146_v4, %v4985_v46  ;;  %v4889_v4 = vld [vmem:[#allocation4 + $0x330] sm:$0xf0] }
  0xf1   :  { %2814 = vmatpush.bf16.msra.mxu0 %v4540_v58  ;;  %v4972_v58 = vor.u32 %v6142_v56, %v4969_v57  ;;  %v4892_v48 = vor.u32 %v6122_v45, %v4889_v4  ;;  %v5081_v57 = vld [vmem:[#allocation4 + $0x4b0] sm:$0xf0] }
  0xf2   :  { %2849 = vmatpush.bf16.msra.mxu3 %v4988_v50  ;;  %2838 = vmatpush.bf16.msra.mxu2 %v4828_v55  ;;  %v6210_v50 = vld [vmem:[#allocation4 + $0x5e4] sm:$0xf]  ;;  %v4873_v55 = vld [vmem:[#allocation4 + $0x310] sm:$0xf0] }
  0xf3   :  { %2827 = vmatpush.bf16.msra.mxu1 %v4668_v62  ;;  %v6138_v62 = vld [vmem:[#allocation4 + $0x3a4] sm:$0xf]  ;;  %v5244_v60 = vor.u32 %v6210_v50, %v5241_v51 }
  0xf4   :  { %v4956_v2 = vor.u32 %v6138_v62, %v4953_v0 }
  0xf5   :  { %2815 = vmatpush.bf16.msra.mxu0 %v4524_v12  ;;  %v4777_v12 = vld [vmem:[#allocation4 + $0x250] sm:$0xf0] }
  0xf6   :  { %2850 = vmatpush.bf16.msra.mxu3 %v4972_v58  ;;  %2839 = vmatpush.bf16.msra.mxu2 %v4812_v61  ;;  %v4780_v13 = vor.u32 %v6094_v11, %v4777_v12  ;;  %v4876_v58 = vor.u32 %v6118_v54, %v4873_v55  ;;  %v5209_v11 = vld [vmem:[#allocation4 + $0x5b0] sm:$0xf0]  ;;  %v6162_v12 = vld [vmem:[#allocation4 + $0x464] sm:$0xf] }
  0xf7   :  { %2828 = vmatpush.bf16.msra.mxu1 %v4652_v22  ;;  %v4761_v22 = vld [vmem:[#allocation4 + $0x230] sm:$0xf0] }
  0xf8   :  { %v4764_v23 = vor.u32 %v6090_v21, %v4761_v22  ;;  %v262_v22 = vperm.slane %v6656_v44, 6 }
  0xf9   :  { %2816 = vmatpush.bf16.msra.mxu0 %v4508_v31  ;;  %v4908_v31 = vor.u32 %v6126_v25, %v4905_v26  ;;  %v5177_v25 = vld [vmem:[#allocation4 + $0x570] sm:$0xf0]  ;;  %v6154_v26 = vld [vmem:[#allocation4 + $0x424] sm:$0xf] }
  0xfa   :  { %2851 = vmatpush.bf16.msra.mxu3 %v4956_v2  ;;  %2840 = vmatpush.bf16.msra.mxu2 %v4796_v6  ;;  %v6206_v2 = vld [vmem:[#allocation4 + $0x5c4] sm:$0xf] }
  0xfb   :  { %2829 = vmatpush.bf16.msra.mxu1 %v4636_v37  ;;  %v6174_v37 = vld [vmem:[#allocation4 + $0x4c4] sm:$0xf]  ;;  %v5228_v8 = vor.u32 %v6206_v2, %v5225_v3  ;;  %v5129_v3 = vld [vmem:[#allocation4 + $0x510] sm:$0xf0] }
  0xfc   :  { %v5100_v52 = vor.u32 %v6174_v37, %v5097_v1  ;;  %v6166_v6 = vld [vmem:[#allocation4 + $0x484] sm:$0xf]  ;;  %v4607_v1 = vld [vmem:[#allocation4 + $0xe8] sm:$0xf] }
  0xfd   :  { %2817 = vmatpush.bf16.msra.mxu0 %v4492_v49  ;;  %v1032_v17 = vpop.f32.mrf.mxu0  ;;  %v6150_v37 = vld [vmem:[#allocation4 + $0x404] sm:$0xf] }
  0xfe   :  { %v1033_v18 = vadd.f32 %v1032_v17, %v260_v9  ;;  %2852 = vmatpush.bf16.msra.mxu3 %v4940_v10  ;;  %2841 = vmatpush.bf16.msra.mxu2 %v4780_v13  ;;  %v5068_v9 = vor.u32 %v6166_v6, %v5065_v7  ;;  %v6202_v10 = vld [vmem:[#allocation4 + $0x5a4] sm:$0xf]  ;;  %v5049_v13 = vld [vmem:[#allocation4 + $0x470] sm:$0xf0] }
  0xff   :  { %2830 = vmatpush.bf16.msra.mxu1 %v4620_v53  ;;  %v1045_v19 = vpop.f32.mrf.mxu1  ;;  %v6170_v53 = vld [vmem:[#allocation4 + $0x4a4] sm:$0xf]  ;;  %v5212_v14 = vor.u32 %v6202_v10, %v5209_v11  ;;  %v5052_v15 = vor.u32 %v6162_v12, %v5049_v13  ;;  %v5497_v7 = vld [vmem:[#allocation4 + $0x7f0] sm:$0xf0] }
 0x100   :  { %v1046_v24 = vadd.f32 %v1045_v19, %v1033_v18  ;;  %v5084_v62 = vor.u32 %v6170_v53, %v5081_v57  ;;  %v6198_v17 = vld [vmem:[#allocation4 + $0x584] sm:$0xf]  ;;  %v5193_v18 = vld [vmem:[#allocation4 + $0x590] sm:$0xf0] }
 0x101   :  { %v6158_v19 = vld [vmem:[#allocation4 + $0x444] sm:$0xf]  ;;  %v5196_v21 = vor.u32 %v6198_v17, %v5193_v18  ;;  %v5337_v13 = vld [vmem:[#allocation4 + $0x6b0] sm:$0xf0]  ;;  %v6045_v17 = vld [vmem:[#allocation4 + $0xb4] sm:$0xf0] }
 0x102   :  { %vm1131_vm4 = vcmp.ge.f32.partialorder %v1046_v24, 0.0  ;;  %v1139_v30 = vmul.f32 0.01, %v1046_v24  ;;  %2853 = vmatpush.bf16.msra.mxu3 %v4924_v20  ;;  %2842 = vmatpush.bf16.msra.mxu2 %v4764_v23  ;;  %v5033_v20 = vld [vmem:[#allocation4 + $0x450] sm:$0xf0] }
 0x103   :  { %v1058_v35 = vpop.f32.mrf.mxu2  ;;  %v5036_v23 = vor.u32 %v6158_v19, %v5033_v20  ;;  %v6238_v53 = vld [vmem:[#allocation4 + $0x6c4] sm:$0xf] }
 0x104   :  { %v1147_v34 = vsel %vm1131_vm4, %v1046_v24, %v1139_v30  ;;  %v1059_v41 = vadd.f32 %v1058_v35, %v261_v27  ;;  %v6194_v24 = vld [vmem:[#allocation4 + $0x564] sm:$0xf]  ;;  %v5017_v27 = vld [vmem:[#allocation4 + $0x430] sm:$0xf0] }
 0x105   :  { %v6676_v39 = vpack.c.bf16 %v1147_v34, %v1147_v34  ;;  %v1071_v42 = vpop.f32.mrf.mxu3  ;;  %v1034_v43 = vpop.f32.mrf.mxu0  ;;  %v5020_v32 = vor.u32 %v6154_v26, %v5017_v27  ;;  %v6190_v34 = vld [vmem:[#allocation4 + $0x544] sm:$0xf]  ;;  %v5161_v35 = vld [vmem:[#allocation4 + $0x550] sm:$0xf0] }
 0x106   :  { %2854 = vmatpush.bf16.msra.mxu3 %v4908_v31  ;;  %v1072_v49 = vadd.f32 %v1071_v42, %v1059_v41  ;;  %2843 = vmatpush.bf16.msra.mxu2 %v4748_v38  ;;  %v5180_v31 = vor.u32 %v6194_v24, %v5177_v25  ;;  %v5001_v38 = vld [vmem:[#allocation4 + $0x410] sm:$0xf0]  ;;  %v6242_v41 = vld [vmem:[#allocation4 + $0x6e4] sm:$0xf]  ;;  %v6053_v43 = vld [vmem:[#allocation4 + $0xf4] sm:$0xf0]  ;;  %v5164_v4 = vor.u32 %v6190_v34, %v5161_v35 }
 0x107   :  { %v1047_v46 = vpop.f32.mrf.mxu1  ;;  %2766 = vmatmul.bf16.vlgmr.msrb.gmra.mxu0 %v6676_v39  ;;  %v5369_v42 = vld [vmem:[#allocation4 + $0x6f0] sm:$0xf0]  ;;  %v6182_v2 = vld [vmem:[#allocation4 + $0x504] sm:$0xf]  ;;  %v6041_v34 = vld [vmem:[#allocation4 + $0x94] sm:$0xf0] }
 0x108   :  { %2862 = vmatpush.bf16.msrb.mxu0 %v5116_v36  ;;  %vm1132_vm5 = vcmp.ge.f32.partialorder %v1072_v49, 0.0  ;;  %v1140_v56 = vmul.f32 0.01, %v1072_v49  ;;  %v5004_v46 = vor.u32 %v6150_v37, %v5001_v38  ;;  %v5372_v51 = vor.u32 %v6242_v41, %v5369_v42  ;;  %v6234_v12 = vld [vmem:[#allocation4 + $0x6a4] sm:$0xf] }
 0x109   :  { %v5132_v18 = vor.u32 %v6182_v2, %v5129_v3  ;;  %v5340_v26 = vor.u32 %v6234_v12, %v5337_v13  ;;  %v6266_v37 = vld [vmem:[#allocation4 + $0x7a4] sm:$0xf]  ;;  %v5465_v42 = vld [vmem:[#allocation4 + $0x7b0] sm:$0xf0] }
 0x10a   :  { %2855 = vmatpush.bf16.msra.mxu3 %v4892_v48  ;;  %v1148_v59 = vsel %vm1132_vm5, %v1072_v49, %v1140_v56  ;;  %v6186_v48 = vld [vmem:[#allocation4 + $0x524] sm:$0xf]  ;;  %v5145_v49 = vld [vmem:[#allocation4 + $0x530] sm:$0xf0] }
 0x10b   :  { %v6679_v61 = vpack.c.bf16 %v1148_v59, %v1148_v59  ;;  %v1060_v0 = vpop.f32.mrf.mxu2  ;;  %v4591_v59 = vld [vmem:[#allocation4 + $0xc8] sm:$0xf]  ;;  %v6258_v2 = vld [vmem:[#allocation4 + $0x764] sm:$0xf]  ;;  %v5273_v12 = vld [vmem:[#allocation4 + $0x630] sm:$0xf0] }
 0x10c   :  { %2863 = vmatpush.bf16.msrb.mxu0 %v5100_v52  ;;  %v4608_v52 = vor.u32 %v6053_v43, %v4607_v1  ;;  %v5148_v0 = vor.u32 %v6186_v48, %v5145_v49  ;;  %v4703_v1 = vld [vmem:[#allocation4 + $0x1a8] sm:$0xf]  ;;  %v6077_v43 = vld [vmem:[#allocation4 + $0x1b4] sm:$0xf0]  ;;  %v5305_v48 = vld [vmem:[#allocation4 + $0x670] sm:$0xf0]  ;;  %v5468_v49 = vor.u32 %v6266_v37, %v5465_v42 }
 0x10d   :  { %v1073_v5 = vpop.f32.mrf.mxu3  ;;  %2779 = vmatmul.bf16.vlgmr.msrb.gmra.mxu1 %v6679_v61  ;;  %v6061_v37 = vld [vmem:[#allocation4 + $0x134] sm:$0xf0] }
 0x10e   :  { %2856 = vmatpush.bf16.msra.mxu3 %v4876_v58  ;;  %2875 = vmatpush.bf16.msrb.mxu1 %v5244_v60  ;;  %v5353_v58 = vld [vmem:[#allocation4 + $0x6d0] sm:$0xf0]  ;;  %v6049_v60 = vld [vmem:[#allocation4 + $0xd4] sm:$0xf0]  ;;  %v6274_v5 = vld [vmem:[#allocation4 + $0x7e4] sm:$0xf] }
 0x10f   :  { %v5356_v10 = vor.u32 %v6238_v53, %v5353_v58  ;;  %v4592_v11 = vor.u32 %v6049_v60, %v4591_v59  ;;  %v5500_v20 = vor.u32 %v6274_v5, %v5497_v7  ;;  %v4687_v53 = vld [vmem:[#allocation4 + $0x188] sm:$0xf]  ;;  %v6033_v58 = vld [vmem:[#allocation4 + $0x54] sm:$0xf0]  ;;  %v6222_v59 = vld [vmem:[#allocation4 + $0x644] sm:$0xf] }
 0x110   :  { %2864 = vmatpush.bf16.msrb.mxu0 %v5084_v62  ;;  %v5289_v60 = vld [vmem:[#allocation4 + $0x650] sm:$0xf0]  ;;  %v6069_v7 = vld [vmem:[#allocation4 + $0x174] sm:$0xf0] }
 0x111   :  { %v5433_v5 = vld [vmem:[#allocation4 + $0x770] sm:$0xf0] }
 0x112   :  { %2876 = vmatpush.bf16.msrb.mxu1 %v5228_v8  ;;  %v4735_v8 = vld [vmem:[#allocation4 + $0x1e8] sm:$0xf]  ;;  %v5436_v13 = vor.u32 %v6258_v2, %v5433_v5 }
 0x113   :  { %v4831_v2 = vld [vmem:[#allocation4 + $0x2a8] sm:$0xf] }
 0x114   :  { %2865 = vmatpush.bf16.msrb.mxu0 %v5068_v9  ;;  %v6085_v9 = vld [vmem:[#allocation4 + $0x1f4] sm:$0xf0] }
 0x116   :  { %2877 = vmatpush.bf16.msrb.mxu1 %v5212_v14  ;;  %v4575_v14 = vld [vmem:[#allocation4 + $0xa8] sm:$0xf] }
 0x117   :  { %2818 = vmatmul.bf16.vlgmr.msra.gmra.mxu0 %v6660_v40  ;;  %v4576_v27 = vor.u32 %v6045_v17, %v4575_v14 }
 0x118   :  { %2866 = vmatpush.bf16.msrb.mxu0 %v5052_v15 }
 0x11a   :  { %2878 = vmatpush.bf16.msrb.mxu1 %v5196_v21  ;;  %v4736_v21 = vor.u32 %v6085_v9, %v4735_v8  ;;  %v5292_v8 = vor.u32 %v6222_v59, %v5289_v60  ;;  %v4511_v9 = vld [vmem:[#allocation4 + $0x28] sm:$0xf]  ;;  %v6173_v60 = vld [vmem:[#allocation4 + $0x4b4] sm:$0xf0] }
 0x11b   :  { %v5087_v59 = vld [vmem:[#allocation4 + $0x4a8] sm:$0xf] }
 0x11c   :  { %2867 = vmatpush.bf16.msrb.mxu0 %v5036_v23  ;;  %v5481_v23 = vld [vmem:[#allocation4 + $0x7d0] sm:$0xf0] }
 0x11d   :  { %v1084_v28 = vpop.f32.mrf.mxu0  ;;  %2831 = vmatmul.bf16.vlgmr.msra.gmra.mxu1 %v6663_v63 }
 0x11e   :  { %v1085_v29 = vadd.f32 %v1084_v28, %v262_v22  ;;  %2879 = vmatpush.bf16.msrb.mxu1 %v5180_v31  ;;  %v6270_v22 = vld [vmem:[#allocation4 + $0x7c4] sm:$0xf]  ;;  %v4719_v28 = vld [vmem:[#allocation4 + $0x1c8] sm:$0xf] }
 0x11f   :  { %v1097_v30 = vpop.f32.mrf.mxu1  ;;  %v5484_v35 = vor.u32 %v6270_v22, %v5481_v23  ;;  %v6214_v22 = vld [vmem:[#allocation4 + $0x604] sm:$0xf]  ;;  %v4495_v23 = vld [vmem:[#allocation4 + $0x8] sm:$0xf] }
 0x120   :  { %v1098_v36 = vadd.f32 %v1097_v30, %v1085_v29  ;;  %2868 = vmatpush.bf16.msrb.mxu0 %v5020_v32  ;;  %v6081_v29 = vld [vmem:[#allocation4 + $0x1d4] sm:$0xf0]  ;;  %v6230_v30 = vld [vmem:[#allocation4 + $0x684] sm:$0xf]  ;;  %v5321_v32 = vld [vmem:[#allocation4 + $0x690] sm:$0xf0] }
 0x121   :  { %v5324_v38 = vor.u32 %v6230_v30, %v5321_v32  ;;  %v6117_v32 = vld [vmem:[#allocation4 + $0x2f4] sm:$0xf0] }
 0x122   :  { %vm1133_vm6 = vcmp.ge.f32.partialorder %v1098_v36, 0.0  ;;  %v1141_v45 = vmul.f32 0.01, %v1098_v36  ;;  %2880 = vmatpush.bf16.msrb.mxu1 %v5164_v4  ;;  %v6037_v4 = vld [vmem:[#allocation4 + $0x74] sm:$0xf0] }
 0x123   :  { %v1110_v50 = vpop.f32.mrf.mxu2 }
 0x124   :  { %v1149_v44 = vsel %vm1133_vm6, %v1098_v36, %v1141_v45  ;;  %v1111_v55 = vadd.f32 %v1110_v50, %v263_v33  ;;  %2869 = vmatpush.bf16.msrb.mxu0 %v5004_v46  ;;  %v4559_v33 = vld [vmem:[#allocation4 + $0x88] sm:$0xf]  ;;  %v4720_v36 = vor.u32 %v6081_v29, %v4719_v28  ;;  %v6226_v46 = vld [vmem:[#allocation4 + $0x664] sm:$0xf]  ;;  %v6181_v28 = vld [vmem:[#allocation4 + $0x4f4] sm:$0xf0] }
 0x125   :  { %v6686_v54 = vpack.c.bf16 %v1149_v44, %v1149_v44  ;;  %v1123_v56 = vpop.f32.mrf.mxu3  ;;  %v1086_v57 = vpop.f32.mrf.mxu0  ;;  %v4560_v41 = vor.u32 %v6041_v34, %v4559_v33  ;;  %v4543_v45 = vld [vmem:[#allocation4 + $0x68] sm:$0xf]  ;;  %v4704_v44 = vor.u32 %v6077_v43, %v4703_v1  ;;  %v6262_v50 = vld [vmem:[#allocation4 + $0x784] sm:$0xf] }
 0x126   :  { %v1124_v6 = vadd.f32 %v1123_v56, %v1111_v55  ;;  %2881 = vmatpush.bf16.msrb.mxu1 %v5148_v0  ;;  %v6073_v55 = vld [vmem:[#allocation4 + $0x194] sm:$0xf0]  ;;  %v5308_v56 = vor.u32 %v6226_v46, %v5305_v48  ;;  %v4527_v57 = vld [vmem:[#allocation4 + $0x48] sm:$0xf]  ;;  %v6250_v33 = vld [vmem:[#allocation4 + $0x724] sm:$0xf] }
 0x127   :  { %v1099_v62 = vpop.f32.mrf.mxu1  ;;  %2792 = vmatmul.bf16.vlgmr.msrb.gmra.mxu2 %v6686_v54  ;;  %2870 = vmatmul.bf16.vlgmr.msrb.gmra.mxu0 %v6676_v39  ;;  %v4688_v0 = vor.u32 %v6073_v55, %v4687_v53  ;;  %v4528_v3 = vor.u32 %v6033_v58, %v4527_v57  ;;  %v4847_v1 = vld [vmem:[#allocation4 + $0x2c8] sm:$0xf]  ;;  %v6113_v48 = vld [vmem:[#allocation4 + $0x2d4] sm:$0xf0] }
 0x128   :  { %2888 = vmatpush.bf16.msrb.mxu2 %v5372_v51  ;;  %2914 = vmatpush.bf16.msra.mxu0 %v4608_v52  ;;  %vm1134_vm7 = vcmp.ge.f32.partialorder %v1124_v6, 0.0  ;;  %v1142_v15 = vmul.f32 0.01, %v1124_v6  ;;  %v4544_v51 = vor.u32 %v6037_v4, %v4543_v45  ;;  %v5449_v52 = vld [vmem:[#allocation4 + $0x790] sm:$0xf0]  ;;  %v4848_v58 = vor.u32 %v6113_v48, %v4847_v1 }
 0x129   :  { %v5452_v62 = vor.u32 %v6262_v50, %v5449_v52  ;;  %v5103_v43 = vld [vmem:[#allocation4 + $0x4c8] sm:$0xf]  ;;  %v6177_v45 = vld [vmem:[#allocation4 + $0x4d4] sm:$0xf0] }
 0x12a   :  { %v1150_v19 = vsel %vm1134_vm7, %v1124_v6, %v1142_v15  ;;  %2882 = vmatpush.bf16.msrb.mxu1 %v5132_v18  ;;  %v4671_v6 = vld [vmem:[#allocation4 + $0x168] sm:$0xf]  ;;  %v6254_v15 = vld [vmem:[#allocation4 + $0x744] sm:$0xf]  ;;  %v5417_v18 = vld [vmem:[#allocation4 + $0x750] sm:$0xf0]  ;;  %v5104_v53 = vor.u32 %v6177_v45, %v5103_v43 }
 0x12b   :  { %v6690_v24 = vpack.c.bf16 %v1150_v19, %v1150_v19  ;;  %v1112_v25 = vpop.f32.mrf.mxu2  ;;  %v4672_v14 = vor.u32 %v6069_v7, %v4671_v6  ;;  %v4655_v19 = vld [vmem:[#allocation4 + $0x148] sm:$0xf]  ;;  %v5420_v29 = vor.u32 %v6254_v15, %v5417_v18  ;;  %v6149_v55 = vld [vmem:[#allocation4 + $0x3f4] sm:$0xf0] }
 0x12c   :  { %2889 = vmatpush.bf16.msrb.mxu2 %v5356_v10  ;;  %2915 = vmatpush.bf16.msra.mxu0 %v4592_v11  ;;  %v6029_v10 = vld [vmem:[#allocation4 + $0x34] sm:$0xf0]  ;;  %v6218_v11 = vld [vmem:[#allocation4 + $0x624] sm:$0xf]  ;;  %v4623_v50 = vld [vmem:[#allocation4 + $0x108] sm:$0xf] }
 0x12d   :  { %v1125_v31 = vpop.f32.mrf.mxu3  ;;  %2805 = vmatmul.bf16.vlgmr.msrb.gmra.mxu3 %v6690_v24  ;;  %2883 = vmatmul.bf16.vlgmr.msrb.gmra.mxu1 %v6679_v61  ;;  %v4512_v17 = vor.u32 %v6029_v10, %v4511_v9  ;;  %v6025_v25 = vld [vmem:[#allocation4 + $0x14] sm:$0xf0]  ;;  %v4991_v52 = vld [vmem:[#allocation4 + $0x3e8] sm:$0xf]  ;;  %v5088_v9 = vor.u32 %v6173_v60, %v5087_v59 }
 0x12e   :  { %2901 = vmatpush.bf16.msrb.mxu3 %v5500_v20  ;;  %2927 = vmatpush.bf16.msra.mxu1 %v4736_v21  ;;  %v6065_v20 = vld [vmem:[#allocation4 + $0x154] sm:$0xf0]  ;;  %v5276_v21 = vor.u32 %v6218_v11, %v5273_v12  ;;  %v4863_v31 = vld [vmem:[#allocation4 + $0x2e8] sm:$0xf]  ;;  %v4496_v34 = vor.u32 %v6025_v25, %v4495_v23  ;;  %v4992_v5 = vor.u32 %v6149_v55, %v4991_v52 }
 0x12f   :  { %v4656_v30 = vor.u32 %v6065_v20, %v4655_v19  ;;  %v4864_v42 = vor.u32 %v6117_v32, %v4863_v31  ;;  %v6213_v57 = vld [vmem:[#allocation4 + $0x5f4] sm:$0xf0]  ;;  %v4975_v7 = vld [vmem:[#allocation4 + $0x3c8] sm:$0xf] }
 0x130   :  { %2890 = vmatpush.bf16.msrb.mxu2 %v5340_v26  ;;  %2916 = vmatpush.bf16.msra.mxu0 %v4576_v27  ;;  %v5257_v26 = vld [vmem:[#allocation4 + $0x610] sm:$0xf0]  ;;  %v5119_v27 = vld [vmem:[#allocation4 + $0x4e8] sm:$0xf]  ;;  %v6209_v11 = vld [vmem:[#allocation4 + $0x5d4] sm:$0xf0] }
 0x131   :  { %v5231_v10 = vld [vmem:[#allocation4 + $0x5c8] sm:$0xf]  ;;  %v6105_v18 = vld [vmem:[#allocation4 + $0x294] sm:$0xf0] }
 0x132   :  { %2902 = vmatpush.bf16.msrb.mxu3 %v5484_v35  ;;  %2928 = vmatpush.bf16.msra.mxu1 %v4720_v36  ;;  %v5401_v35 = vld [vmem:[#allocation4 + $0x730] sm:$0xf0]  ;;  %v4639_v36 = vld [vmem:[#allocation4 + $0x128] sm:$0xf]  ;;  %v5232_v20 = vor.u32 %v6209_v11, %v5231_v10  ;;  %v6101_v32 = vld [vmem:[#allocation4 + $0x274] sm:$0xf0] }
 0x133   :  { %v5404_v4 = vor.u32 %v6250_v33, %v5401_v35  ;;  %v4640_v46 = vor.u32 %v6061_v37, %v4639_v36  ;;  %v5071_v12 = vld [vmem:[#allocation4 + $0x488] sm:$0xf]  ;;  %v6097_v48 = vld [vmem:[#allocation4 + $0x254] sm:$0xf0] }
 0x134   :  { %2891 = vmatpush.bf16.msrb.mxu2 %v5324_v38  ;;  %2917 = vmatpush.bf16.msra.mxu0 %v4560_v41  ;;  %v5260_v38 = vor.u32 %v6214_v22, %v5257_v26  ;;  %v5120_v41 = vor.u32 %v6181_v28, %v5119_v27  ;;  %v4484_v15 = vld [vmem:[%s6790_s7 + $0x1] ss:$8 sm:$0xf] }
 0x135   :  { %v6141_v22 = vld [vmem:[#allocation4 + $0x3b4] sm:$0xf0]  ;;  %v5215_v25 = vld [vmem:[#allocation4 + $0x5a8] sm:$0xf]  ;;  %v1418_v27 = vperm.slane %v4484_v15, 0 }
 0x136   :  { %2903 = vmatpush.bf16.msrb.mxu3 %v5468_v49  ;;  %2929 = vmatpush.bf16.msra.mxu1 %v4704_v44  ;;  %v6246_v49 = vld [vmem:[#allocation4 + $0x704] sm:$0xf]  ;;  %v5385_v44 = vld [vmem:[#allocation4 + $0x710] sm:$0xf0]  ;;  %v6205_v26 = vld [vmem:[#allocation4 + $0x5b4] sm:$0xf0] }
 0x137   :  { %2844 = vmatmul.bf16.vlgmr.msra.gmra.mxu2 %v6668_v16  ;;  %v4799_v31 = vld [vmem:[#allocation4 + $0x268] sm:$0xf]  ;;  %v5216_v35 = vor.u32 %v6205_v26, %v5215_v25  ;;  %v6157_v60 = vld [vmem:[#allocation4 + $0x434] sm:$0xf0] }
 0x138   :  { %2918 = vmatpush.bf16.msra.mxu0 %v4544_v51  ;;  %2892 = vmatpush.bf16.msrb.mxu2 %v5308_v56  ;;  %v6057_v51 = vld [vmem:[#allocation4 + $0x114] sm:$0xf0]  ;;  %v5247_v56 = vld [vmem:[#allocation4 + $0x5e8] sm:$0xf]  ;;  %v4800_v43 = vor.u32 %v6101_v32, %v4799_v31 }
 0x139   :  { %v5248_v6 = vor.u32 %v6213_v57, %v5247_v56  ;;  %v4943_v36 = vld [vmem:[#allocation4 + $0x388] sm:$0xf]  ;;  %v6197_v56 = vld [vmem:[#allocation4 + $0x574] sm:$0xf0] }
 0x13a   :  { %2904 = vmatpush.bf16.msrb.mxu3 %v5452_v62  ;;  %2930 = vmatpush.bf16.msra.mxu1 %v4688_v0  ;;  %v5388_v62 = vor.u32 %v6246_v49, %v5385_v44  ;;  %v4624_v0 = vor.u32 %v6057_v51, %v4623_v50  ;;  %v5039_v45 = vld [vmem:[#allocation4 + $0x448] sm:$0xf]  ;;  %v6193_v10 = vld [vmem:[#allocation4 + $0x554] sm:$0xf0] }
 0x13b   :  { %v4927_v50 = vld [vmem:[#allocation4 + $0x368] sm:$0xf]  ;;  %v6089_v15 = vld [vmem:[#allocation4 + $0x214] sm:$0xf0] }
 0x13c   :  { %2919 = vmatpush.bf16.msra.mxu0 %v4528_v3  ;;  %2893 = vmatpush.bf16.msrb.mxu2 %v5292_v8  ;;  %v6109_v3 = vld [vmem:[#allocation4 + $0x2b4] sm:$0xf0]  ;;  %v5183_v55 = vld [vmem:[#allocation4 + $0x568] sm:$0xf] }
 0x13d   :  { %2857 = vmatmul.bf16.vlgmr.msra.gmra.mxu3 %v6671_v47  ;;  %v6145_v8 = vld [vmem:[#allocation4 + $0x3d4] sm:$0xf0]  ;;  %v5023_v59 = vld [vmem:[#allocation4 + $0x428] sm:$0xf] }
 0x13e   :  { %2905 = vmatpush.bf16.msrb.mxu3 %v5436_v13  ;;  %2931 = vmatpush.bf16.msra.mxu1 %v4672_v14  ;;  %v4832_v13 = vor.u32 %v6109_v3, %v4831_v2  ;;  %v6169_v14 = vld [vmem:[#allocation4 + $0x494] sm:$0xf0]  ;;  %v4976_v19 = vor.u32 %v6145_v8, %v4975_v7  ;;  %v5024_v7 = vor.u32 %v6157_v60, %v5023_v59  ;;  %v5487_v60 = vld [vmem:[#allocation4 + $0x7c8] sm:$0xf] }
 0x13f   :  { %v5072_v23 = vor.u32 %v6169_v14, %v5071_v12  ;;  %v6129_v8 = vld [vmem:[#allocation4 + $0x354] sm:$0xf0]  ;;  %v4751_v12 = vld [vmem:[#allocation4 + $0x208] sm:$0xf] }
 0x140   :  { %2920 = vmatpush.bf16.msra.mxu0 %v4512_v17  ;;  %2894 = vmatpush.bf16.msrb.mxu2 %v5276_v21  ;;  %v4815_v17 = vld [vmem:[#allocation4 + $0x288] sm:$0xf]  ;;  %v6153_v14 = vld [vmem:[#allocation4 + $0x414] sm:$0xf0] }
 0x141   :  { %v4959_v21 = vld [vmem:[#allocation4 + $0x3a8] sm:$0xf]  ;;  %v4816_v28 = vor.u32 %v6105_v18, %v4815_v17  ;;  %v6051_v17 = vld [vmem:[#allocation4 + $0xec] sm:$0xf]  ;;  %v4609_v18 = vld [vmem:[#allocation4 + $0xf8] sm:$0xf0] }
 0x142   :  { %2906 = vmatpush.bf16.msrb.mxu3 %v5420_v29  ;;  %2932 = vmatpush.bf16.msra.mxu1 %v4656_v30  ;;  %v5055_v29 = vld [vmem:[#allocation4 + $0x468] sm:$0xf]  ;;  %v6165_v30 = vld [vmem:[#allocation4 + $0x474] sm:$0xf0]  ;;  %v4612_v31 = vor.u32 %v6051_v17, %v4609_v18  ;;  %v4705_v17 = vld [vmem:[#allocation4 + $0x1b8] sm:$0xf0] }
 0x143   :  { %v5056_v37 = vor.u32 %v6165_v30, %v5055_v29  ;;  %v6189_v29 = vld [vmem:[#allocation4 + $0x534] sm:$0xf0]  ;;  %v4752_v30 = vor.u32 %v6089_v15, %v4751_v12  ;;  %v5471_v12 = vld [vmem:[#allocation4 + $0x7a8] sm:$0xf]  ;;  %v6075_v15 = vld [vmem:[#allocation4 + $0x1ac] sm:$0xf] }
 0x144   :  { %2921 = vmatpush.bf16.msra.mxu0 %v4496_v34  ;;  %2895 = vmatpush.bf16.msrb.mxu2 %v5260_v38  ;;  %v4960_v34 = vor.u32 %v6141_v22, %v4959_v21  ;;  %v6137_v38 = vld [vmem:[#allocation4 + $0x394] sm:$0xf0]  ;;  %v5375_v21 = vld [vmem:[#allocation4 + $0x6e8] sm:$0xf]  ;;  %v6035_v18 = vld [vmem:[#allocation4 + $0x6c] sm:$0xf] }
 0x145   :  { %v4944_v49 = vor.u32 %v6137_v38, %v4943_v36  ;;  %v6245_v22 = vld [vmem:[#allocation4 + $0x6f4] sm:$0xf0] }
 0x146   :  { %2907 = vmatpush.bf16.msrb.mxu3 %v5404_v4  ;;  %2933 = vmatpush.bf16.msra.mxu1 %v4640_v46  ;;  %v6161_v4 = vld [vmem:[#allocation4 + $0x454] sm:$0xf0]  ;;  %v4783_v46 = vld [vmem:[#allocation4 + $0x248] sm:$0xf]  ;;  %v5376_v32 = vor.u32 %v6245_v22, %v5375_v21  ;;  %v4708_v22 = vor.u32 %v6075_v15, %v4705_v17  ;;  %v6059_v17 = vld [vmem:[#allocation4 + $0x12c] sm:$0xf] }
 0x147   :  { %2922 = vmatmul.bf16.vlgmr.msra.gmra.mxu0 %v6660_v40  ;;  %2896 = vmatmul.bf16.vlgmr.msrb.gmra.mxu2 %v6686_v54  ;;  %v2715_v33 = vpop.f32.mrf.mxu0  ;;  %v5040_v52 = vor.u32 %v6161_v4, %v5039_v45  ;;  %v6241_v38 = vld [vmem:[#allocation4 + $0x6d4] sm:$0xf0]  ;;  %v5503_v45 = vld [vmem:[#allocation4 + $0x7e8] sm:$0xf] }
 0x148   :  { %2966 = vmatpush.bf16.msrb.mxu0 %v5120_v41  ;;  %2940 = vmatpush.bf16.msra.mxu2 %v4864_v42  ;;  %v5199_v41 = vld [vmem:[#allocation4 + $0x588] sm:$0xf]  ;;  %v6201_v42 = vld [vmem:[#allocation4 + $0x594] sm:$0xf0]  ;;  %v2716_v1 = vadd.f32 %v2715_v33, %v1418_v27 }
 0x149   :  { %v5200_v44 = vor.u32 %v6201_v42, %v5199_v41  ;;  %v6125_v27 = vld [vmem:[#allocation4 + $0x334] sm:$0xf0]  ;;  %v5359_v33 = vld [vmem:[#allocation4 + $0x6c8] sm:$0xf] }
 0x14a   :  { %2908 = vmatpush.bf16.msrb.mxu3 %v5388_v62  ;;  %2934 = vmatpush.bf16.msra.mxu1 %v4624_v0  ;;  %v4767_v62 = vld [vmem:[#allocation4 + $0x228] sm:$0xf]  ;;  %v6093_v0 = vld [vmem:[#allocation4 + $0x234] sm:$0xf0] }
 0x14b   :  { %v4768_v11 = vor.u32 %v6093_v0, %v4767_v62  ;;  %v4879_v41 = vld [vmem:[#allocation4 + $0x308] sm:$0xf]  ;;  %v6121_v42 = vld [vmem:[#allocation4 + $0x314] sm:$0xf0] }
 0x14c   :  { %2967 = vmatpush.bf16.msrb.mxu0 %v5104_v53  ;;  %2941 = vmatpush.bf16.msra.mxu2 %v4848_v58  ;;  %v6133_v53 = vld [vmem:[#allocation4 + $0x374] sm:$0xf0]  ;;  %v4784_v58 = vor.u32 %v6097_v48, %v4783_v46  ;;  %v6083_v48 = vld [vmem:[#allocation4 + $0x1ec] sm:$0xf] }
 0x14d   :  { %2935 = vmatmul.bf16.vlgmr.msra.gmra.mxu1 %v6663_v63  ;;  %2909 = vmatmul.bf16.vlgmr.msrb.gmra.mxu3 %v6690_v24  ;;  %v4928_v3 = vor.u32 %v6133_v53, %v4927_v50  ;;  %v6277_v46 = vld [vmem:[#allocation4 + $0x7f4] sm:$0xf0]  ;;  %v6043_v50 = vld [vmem:[#allocation4 + $0xac] sm:$0xf] }
 0x14e   :  { %2953 = vmatpush.bf16.msra.mxu3 %v4992_v5  ;;  %2979 = vmatpush.bf16.msrb.mxu1 %v5248_v6  ;;  %v5184_v5 = vor.u32 %v6197_v56, %v5183_v55  ;;  %v4911_v6 = vld [vmem:[#allocation4 + $0x348] sm:$0xf]  ;;  %v5504_v55 = vor.u32 %v6277_v46, %v5503_v45  ;;  %v6237_v59 = vld [vmem:[#allocation4 + $0x6b4] sm:$0xf0]  ;;  %v4673_v45 = vld [vmem:[#allocation4 + $0x178] sm:$0xf0] }
 0x14f   :  { %v2728_v51 = vpop.f32.mrf.mxu1  ;;  %v2717_v2 = vpop.f32.mrf.mxu0  ;;  %v6273_v0 = vld [vmem:[#allocation4 + $0x7d4] sm:$0xf0]  ;;  %v4513_v46 = vld [vmem:[#allocation4 + $0x38] sm:$0xf0] }
 0x150   :  { %2968 = vmatpush.bf16.msrb.mxu0 %v5088_v9  ;;  %2942 = vmatpush.bf16.msra.mxu2 %v4832_v13  ;;  %v6703_v57 = vadd.f32 %v2728_v51, %v2716_v1  ;;  %v5167_v9 = vld [vmem:[#allocation4 + $0x548] sm:$0xf]  ;;  %v4577_v51 = vld [vmem:[#allocation4 + $0xb8] sm:$0xf0]  ;;  %v6079_v2 = vld [vmem:[#allocation4 + $0x1cc] sm:$0xf] }
 0x151   :  { %v5007_v13 = vld [vmem:[#allocation4 + $0x408] sm:$0xf]  ;;  %v4580_v62 = vor.u32 %v6043_v50, %v4577_v51  ;;  %v6221_v51 = vld [vmem:[#allocation4 + $0x634] sm:$0xf0] }
 0x152   :  { %2954 = vmatpush.bf16.msra.mxu3 %v4976_v19  ;;  %2980 = vmatpush.bf16.msrb.mxu1 %v5232_v20  ;;  %v4912_v19 = vor.u32 %v6129_v8, %v4911_v6  ;;  %v5168_v20 = vor.u32 %v6193_v10, %v5167_v9  ;;  %v5008_v26 = vor.u32 %v6153_v14, %v5007_v13  ;;  %v5135_v1 = vld [vmem:[#allocation4 + $0x508] sm:$0xf]  ;;  %v4561_v6 = vld [vmem:[#allocation4 + $0x98] sm:$0xf0]  ;;  %v6269_v14 = vld [vmem:[#allocation4 + $0x7b4] sm:$0xf0] }
 0x153   :  { %v5488_v8 = vor.u32 %v6273_v0, %v5487_v60  ;;  %v5327_v10 = vld [vmem:[#allocation4 + $0x688] sm:$0xf]  ;;  %v5472_v21 = vor.u32 %v6269_v14, %v5471_v12  ;;  %v6023_v60 = vld [vmem:[#allocation4 + $0xc] sm:$0xf]  ;;  %v4865_v12 = vld [vmem:[#allocation4 + $0x2f8] sm:$0xf0] }
 0x154   :  { %2969 = vmatpush.bf16.msrb.mxu0 %v5072_v23  ;;  %2943 = vmatpush.bf16.msra.mxu2 %v4816_v28  ;;  %v4895_v23 = vld [vmem:[#allocation4 + $0x328] sm:$0xf]  ;;  %v6253_v14 = vld [vmem:[#allocation4 + $0x734] sm:$0xf0] }
 0x155   :  { %v5151_v28 = vld [vmem:[#allocation4 + $0x528] sm:$0xf]  ;;  %v4896_v36 = vor.u32 %v6125_v27, %v4895_v23 }
 0x156   :  { %2955 = vmatpush.bf16.msra.mxu3 %v4960_v34  ;;  %2981 = vmatpush.bf16.msrb.mxu1 %v5216_v35  ;;  %v6047_v34 = vld [vmem:[#allocation4 + $0xcc] sm:$0xf]  ;;  %v4593_v35 = vld [vmem:[#allocation4 + $0xd8] sm:$0xf0]  ;;  %v5311_v23 = vld [vmem:[#allocation4 + $0x668] sm:$0xf] }
 0x157   :  { %v2730_v25 = vpop.f32.mrf.mxu1  ;;  %v4596_v4 = vor.u32 %v6047_v34, %v4593_v35  ;;  %v5279_v50 = vld [vmem:[#allocation4 + $0x628] sm:$0xf] }
 0x158   :  { %2970 = vmatpush.bf16.msrb.mxu0 %v5056_v37  ;;  %2944 = vmatpush.bf16.msra.mxu2 %v4800_v43  ;;  %v5152_v37 = vor.u32 %v6189_v29, %v5151_v28  ;;  %v6185_v43 = vld [vmem:[#allocation4 + $0x514] sm:$0xf0]  ;;  %v6071_v29 = vld [vmem:[#allocation4 + $0x18c] sm:$0xf] }
 0x159   :  { %v5136_v53 = vor.u32 %v6185_v43, %v5135_v1  ;;  %v6229_v25 = vld [vmem:[#allocation4 + $0x674] sm:$0xf0]  ;;  %v6067_v43 = vld [vmem:[#allocation4 + $0x16c] sm:$0xf] }
 0x15a   :  { %2956 = vmatpush.bf16.msra.mxu3 %v4944_v49  ;;  %2982 = vmatpush.bf16.msrb.mxu1 %v5200_v44  ;;  %v4737_v49 = vld [vmem:[#allocation4 + $0x1f8] sm:$0xf0]  ;;  %v5360_v44 = vor.u32 %v6241_v38, %v5359_v33  ;;  %v6265_v28 = vld [vmem:[#allocation4 + $0x794] sm:$0xf0]  ;;  %v5312_v34 = vor.u32 %v6229_v25, %v5311_v23  ;;  %v6111_v25 = vld [vmem:[#allocation4 + $0x2cc] sm:$0xf] }
 0x15b   :  { %v4740_v56 = vor.u32 %v6083_v48, %v4737_v49  ;;  %v4529_v33 = vld [vmem:[#allocation4 + $0x58] sm:$0xf0]  ;;  %v6225_v38 = vld [vmem:[#allocation4 + $0x654] sm:$0xf0] }
 0x15c   :  { %2971 = vmatpush.bf16.msrb.mxu0 %v5040_v52  ;;  %2945 = vmatpush.bf16.msra.mxu2 %v4784_v58  ;;  %v4880_v52 = vor.u32 %v6121_v42, %v4879_v41  ;;  %v5343_v58 = vld [vmem:[#allocation4 + $0x6a8] sm:$0xf]  ;;  %v6261_v1 = vld [vmem:[#allocation4 + $0x774] sm:$0xf0] }
 0x15d   :  { %v5439_v41 = vld [vmem:[#allocation4 + $0x768] sm:$0xf] }
 0x15e   :  { %2957 = vmatpush.bf16.msra.mxu3 %v4928_v3  ;;  %2983 = vmatpush.bf16.msrb.mxu1 %v5184_v5  ;;  %v4721_v3 = vld [vmem:[#allocation4 + $0x1d8] sm:$0xf0]  ;;  %v6039_v5 = vld [vmem:[#allocation4 + $0x8c] sm:$0xf]  ;;  %v5440_v49 = vor.u32 %v6261_v1, %v5439_v41 }
 0x15f   :  { %v4724_v9 = vor.u32 %v6079_v2, %v4721_v3  ;;  %v4564_v13 = vor.u32 %v6039_v5, %v4561_v6  ;;  %v5280_v2 = vor.u32 %v6221_v51, %v5279_v50  ;;  %v6179_v3 = vld [vmem:[#allocation4 + $0x4ec] sm:$0xf]  ;;  %v5121_v5 = vld [vmem:[#allocation4 + $0x4f8] sm:$0xf0] }
 0x160   :  { %2972 = vmatpush.bf16.msrb.mxu0 %v5024_v7  ;;  %2946 = vmatpush.bf16.msra.mxu2 %v4768_v11  ;;  %v5344_v7 = vor.u32 %v6237_v59, %v5343_v58  ;;  %v6233_v11 = vld [vmem:[#allocation4 + $0x694] sm:$0xf0]  ;;  %v6063_v58 = vld [vmem:[#allocation4 + $0x14c] sm:$0xf]  ;;  %v4657_v59 = vld [vmem:[#allocation4 + $0x158] sm:$0xf0]  ;;  %v5124_v15 = vor.u32 %v6179_v3, %v5121_v5 }
 0x161   :  { %v6171_v41 = vld [vmem:[#allocation4 + $0x4ac] sm:$0xf]  ;;  %v4977_v51 = vld [vmem:[#allocation4 + $0x3d8] sm:$0xf0] }
 0x162   :  { %2958 = vmatpush.bf16.msra.mxu3 %v4912_v19  ;;  %2984 = vmatpush.bf16.msrb.mxu1 %v5168_v20  ;;  %v4545_v19 = vld [vmem:[#allocation4 + $0x78] sm:$0xf0]  ;;  %v5328_v20 = vor.u32 %v6233_v11, %v5327_v10  ;;  %v6115_v10 = vld [vmem:[#allocation4 + $0x2ec] sm:$0xf] }
 0x163   :  { %v4548_v27 = vor.u32 %v6035_v18, %v4545_v19  ;;  %v4641_v18 = vld [vmem:[#allocation4 + $0x138] sm:$0xf0]  ;;  %v6143_v50 = vld [vmem:[#allocation4 + $0x3cc] sm:$0xf] }
 0x164   :  { %2973 = vmatpush.bf16.msrb.mxu0 %v5008_v26  ;;  %2947 = vmatpush.bf16.msra.mxu2 %v4752_v30  ;;  %v5455_v26 = vld [vmem:[#allocation4 + $0x788] sm:$0xf]  ;;  %v4689_v30 = vld [vmem:[#allocation4 + $0x198] sm:$0xf0]  ;;  %v6139_v5 = vld [vmem:[#allocation4 + $0x3ac] sm:$0xf] }
 0x165   :  { %v5456_v35 = vor.u32 %v6265_v28, %v5455_v26  ;;  %v4849_v26 = vld [vmem:[#allocation4 + $0x2d8] sm:$0xf0]  ;;  %v4644_v28 = vor.u32 %v6059_v17, %v4641_v18  ;;  %v6135_v18 = vld [vmem:[#allocation4 + $0x38c] sm:$0xf] }
 0x166   :  { %2959 = vmatpush.bf16.msra.mxu3 %v4896_v36  ;;  %2985 = vmatpush.bf16.msrb.mxu1 %v5152_v37  ;;  %v4692_v36 = vor.u32 %v6071_v29, %v4689_v30  ;;  %v5295_v37 = vld [vmem:[#allocation4 + $0x648] sm:$0xf]  ;;  %v6249_v29 = vld [vmem:[#allocation4 + $0x714] sm:$0xf0]  ;;  %v6055_v30 = vld [vmem:[#allocation4 + $0x10c] sm:$0xf]  ;;  %v4852_v1 = vor.u32 %v6111_v25, %v4849_v26 }
 0x167   :  { %2948 = vmatmul.bf16.vlgmr.msra.gmra.mxu2 %v6668_v16  ;;  %2974 = vmatmul.bf16.vlgmr.msrb.gmra.mxu0 %v6676_v39  ;;  %v5296_v48 = vor.u32 %v6225_v38, %v5295_v37  ;;  %v6211_v37 = vld [vmem:[#allocation4 + $0x5ec] sm:$0xf]  ;;  %v5249_v38 = vld [vmem:[#allocation4 + $0x5f8] sm:$0xf0] }
 0x168   :  { %3018 = vmatpush.bf16.msra.mxu0 %v4612_v31  ;;  %2992 = vmatpush.bf16.msrb.mxu2 %v5376_v32  ;;  %v6031_v32 = vld [vmem:[#allocation4 + $0x4c] sm:$0xf] }
 0x169   :  { %v4532_v42 = vor.u32 %v6031_v32, %v4529_v33  ;;  %v4625_v32 = vld [vmem:[#allocation4 + $0x118] sm:$0xf0] }
 0x16a   :  { %2960 = vmatpush.bf16.msra.mxu3 %v4880_v52  ;;  %2986 = vmatpush.bf16.msrb.mxu1 %v5136_v53  ;;  %v6709_v31 = vpop.f32.mrf.mxu2  ;;  %v5423_v52 = vld [vmem:[#allocation4 + $0x748] sm:$0xf] }
 0x16c   :  { %3019 = vmatpush.bf16.msra.mxu0 %v4596_v4  ;;  %2993 = vmatpush.bf16.msrb.mxu2 %v5360_v44  ;;  %v6027_v4 = vld [vmem:[#allocation4 + $0x2c] sm:$0xf]  ;;  %v4676_v44 = vor.u32 %v6067_v43, %v4673_v45  ;;  %v4628_v45 = vor.u32 %v6055_v30, %v4625_v32 }
 0x16d   :  { %2961 = vmatmul.bf16.vlgmr.msra.gmra.mxu3 %v6671_v47  ;;  %2987 = vmatmul.bf16.vlgmr.msrb.gmra.mxu1 %v6679_v61 }
 0x16e   :  { %3005 = vmatpush.bf16.msrb.mxu3 %v5504_v55  ;;  %3031 = vmatpush.bf16.msra.mxu1 %v4740_v56  ;;  %v4516_v55 = vor.u32 %v6027_v4, %v4513_v46  ;;  %v6257_v56 = vld [vmem:[#allocation4 + $0x754] sm:$0xf0]  ;;  %v6107_v46 = vld [vmem:[#allocation4 + $0x2ac] sm:$0xf] }
 0x16f   :  { %v5424_v6 = vor.u32 %v6257_v56, %v5423_v52  ;;  %v6207_v52 = vld [vmem:[#allocation4 + $0x5cc] sm:$0xf] }
 0x170   :  { %3020 = vmatpush.bf16.msra.mxu0 %v4580_v62  ;;  %2994 = vmatpush.bf16.msrb.mxu2 %v5344_v7  ;;  %v6711_v53 = vpop.f32.mrf.mxu3  ;;  %v4497_v62 = vld [vmem:[#allocation4 + $0x18] sm:$0xf0]  ;;  %v4660_v7 = vor.u32 %v6063_v58, %v4657_v59  ;;  %v6167_v56 = vld [vmem:[#allocation4 + $0x48c] sm:$0xf] }
 0x171   :  { %v4500_v11 = vor.u32 %v6023_v60, %v4497_v62  ;;  %v5073_v58 = vld [vmem:[#allocation4 + $0x498] sm:$0xf0]  ;;  %v6103_v60 = vld [vmem:[#allocation4 + $0x28c] sm:$0xf] }
 0x172   :  { %3006 = vmatpush.bf16.msrb.mxu3 %v5488_v8  ;;  %3032 = vmatpush.bf16.msra.mxu1 %v4724_v9  ;;  %v2743_v0 = vpop.f32.mrf.mxu2  ;;  %v5263_v8 = vld [vmem:[#allocation4 + $0x608] sm:$0xf]  ;;  %v6217_v9 = vld [vmem:[#allocation4 + $0x614] sm:$0xf0]  ;;  %v4817_v62 = vld [vmem:[#allocation4 + $0x298] sm:$0xf0]  ;;  %v5076_v3 = vor.u32 %v6167_v56, %v5073_v58 }
 0x173   :  { %v5264_v19 = vor.u32 %v6217_v9, %v5263_v8  ;;  %v5217_v8 = vld [vmem:[#allocation4 + $0x5b8] sm:$0xf0]  ;;  %v6163_v9 = vld [vmem:[#allocation4 + $0x46c] sm:$0xf]  ;;  %v6293_v56 = vld [vmem:[#allocation6 + $0x74] sm:$0xf0] }
 0x174   :  { %3021 = vmatpush.bf16.msra.mxu0 %v4564_v13  ;;  %2995 = vmatpush.bf16.msrb.mxu2 %v5328_v20  ;;  %v5407_v13 = vld [vmem:[#allocation4 + $0x728] sm:$0xf]  ;;  %v6175_v20 = vld [vmem:[#allocation4 + $0x4cc] sm:$0xf] }
 0x175   :  { %v5408_v23 = vor.u32 %v6253_v14, %v5407_v13  ;;  %v6099_v13 = vld [vmem:[#allocation4 + $0x26c] sm:$0xf]  ;;  %v4801_v14 = vld [vmem:[#allocation4 + $0x278] sm:$0xf0] }
 0x176   :  { %3007 = vmatpush.bf16.msrb.mxu3 %v5472_v21  ;;  %3033 = vmatpush.bf16.msra.mxu1 %v4708_v22  ;;  %v5105_v21 = vld [vmem:[#allocation4 + $0x4d8] sm:$0xf0]  ;;  %v4868_v22 = vor.u32 %v6115_v10, %v4865_v12  ;;  %v4804_v25 = vor.u32 %v6099_v13, %v4801_v14  ;;  %v5560_v13 = vld [vmem:[#allocation6 + $0x60] sm:$0xf]  ;;  %v6291_v14 = vld [vmem:[#allocation6 + $0x64] sm:$0xf0] }
 0x177   :  { %v5057_v10 = vld [vmem:[#allocation4 + $0x478] sm:$0xf0] }
 0x178   :  { %3022 = vmatpush.bf16.msra.mxu0 %v4548_v27  ;;  %2996 = vmatpush.bf16.msrb.mxu2 %v5312_v34  ;;  %v5391_v27 = vld [vmem:[#allocation4 + $0x708] sm:$0xf]  ;;  %v2756_v33 = vpop.f32.mrf.mxu3  ;;  %v5108_v34 = vor.u32 %v6175_v20, %v5105_v21  ;;  %v5060_v17 = vor.u32 %v6163_v9, %v5057_v10  ;;  %v6199_v20 = vld [vmem:[#allocation4 + $0x58c] sm:$0xf]  ;;  %v5201_v21 = vld [vmem:[#allocation4 + $0x598] sm:$0xf0] }
 0x179   :  { %v5392_v43 = vor.u32 %v6249_v29, %v5391_v27  ;;  %v6095_v27 = vld [vmem:[#allocation4 + $0x24c] sm:$0xf]  ;;  %v5204_v30 = vor.u32 %v6199_v20, %v5201_v21 }
 0x17a   :  { %3008 = vmatpush.bf16.msrb.mxu3 %v5456_v35  ;;  %3034 = vmatpush.bf16.msra.mxu1 %v4692_v36  ;;  %v6147_v35 = vld [vmem:[#allocation4 + $0x3ec] sm:$0xf]  ;;  %v4993_v36 = vld [vmem:[#allocation4 + $0x3f8] sm:$0xf0] }
 0x17b   :  { %v4996_v4 = vor.u32 %v6147_v35, %v4993_v36  ;;  %v6131_v33 = vld [vmem:[#allocation4 + $0x36c] sm:$0xf]  ;;  %v5185_v36 = vld [vmem:[#allocation4 + $0x578] sm:$0xf0] }
 0x17c   :  { %3023 = vmatpush.bf16.msra.mxu0 %v4532_v42  ;;  %2997 = vmatpush.bf16.msrb.mxu2 %v5296_v48  ;;  %v5089_v42 = vld [vmem:[#allocation4 + $0x4b8] sm:$0xf0]  ;;  %v6195_v35 = vld [vmem:[#allocation4 + $0x56c] sm:$0xf] }
 0x17d   :  { %v4833_v48 = vld [vmem:[#allocation4 + $0x2b8] sm:$0xf0]  ;;  %v6187_v10 = vld [vmem:[#allocation4 + $0x52c] sm:$0xf] }
 0x17e   :  { %3009 = vmatpush.bf16.msrb.mxu3 %v5440_v49  ;;  %3035 = vmatpush.bf16.msra.mxu1 %v4676_v44  ;;  %v5252_v49 = vor.u32 %v6211_v37, %v5249_v38  ;;  %v5092_v44 = vor.u32 %v6171_v41, %v5089_v42  ;;  %v4836_v59 = vor.u32 %v6107_v46, %v4833_v48  ;;  %v6155_v37 = vld [vmem:[#allocation4 + $0x42c] sm:$0xf]  ;;  %v5025_v38 = vld [vmem:[#allocation4 + $0x438] sm:$0xf0] }
 0x17f   :  { %v6127_v46 = vld [vmem:[#allocation4 + $0x34c] sm:$0xf]  ;;  %v4913_v48 = vld [vmem:[#allocation4 + $0x358] sm:$0xf0] }
 0x180   :  { %3024 = vmatpush.bf16.msra.mxu0 %v4516_v55  ;;  %2998 = vmatpush.bf16.msrb.mxu2 %v5280_v2  ;;  %v5233_v55 = vld [vmem:[#allocation4 + $0x5d8] sm:$0xf0]  ;;  %v6119_v20 = vld [vmem:[#allocation4 + $0x30c] sm:$0xf] }
 0x181   :  { %v5236_v2 = vor.u32 %v6207_v52, %v5233_v55  ;;  %v5568_v55 = vld [vmem:[#allocation6 + $0x70] sm:$0xf] }
 0x182   :  { %3010 = vmatpush.bf16.msrb.mxu3 %v5424_v6  ;;  %3036 = vmatpush.bf16.msra.mxu1 %v4660_v7  ;;  %v4961_v6 = vld [vmem:[#allocation4 + $0x3b8] sm:$0xf0]  ;;  %v6203_v7 = vld [vmem:[#allocation4 + $0x5ac] sm:$0xf]  ;;  %v5569_v9 = vor.u32 %v6293_v56, %v5568_v55 }
 0x183   :  { %v4964_v12 = vor.u32 %v6139_v5, %v4961_v6  ;;  %v5377_v6 = vld [vmem:[#allocation4 + $0x6f8] sm:$0xf0] }
 0x184   :  { %3025 = vmatpush.bf16.msra.mxu0 %v4500_v11  ;;  %2999 = vmatpush.bf16.msrb.mxu2 %v5264_v19  ;;  %v6715_v0 = vpop.f32.mrf.mxu0  ;;  %v4820_v11 = vor.u32 %v6103_v60, %v4817_v62  ;;  %v4945_v19 = vld [vmem:[#allocation4 + $0x398] sm:$0xf0]  ;;  %v6243_v62 = vld [vmem:[#allocation4 + $0x6ec] sm:$0xf] }
 0x185   :  { %v4948_v26 = vor.u32 %v6135_v18, %v4945_v19  ;;  %v4753_v60 = vld [vmem:[#allocation4 + $0x218] sm:$0xf0]  ;;  %v6239_v18 = vld [vmem:[#allocation4 + $0x6cc] sm:$0xf] }
 0x186   :  { %3011 = vmatpush.bf16.msrb.mxu3 %v5408_v23  ;;  %3037 = vmatpush.bf16.msra.mxu1 %v4644_v28  ;;  %v5041_v23 = vld [vmem:[#allocation4 + $0x458] sm:$0xf0] }
 0x187   :  { %3026 = vmatmul.bf16.vlgmr.msra.gmra.mxu0 %v6660_v40  ;;  %3000 = vmatmul.bf16.vlgmr.msrb.gmra.mxu2 %v6686_v54  ;;  %v4980_v40 = vor.u32 %v6143_v50, %v4977_v51  ;;  %v4785_v28 = vld [vmem:[#allocation4 + $0x258] sm:$0xf0]  ;;  %v6151_v50 = vld [vmem:[#allocation4 + $0x40c] sm:$0xf] }
 0x188   :  { %3070 = vmatpush.bf16.msrb.mxu0 %v5124_v15  ;;  %3044 = vmatpush.bf16.msra.mxu2 %v4868_v22  ;;  %v5220_v15 = vor.u32 %v6203_v7, %v5217_v8  ;;  %v6159_v22 = vld [vmem:[#allocation4 + $0x44c] sm:$0xf]  ;;  %v4788_v41 = vor.u32 %v6095_v27, %v4785_v28  ;;  %v5009_v51 = vld [vmem:[#allocation4 + $0x418] sm:$0xf0] }
 0x189   :  { %v5044_v32 = vor.u32 %v6159_v22, %v5041_v23  ;;  %v5012_v5 = vor.u32 %v6151_v50, %v5009_v51  ;;  %v6123_v7 = vld [vmem:[#allocation4 + $0x32c] sm:$0xf]  ;;  %v4897_v8 = vld [vmem:[#allocation4 + $0x338] sm:$0xf0]  ;;  %v6307_v50 = vld [vmem:[#allocation6 + $0xe4] sm:$0xf0] }
 0x18a   :  { %3012 = vmatpush.bf16.msrb.mxu3 %v5392_v43  ;;  %3038 = vmatpush.bf16.msra.mxu1 %v4628_v45  ;;  %v4769_v43 = vld [vmem:[#allocation4 + $0x238] sm:$0xf0]  ;;  %v5188_v45 = vor.u32 %v6195_v35, %v5185_v36  ;;  %v6183_v23 = vld [vmem:[#allocation4 + $0x50c] sm:$0xf] }
 0x18b   :  { %v5361_v19 = vld [vmem:[#allocation4 + $0x6d8] sm:$0xf0]  ;;  %v6275_v27 = vld [vmem:[#allocation4 + $0x7ec] sm:$0xf] }
 0x18c   :  { %3071 = vmatpush.bf16.msrb.mxu0 %v5108_v34  ;;  %3045 = vmatpush.bf16.msra.mxu2 %v4852_v1  ;;  %v2769_v29 = vpop.f32.mrf.mxu0  ;;  %v4929_v34 = vld [vmem:[#allocation4 + $0x378] sm:$0xf0]  ;;  %v6091_v1 = vld [vmem:[#allocation4 + $0x22c] sm:$0xf]  ;;  %v5364_v35 = vor.u32 %v6239_v18, %v5361_v19  ;;  %v6303_v18 = vld [vmem:[#allocation6 + $0xc4] sm:$0xf0] }
 0x18d   :  { %3013 = vmatmul.bf16.vlgmr.msrb.gmra.mxu3 %v6690_v24  ;;  %3039 = vmatmul.bf16.vlgmr.msra.gmra.mxu1 %v6663_v63  ;;  %v6719_v63 = vpop.f32.mrf.mxu1  ;;  %v4932_v42 = vor.u32 %v6131_v33, %v4929_v34  ;;  %v4772_v52 = vor.u32 %v6091_v1, %v4769_v43  ;;  %v4881_v22 = vld [vmem:[#allocation4 + $0x318] sm:$0xf0]  ;;  %v5552_v29 = vld [vmem:[#allocation6 + $0x50] sm:$0xf]  ;;  %v6309_v33 = vld [vmem:[#allocation6 + $0xf4] sm:$0xf0] }
 0x18e   :  { %3057 = vmatpush.bf16.msra.mxu3 %v4996_v4  ;;  %3083 = vmatpush.bf16.msrb.mxu1 %v5252_v49  ;;  %v5028_v4 = vor.u32 %v6155_v37, %v5025_v38  ;;  %v6191_v49 = vld [vmem:[#allocation4 + $0x54c] sm:$0xf]  ;;  %v5505_v28 = vld [vmem:[#allocation4 + $0x7f8] sm:$0xf0]  ;;  %v4884_v36 = vor.u32 %v6119_v20, %v4881_v22 }
 0x18f   :  { %v5345_v1 = vld [vmem:[#allocation4 + $0x6b8] sm:$0xf0] }
 0x190   :  { %3072 = vmatpush.bf16.msrb.mxu0 %v5092_v44  ;;  %3046 = vmatpush.bf16.msra.mxu2 %v4836_v59  ;;  %v5169_v44 = vld [vmem:[#allocation4 + $0x558] sm:$0xf0]  ;;  %v4916_v59 = vor.u32 %v6127_v46, %v4913_v48  ;;  %v5544_v46 = vld [vmem:[#allocation6 + $0x40] sm:$0xf] }
 0x191   :  { %v5329_v55 = vld [vmem:[#allocation4 + $0x698] sm:$0xf0] }
 0x192   :  { %3058 = vmatpush.bf16.msra.mxu3 %v4980_v40  ;;  %3084 = vmatpush.bf16.msrb.mxu1 %v5236_v2  ;;  %v6087_v40 = vld [vmem:[#allocation4 + $0x20c] sm:$0xf] }
 0x194   :  { %3073 = vmatpush.bf16.msrb.mxu0 %v5076_v3  ;;  %3047 = vmatpush.bf16.msra.mxu2 %v4820_v11  ;;  %v6721_v2 = vpop.f32.mrf.mxu0  ;;  %v5172_v3 = vor.u32 %v6191_v49, %v5169_v44  ;;  %v5153_v11 = vld [vmem:[#allocation4 + $0x538] sm:$0xf0]  ;;  %v6287_v49 = vld [vmem:[#allocation6 + $0x44] sm:$0xf0]  ;;  %v5624_v44 = vld [vmem:[#allocation6 + $0xe0] sm:$0xf] }
 0x195   :  { %v2782_v58 = vpop.f32.mrf.mxu1  ;;  %v5156_v21 = vor.u32 %v6187_v10, %v5153_v11  ;;  %v5545_v56 = vor.u32 %v6287_v49, %v5544_v46  ;;  %v5313_v10 = vld [vmem:[#allocation4 + $0x678] sm:$0xf0]  ;;  %v2742_v11 = vadd.f32 %v6709_v31, %v6703_v57  ;;  %v6279_v49 = vld [vmem:[#allocation6 + $0x4] sm:$0xf0] }
 0x196   :  { %3059 = vmatpush.bf16.msra.mxu3 %v4964_v12  ;;  %3085 = vmatpush.bf16.msrb.mxu1 %v5220_v15  ;;  %v4756_v12 = vor.u32 %v6087_v40, %v4753_v60  ;;  %v5380_v15 = vor.u32 %v6243_v62, %v5377_v6  ;;  %v5473_v58 = vld [vmem:[#allocation4 + $0x7b8] sm:$0xf0]  ;;  %v5625_v40 = vor.u32 %v6307_v50, %v5624_v44  ;;  %v6285_v60 = vld [vmem:[#allocation6 + $0x34] sm:$0xf0]  ;;  %v5616_v62 = vld [vmem:[#allocation6 + $0xd0] sm:$0xf] }
 0x197   :  { %v2755_v19 = vadd.f32 %v6711_v53, %v2742_v11  ;;  %v6299_v44 = vld [vmem:[#allocation6 + $0xa4] sm:$0xf0] }
 0x198   :  { %3074 = vmatpush.bf16.msrb.mxu0 %v5060_v17  ;;  %3048 = vmatpush.bf16.msra.mxu2 %v4804_v25  ;;  %v4900_v17 = vor.u32 %v6123_v7, %v4897_v8  ;;  %v5137_v25 = vld [vmem:[#allocation4 + $0x518] sm:$0xf0] }
 0x199   :  { %v5140_v38 = vor.u32 %v6183_v23, %v5137_v25  ;;  %v6223_v23 = vld [vmem:[#allocation4 + $0x64c] sm:$0xf]  ;;  %v5297_v25 = vld [vmem:[#allocation4 + $0x658] sm:$0xf0]  ;;  %v2768_v57 = vadd.f32 %v6715_v0, %v2755_v19 }
 0x19a   :  { %3060 = vmatpush.bf16.msra.mxu3 %v4948_v26  ;;  %3086 = vmatpush.bf16.msrb.mxu1 %v5204_v30  ;;  %v5561_v26 = vor.u32 %v6291_v14, %v5560_v13  ;;  %v6289_v30 = vld [vmem:[#allocation6 + $0x54] sm:$0xf0]  ;;  %v5457_v13 = vld [vmem:[#allocation4 + $0x798] sm:$0xf0]  ;;  %v5528_v14 = vld [vmem:[#allocation6 + $0x20] sm:$0xf] }
 0x19b   :  { %v5553_v43 = vor.u32 %v6289_v30, %v5552_v29  ;;  %v6281_v30 = vld [vmem:[#allocation6 + $0x14] sm:$0xf0]  ;;  %v2781_v53 = vadd.f32 %v6719_v63, %v2768_v57  ;;  %v6219_v0 = vld [vmem:[#allocation4 + $0x62c] sm:$0xf]  ;;  %v5592_v63 = vld [vmem:[#allocation6 + $0xa0] sm:$0xf] }
 0x19c   :  { %3075 = vmatpush.bf16.msrb.mxu0 %v5044_v32  ;;  %3049 = vmatpush.bf16.msra.mxu2 %v4788_v41  ;;  %v5632_v32 = vld [vmem:[#allocation6 + $0xf0] sm:$0xf]  ;;  %v2821_v37 = vpop.f32.mrf.mxu0  ;;  %v5508_v41 = vor.u32 %v6275_v27, %v5505_v28  ;;  %v5441_v27 = vld [vmem:[#allocation4 + $0x778] sm:$0xf0] }
 0x19d   :  { %v6723_v34 = vpop.f32.mrf.mxu1  ;;  %v5633_v48 = vor.u32 %v6309_v33, %v5632_v32  ;;  %v5520_v28 = vld [vmem:[#allocation6 + $0x10] sm:$0xf]  ;;  %v6301_v33 = vld [vmem:[#allocation6 + $0xb4] sm:$0xf0]  ;;  %v5634_v57 = vld [vmem:[#allocation6 + $0xf8] sm:$0xf0] }
 0x19e   :  { %3061 = vmatpush.bf16.msra.mxu3 %v4932_v42  ;;  %3087 = vmatpush.bf16.msrb.mxu1 %v5188_v45  ;;  %v6235_v42 = vld [vmem:[#allocation4 + $0x6ac] sm:$0xf]  ;;  %v5600_v32 = vld [vmem:[#allocation6 + $0xb0] sm:$0xf] }
 0x19f   :  { %v6271_v45 = vld [vmem:[#allocation4 + $0x7cc] sm:$0xf]  ;;  %v5348_v51 = vor.u32 %v6235_v42, %v5345_v1  ;;  %v5521_v1 = vor.u32 %v6281_v30, %v5520_v28  ;;  %v5601_v46 = vor.u32 %v6301_v33, %v5600_v32  ;;  %v6744_v28 = vld [vmem:[%s6790_s7 + $0x1] ss:$8 sm:$0xf] }
 0x1a0   :  { %3076 = vmatpush.bf16.msrb.mxu0 %v5028_v4  ;;  %3050 = vmatpush.bf16.msra.mxu2 %v4772_v52  ;;  %v5489_v4 = vld [vmem:[#allocation4 + $0x7d8] sm:$0xf0]  ;;  %v6231_v52 = vld [vmem:[#allocation4 + $0x68c] sm:$0xf]  ;;  %v6286_v32 = vld [vmem:[#allocation6 + $0x44] sm:$0xf] }
 0x1a1   :  { %v5332_v6 = vor.u32 %v6231_v52, %v5329_v55  ;;  %v6292_v52 = vld [vmem:[#allocation6 + $0x74] sm:$0xf]  ;;  %v5570_v55 = vld [vmem:[#allocation6 + $0x78] sm:$0xf0] }
 0x1a2   :  { %3062 = vmatpush.bf16.msra.mxu3 %v4916_v59  ;;  %3088 = vmatpush.bf16.msrb.mxu1 %v5172_v3  ;;  %v5536_v59 = vld [vmem:[#allocation6 + $0x30] sm:$0xf]  ;;  %v6305_v3 = vld [vmem:[#allocation6 + $0xd4] sm:$0xf0] }
 0x1a4   :  { %3077 = vmatpush.bf16.msrb.mxu0 %v5012_v5  ;;  %3051 = vmatpush.bf16.msra.mxu2 %v4756_v12  ;;  %v6729_v7 = vpop.f32.mrf.mxu0  ;;  %v5537_v12 = vor.u32 %v6285_v60, %v5536_v59  ;;  %v6251_v59 = vld [vmem:[#allocation4 + $0x72c] sm:$0xf] }
 0x1a5   :  { %v2834_v5 = vpop.f32.mrf.mxu1 }
 0x1a6   :  { %3063 = vmatpush.bf16.msra.mxu3 %v4900_v17  ;;  %3089 = vmatpush.bf16.msrb.mxu1 %v5156_v21  ;;  %v5608_v17 = vld [vmem:[#allocation6 + $0xc0] sm:$0xf]  ;;  %v5573_v5 = vor.u32 %v6292_v52, %v5570_v55  ;;  %v5530_v52 = vld [vmem:[#allocation6 + $0x28] sm:$0xf0]  ;;  %v6302_v55 = vld [vmem:[#allocation6 + $0xc4] sm:$0xf] }
 0x1a7   :  { %3078 = vmatmul.bf16.vlgmr.msrb.gmra.mxu0 %v6676_v39  ;;  %3052 = vmatmul.bf16.vlgmr.msra.gmra.mxu2 %v6668_v16  ;;  %v5492_v39 = vor.u32 %v6271_v45, %v5489_v4  ;;  %v6267_v16 = vld [vmem:[#allocation4 + $0x7ac] sm:$0xf]  ;;  %v5609_v29 = vor.u32 %v6303_v18, %v5608_v17  ;;  %v5425_v45 = vld [vmem:[#allocation4 + $0x758] sm:$0xf0]  ;;  %v5512_v4 = vld [vmem:[#allocation6] sm:$0xf] }
 0x1a8   :  { %3529 = vmatpush.bf16.msra.mxu0 %v5569_v9  ;;  %3096 = vmatpush.bf16.msrb.mxu2 %v5380_v15  ;;  %v5476_v8 = vor.u32 %v6267_v16, %v5473_v58  ;;  %v6227_v9 = vld [vmem:[#allocation4 + $0x66c] sm:$0xf]  ;;  %v5617_v15 = vor.u32 %v6305_v3, %v5616_v62  ;;  %v5265_v58 = vld [vmem:[#allocation4 + $0x618] sm:$0xf0]  ;;  %v5513_v60 = vor.u32 %v6279_v49, %v5512_v4  ;;  %v5696_v4 = vld [vmem:[#allocation6 + $0x170] sm:$0xf] }
 0x1a9   :  { %v5316_v21 = vor.u32 %v6227_v9, %v5313_v10  ;;  %v6215_v16 = vld [vmem:[#allocation4 + $0x60c] sm:$0xf]  ;;  %v5409_v62 = vld [vmem:[#allocation4 + $0x738] sm:$0xf0]  ;;  %v5593_v3 = vor.u32 %v6299_v44, %v5592_v63 }
 0x1aa   :  { %3064 = vmatpush.bf16.msra.mxu3 %v4884_v36  ;;  %3090 = vmatpush.bf16.msrb.mxu1 %v5140_v38  ;;  %v2793_v20 = vpop.f32.mrf.mxu2  ;;  %v5300_v36 = vor.u32 %v6223_v23, %v5297_v25  ;;  %v5268_v11 = vor.u32 %v6215_v16, %v5265_v58  ;;  %v5554_v23 = vld [vmem:[#allocation6 + $0x58] sm:$0xf0]  ;;  %v6308_v25 = vld [vmem:[#allocation6 + $0xf4] sm:$0xf] }
 0x1ab   :  { %v2794_v42 = vadd.f32 %v2793_v20, %v2781_v53  ;;  %v6288_v20 = vld [vmem:[#allocation6 + $0x54] sm:$0xf]  ;;  %v5637_v33 = vor.u32 %v6308_v25, %v5634_v57  ;;  %v5546_v53 = vld [vmem:[#allocation6 + $0x48] sm:$0xf0]  ;;  %v5672_v25 = vld [vmem:[#allocation6 + $0x140] sm:$0xf] }
 0x1ac   :  { %3530 = vmatpush.bf16.msra.mxu0 %v5561_v26  ;;  %3097 = vmatpush.bf16.msrb.mxu2 %v5364_v35  ;;  %v6259_v26 = vld [vmem:[#allocation4 + $0x76c] sm:$0xf]  ;;  %v2873_v37 = vpop.f32.mrf.mxu0  ;;  %v5557_v30 = vor.u32 %v6288_v20, %v5554_v23  ;;  %v6319_v57 = vld [vmem:[#allocation6 + $0x144] sm:$0xf0] }
 0x1ad   :  { %3065 = vmatmul.bf16.vlgmr.msra.gmra.mxu3 %v6671_v47  ;;  %3091 = vmatmul.bf16.vlgmr.msrb.gmra.mxu1 %v6679_v61  ;;  %v6263_v47 = vld [vmem:[#allocation4 + $0x78c] sm:$0xf]  ;;  %v6283_v61 = vld [vmem:[#allocation6 + $0x24] sm:$0xf0]  ;;  %v6736_v35 = vpop.f32.mrf.mxu1  ;;  %v5444_v38 = vor.u32 %v6259_v26, %v5441_v27 }
 0x1ae   :  { %3109 = vmatpush.bf16.msrb.mxu3 %v5508_v41  ;;  %3542 = vmatpush.bf16.msra.mxu1 %v5633_v48  ;;  %v5460_v22 = vor.u32 %v6263_v47, %v5457_v13  ;;  %v5529_v31 = vor.u32 %v6283_v61, %v5528_v14  ;;  %v5281_v41 = vld [vmem:[#allocation4 + $0x638] sm:$0xf0]  ;;  %v5562_v47 = vld [vmem:[#allocation6 + $0x68] sm:$0xf0]  ;;  %v5412_v13 = vor.u32 %v6251_v59, %v5409_v62  ;;  %v6280_v59 = vld [vmem:[#allocation6 + $0x14] sm:$0xf] }
 0x1af   :  { %v6247_v14 = vld [vmem:[#allocation4 + $0x70c] sm:$0xf]  ;;  %v5522_v62 = vld [vmem:[#allocation6 + $0x18] sm:$0xf0] }
 0x1b0   :  { %3531 = vmatpush.bf16.msra.mxu0 %v5553_v43  ;;  %3098 = vmatpush.bf16.msrb.mxu2 %v5348_v51  ;;  %v6255_v43 = vld [vmem:[#allocation4 + $0x74c] sm:$0xf]  ;;  %v2806_v48 = vpop.f32.mrf.mxu3 }
 0x1b1   :  { %v2807_v50 = vadd.f32 %v2806_v48, %v2794_v42  ;;  %v5626_v37 = vld [vmem:[#allocation6 + $0xe8] sm:$0xf0]  ;;  %v6284_v42 = vld [vmem:[#allocation6 + $0x34] sm:$0xf] }
 0x1b2   :  { %3110 = vmatpush.bf16.msrb.mxu3 %v5492_v39  ;;  %3543 = vmatpush.bf16.msra.mxu1 %v5625_v40  ;;  %v2795_v51 = vpop.f32.mrf.mxu2  ;;  %v5284_v39 = vor.u32 %v6219_v0, %v5281_v41  ;;  %v5549_v41 = vor.u32 %v6286_v32, %v5546_v53  ;;  %v6294_v53 = vld [vmem:[#allocation6 + $0x84] sm:$0xf] }
 0x1b3   :  { %vm3122_vm8 = vcmp.ge.f32.partialorder %v2807_v50, 0.0  ;;  %v3126_v40 = vmul.f32 0.01, %v2807_v50  ;;  %v6282_v51 = vld [vmem:[#allocation6 + $0x24] sm:$0xf] }
 0x1b4   :  { %3532 = vmatpush.bf16.msra.mxu0 %v5545_v56  ;;  %3099 = vmatpush.bf16.msrb.mxu2 %v5332_v6  ;;  %v5428_v56 = vor.u32 %v6255_v43, %v5425_v45  ;;  %v5584_v6 = vld [vmem:[#allocation6 + $0x90] sm:$0xf]  ;;  %v6304_v45 = vld [vmem:[#allocation6 + $0xd4] sm:$0xf]  ;;  %v5533_v58 = vor.u32 %v6282_v51, %v5530_v52  ;;  %v5698_v52 = vld [vmem:[#allocation6 + $0x178] sm:$0xf0] }
 0x1b5   :  { %v3130_v9 = vsel %vm3122_vm8, %v2807_v50, %v3126_v40  ;;  %v2886_v10 = vpop.f32.mrf.mxu1  ;;  %v5688_v40 = vld [vmem:[#allocation6 + $0x160] sm:$0xf]  ;;  %v6324_v51 = vld [vmem:[#allocation6 + $0x174] sm:$0xf] }
 0x1b6   :  { %3111 = vmatpush.bf16.msrb.mxu3 %v5476_v8  ;;  %3544 = vmatpush.bf16.msra.mxu1 %v5617_v15  ;;  %v6297_v8 = vld [vmem:[#allocation6 + $0x94] sm:$0xf0]  ;;  %v5393_v15 = vld [vmem:[#allocation4 + $0x718] sm:$0xf0]  ;;  %v6738_v17 = vpack.c.bf16 %v3130_v9, %v3130_v9 }
 0x1b7   :  { %v5585_v61 = vor.u32 %v6297_v8, %v5584_v6  ;;  %v5396_v26 = vor.u32 %v6247_v14, %v5393_v15  ;;  %v5680_v14 = vld [vmem:[#allocation6 + $0x150] sm:$0xf]  ;;  %v6321_v15 = vld [vmem:[#allocation6 + $0x154] sm:$0xf0] }
 0x1b8   :  { %3533 = vmatpush.bf16.msra.mxu0 %v5537_v12  ;;  %3100 = vmatpush.bf16.msrb.mxu2 %v5316_v21  ;;  %v6290_v12 = vld [vmem:[#allocation6 + $0x64] sm:$0xf]  ;;  %v2808_v18 = vpop.f32.mrf.mxu3  ;;  %v5576_v21 = vld [vmem:[#allocation6 + $0x80] sm:$0xf]  ;;  %v5681_v20 = vor.u32 %v6321_v15, %v5680_v14  ;;  %v5658_v15 = vld [vmem:[#allocation6 + $0x128] sm:$0xf0] }
 0x1b9   :  { %v5565_v19 = vor.u32 %v6290_v12, %v5562_v47  ;;  %v5525_v12 = vor.u32 %v6280_v59, %v5522_v62  ;;  %v6278_v47 = vld [vmem:[#allocation6 + $0x4] sm:$0xf] }
 0x1ba   :  { %3112 = vmatpush.bf16.msrb.mxu3 %v5460_v22  ;;  %3545 = vmatpush.bf16.msra.mxu1 %v5609_v29  ;;  %v6295_v22 = vld [vmem:[#allocation6 + $0x84] sm:$0xf0]  ;;  %v1419_v29 = vperm.slane %v6744_v28, 1  ;;  %v6298_v18 = vld [vmem:[#allocation6 + $0xa4] sm:$0xf] }
 0x1bb   :  { %v5577_v27 = vor.u32 %v6295_v22, %v5576_v21  ;;  %v6314_v14 = vld [vmem:[#allocation6 + $0x124] sm:$0xf] }
 0x1bc   :  { %3534 = vmatpush.bf16.msra.mxu0 %v5529_v31  ;;  %3101 = vmatpush.bf16.msrb.mxu2 %v5300_v36  ;;  %v2845_v31 = vpop.f32.mrf.mxu2  ;;  %v6306_v36 = vld [vmem:[#allocation6 + $0xe4] sm:$0xf] }
 0x1bd   :  { %v5629_v43 = vor.u32 %v6306_v36, %v5626_v37  ;;  %v5578_v36 = vld [vmem:[#allocation6 + $0x88] sm:$0xf0] }
 0x1be   :  { %3113 = vmatpush.bf16.msrb.mxu3 %v5444_v38  ;;  %3546 = vmatpush.bf16.msra.mxu1 %v5601_v46  ;;  %v2820_v38 = vadd.f32 %v6721_v2, %v1419_v29  ;;  %v6325_v46 = vld [vmem:[#allocation6 + $0x174] sm:$0xf0]  ;;  %v5673_v29 = vor.u32 %v6319_v57, %v5672_v25  ;;  %v6310_v25 = vld [vmem:[#allocation6 + $0x104] sm:$0xf]  ;;  %v5642_v57 = vld [vmem:[#allocation6 + $0x108] sm:$0xf0] }
 0x1bf   :  { %v5697_v63 = vor.u32 %v6325_v46, %v5696_v4 }
 0x1c0   :  { %3535 = vmatpush.bf16.msra.mxu0 %v5521_v1  ;;  %3102 = vmatpush.bf16.msrb.mxu2 %v5284_v39  ;;  %v2858_v0 = vpop.f32.mrf.mxu3  ;;  %v5538_v1 = vld [vmem:[#allocation6 + $0x38] sm:$0xf0]  ;;  %v2833_v48 = vadd.f32 %v6723_v34, %v2820_v38  ;;  %v5664_v38 = vld [vmem:[#allocation6 + $0x130] sm:$0xf] }
 0x1c1   :  { %v5541_v2 = vor.u32 %v6284_v42, %v5538_v1  ;;  %v6315_v42 = vld [vmem:[#allocation6 + $0x124] sm:$0xf0] }
 0x1c2   :  { %3114 = vmatpush.bf16.msrb.mxu3 %v5428_v56  ;;  %3547 = vmatpush.bf16.msra.mxu1 %v5593_v3  ;;  %v2846_v44 = vadd.f32 %v2845_v31, %v2833_v48  ;;  %v5610_v56 = vld [vmem:[#allocation6 + $0xc8] sm:$0xf0]  ;;  %v6300_v3 = vld [vmem:[#allocation6 + $0xb4] sm:$0xf]  ;;  %v5648_v48 = vld [vmem:[#allocation6 + $0x110] sm:$0xf] }
 0x1c3   :  { %v5613_v34 = vor.u32 %v6302_v55, %v5610_v56  ;;  %v5701_v56 = vor.u32 %v6324_v51, %v5698_v52  ;;  %v6333_v51 = vld [vmem:[#allocation6 + $0x1b4] sm:$0xf0] }
 0x1c4   :  { %3536 = vmatpush.bf16.msra.mxu0 %v5513_v60  ;;  %3103 = vmatpush.bf16.msrb.mxu2 %v5268_v11  ;;  %v2847_v49 = vpop.f32.mrf.mxu2  ;;  %v6751_v50 = vpop.f32.mrf.mxu0  ;;  %v6323_v60 = vld [vmem:[#allocation6 + $0x164] sm:$0xf0] }
 0x1c5   :  { %v5689_v6 = vor.u32 %v6323_v60, %v5688_v40  ;;  %v6313_v49 = vld [vmem:[#allocation6 + $0x114] sm:$0xf0]  ;;  %v6320_v40 = vld [vmem:[#allocation6 + $0x154] sm:$0xf]  ;;  %v5682_v60 = vld [vmem:[#allocation6 + $0x158] sm:$0xf0] }
 0x1c6   :  { %3115 = vmatpush.bf16.msrb.mxu3 %v5412_v13  ;;  %3548 = vmatpush.bf16.msra.mxu1 %v5585_v61  ;;  %v5514_v61 = vld [vmem:[#allocation6 + $0x8] sm:$0xf0]  ;;  %v5685_v62 = vor.u32 %v6320_v40, %v5682_v60  ;;  %v5704_v40 = vld [vmem:[#allocation6 + $0x180] sm:$0xf]  ;;  %v6327_v60 = vld [vmem:[#allocation6 + $0x184] sm:$0xf0] }
 0x1c7   :  { %3537 = vmatmul.bf16.vlgmr.msra.gmra.mxu0 %v6738_v17  ;;  %3104 = vmatmul.bf16.vlgmr.msrb.gmra.mxu2 %v6686_v54  ;;  %v5618_v54 = vld [vmem:[#allocation6 + $0xd8] sm:$0xf0]  ;;  %v5517_v22 = vor.u32 %v6278_v47, %v5514_v61  ;;  %v1420_v61 = vperm.slane %v6744_v28, 2 }
 0x1c8   :  { %3581 = vmatpush.bf16.msrb.mxu0 %v5573_v5  ;;  %v5621_v39 = vor.u32 %v6304_v45, %v5618_v54  ;;  %3555 = vmatpush.bf16.msra.mxu2 %v5697_v63  ;;  %v2860_v16 = vpop.f32.mrf.mxu3  ;;  %v5602_v5 = vld [vmem:[#allocation6 + $0xb8] sm:$0xf0]  ;;  %v5581_v54 = vor.u32 %v6294_v53, %v5578_v36  ;;  %v5649_v63 = vor.u32 %v6313_v49, %v5648_v48  ;;  %v6339_v53 = vld [vmem:[#allocation6 + $0x1e4] sm:$0xf0] }
 0x1c9   :  { %v5605_v13 = vor.u32 %v6300_v3, %v5602_v5  ;;  %v6318_v5 = vld [vmem:[#allocation6 + $0x144] sm:$0xf]  ;;  %v5666_v47 = vld [vmem:[#allocation6 + $0x138] sm:$0xf0] }
 0x1ca   :  { %3116 = vmatpush.bf16.msrb.mxu3 %v5396_v26  ;;  %3549 = vmatpush.bf16.msra.mxu1 %v5577_v27  ;;  %v6754_v9 = vpop.f32.mrf.mxu1  ;;  %v6296_v26 = vld [vmem:[#allocation6 + $0x94] sm:$0xf]  ;;  %v5586_v27 = vld [vmem:[#allocation6 + $0x98] sm:$0xf0] }
 0x1cb   :  { %v5589_v37 = vor.u32 %v6296_v26, %v5586_v27  ;;  %v6341_v26 = vld [vmem:[#allocation6 + $0x1f4] sm:$0xf0] }
 0x1cc   :  { %3582 = vmatpush.bf16.msrb.mxu0 %v5565_v19  ;;  %v2897_v10 = vpop.f32.mrf.mxu2  ;;  %3556 = vmatpush.bf16.msra.mxu2 %v5689_v6  ;;  %v2925_v11 = vpop.f32.mrf.mxu0  ;;  %v5594_v19 = vld [vmem:[#allocation6 + $0xa8] sm:$0xf0] }
 0x1cd   :  { %3117 = vmatmul.bf16.vlgmr.msrb.gmra.mxu3 %v6690_v24  ;;  %v2859_v24 = vadd.f32 %v2858_v0, %v2846_v44  ;;  %v5597_v23 = vor.u32 %v6298_v18, %v5594_v19  ;;  %v6317_v0 = vld [vmem:[#allocation6 + $0x134] sm:$0xf0]  ;;  %v5640_v44 = vld [vmem:[#allocation6 + $0x100] sm:$0xf]  ;;  %v5674_v6 = vld [vmem:[#allocation6 + $0x148] sm:$0xf0]  ;;  %v5661_v19 = vor.u32 %v6314_v14, %v5658_v15 }
 0x1ce   :  { %3594 = vmatpush.bf16.msrb.mxu1 %v5637_v33  ;;  %v6336_v15 = vld [vmem:[#allocation6 + $0x1d4] sm:$0xf] }
 0x1cf   :  { %v2872_v8 = vadd.f32 %v6729_v7, %v2859_v24  ;;  %v5690_v24 = vld [vmem:[#allocation6 + $0x168] sm:$0xf0] }
 0x1d0   :  { %3583 = vmatpush.bf16.msrb.mxu0 %v5557_v30  ;;  %3557 = vmatpush.bf16.msra.mxu2 %v5681_v20  ;;  %v2910_v31 = vpop.f32.mrf.mxu3  ;;  %v2924_v20 = vadd.f32 %v6751_v50, %v1420_v61  ;;  %v5752_v50 = vld [vmem:[#allocation6 + $0x1e0] sm:$0xf]  ;;  %v5746_v61 = vld [vmem:[#allocation6 + $0x1d8] sm:$0xf0] }
 0x1d1   :  { %v2885_v21 = vadd.f32 %v6736_v35, %v2872_v8  ;;  %v5677_v8 = vor.u32 %v6318_v5, %v5674_v6  ;;  %v5762_v5 = vld [vmem:[#allocation6 + $0x1f8] sm:$0xf0] }
 0x1d2   :  { %3595 = vmatpush.bf16.msrb.mxu1 %v5629_v43  ;;  %v2938_v32 = vpop.f32.mrf.mxu1  ;;  %v5665_v43 = vor.u32 %v6317_v0, %v5664_v38  ;;  %v5744_v0 = vld [vmem:[#allocation6 + $0x1d0] sm:$0xf] }
 0x1d3   :  { %v2898_v7 = vadd.f32 %v2897_v10, %v2885_v21  ;;  %v6312_v21 = vld [vmem:[#allocation6 + $0x114] sm:$0xf] }
 0x1d4   :  { %3584 = vmatpush.bf16.msrb.mxu0 %v5549_v41  ;;  %v2899_v33 = vpop.f32.mrf.mxu2  ;;  %3558 = vmatpush.bf16.msra.mxu2 %v5673_v29  ;;  %v5656_v41 = vld [vmem:[#allocation6 + $0x120] sm:$0xf]  ;;  %v5645_v29 = vor.u32 %v6310_v25, %v5642_v57  ;;  %v6332_v25 = vld [vmem:[#allocation6 + $0x1b4] sm:$0xf]  ;;  %v5730_v57 = vld [vmem:[#allocation6 + $0x1b8] sm:$0xf0] }
 0x1d5   :  { %v2911_v30 = vadd.f32 %v2910_v31, %v2898_v7  ;;  %v5657_v4 = vor.u32 %v6315_v42, %v5656_v41  ;;  %v5650_v7 = vld [vmem:[#allocation6 + $0x118] sm:$0xf0]  ;;  %v5760_v31 = vld [vmem:[#allocation6 + $0x1f0] sm:$0xf]  ;;  %v6337_v41 = vld [vmem:[#allocation6 + $0x1d4] sm:$0xf0] }
 0x1d6   :  { %3596 = vmatpush.bf16.msrb.mxu1 %v5621_v39 }
 0x1d7   :  { %vm3123_vm9 = vcmp.ge.f32.partialorder %v2911_v30, 0.0  ;;  %v3127_v35 = vmul.f32 0.01, %v2911_v30 }
 0x1d8   :  { %3585 = vmatpush.bf16.msrb.mxu0 %v5541_v2  ;;  %3559 = vmatpush.bf16.msra.mxu2 %v5665_v43  ;;  %v2912_v46 = vpop.f32.mrf.mxu3  ;;  %v6311_v2 = vld [vmem:[#allocation6 + $0x104] sm:$0xf0] }
 0x1d9   :  { %v3131_v1 = vsel %vm3123_vm9, %v2911_v30, %v3127_v35  ;;  %v5641_v39 = vor.u32 %v6311_v2, %v5640_v44  ;;  %v5761_v30 = vor.u32 %v6341_v26, %v5760_v31  ;;  %v5753_v35 = vor.u32 %v6339_v53, %v5752_v50  ;;  %v5728_v2 = vld [vmem:[#allocation6 + $0x1b0] sm:$0xf]  ;;  %v6330_v26 = vld [vmem:[#allocation6 + $0x1a4] sm:$0xf]  ;;  %v6328_v53 = vld [vmem:[#allocation6 + $0x194] sm:$0xf] }
 0x1da   :  { %3597 = vmatpush.bf16.msrb.mxu1 %v5613_v34  ;;  %v3135_v45 = vpack.c.bf16 %v3131_v1, %v3131_v1  ;;  %v5745_v1 = vor.u32 %v6337_v41, %v5744_v0  ;;  %v5729_v52 = vor.u32 %v6333_v51, %v5728_v2  ;;  %v5733_v31 = vor.u32 %v6332_v25, %v5730_v57  ;;  %v6326_v41 = vld [vmem:[#allocation6 + $0x184] sm:$0xf]  ;;  %v5509_v51 = vld [vmem:[%s6790_s7 + $0x2] ss:$8 sm:$0x3]  ;;  %v6365_v25 = vld [vmem:[#allocation9 + $0x38] sm:$0xff] }
 0x1db   :  { %3568 = vmatpush.bf16.msra.mxu3 %v5761_v30  ;;  %v1421_v30 = vperm.slane %v6744_v28, 3  ;;  %v6364_v57 = vld [vmem:[#allocation9 + $0x30] sm:$0xff] }
 0x1dc   :  { %3586 = vmatpush.bf16.msrb.mxu0 %v5533_v58  ;;  %3550 = vmatmul.bf16.vlgmr.msra.gmra.mxu1 %v3135_v45 }
 0x1dd   :  { %3560 = vmatpush.bf16.msra.mxu2 %v5657_v4  ;;  %v6335_v4 = vld [vmem:[#allocation6 + $0x1c4] sm:$0xf0] }
 0x1de   :  { %3598 = vmatpush.bf16.msrb.mxu1 %v5605_v13 }
 0x1df   :  { %3569 = vmatpush.bf16.msra.mxu3 %v5753_v35 }
 0x1e0   :  { %3587 = vmatpush.bf16.msrb.mxu0 %v5525_v12  ;;  %v6316_v12 = vld [vmem:[#allocation6 + $0x134] sm:$0xf] }
 0x1e1   :  { %3561 = vmatpush.bf16.msra.mxu2 %v5649_v63  ;;  %v5669_v13 = vor.u32 %v6316_v12, %v5666_v47 }
 0x1e2   :  { %3599 = vmatpush.bf16.msrb.mxu1 %v5597_v23  ;;  %v2937_v23 = vadd.f32 %v6754_v9, %v2924_v20  ;;  %v6334_v20 = vld [vmem:[#allocation6 + $0x1c4] sm:$0xf] }
 0x1e3   :  { %3570 = vmatpush.bf16.msra.mxu3 %v5745_v1 }
 0x1e4   :  { %3588 = vmatpush.bf16.msrb.mxu0 %v5517_v22  ;;  %v2975_v55 = vpop.f32.mrf.mxu0  ;;  %v5653_v22 = vor.u32 %v6312_v21, %v5650_v7  ;;  %v5738_v21 = vld [vmem:[#allocation6 + $0x1c8] sm:$0xf0] }
 0x1e5   :  { %3562 = vmatpush.bf16.msra.mxu2 %v5641_v39  ;;  %v5741_v7 = vor.u32 %v6334_v20, %v5738_v21  ;;  %v6354_v20 = vld [vmem:[#allocation7 + $0x60] sm:$0xff]  ;;  %v6353_v21 = vld [vmem:[#allocation7 + $0x58] sm:$0xff] }
 0x1e6   :  { %3600 = vmatpush.bf16.msrb.mxu1 %v5589_v37 }
 0x1e7   :  { %3589 = vmatmul.bf16.vlgmr.msrb.gmra.mxu0 %v6738_v17  ;;  %v6322_v17 = vld [vmem:[#allocation6 + $0x164] sm:$0xf] }
 0x1e8   :  { %v5693_v16 = vor.u32 %v6322_v17, %v5690_v24 }
 0x1e9   :  { %3607 = vmatpush.bf16.msrb.mxu2 %v5701_v56  ;;  %v6331_v56 = vld [vmem:[#allocation6 + $0x1a4] sm:$0xf0] }
 0x1ea   :  { %3601 = vmatpush.bf16.msrb.mxu1 %v5581_v54  ;;  %v2949_v58 = vpop.f32.mrf.mxu2  ;;  %v2988_v59 = vpop.f32.mrf.mxu1  ;;  %v5736_v54 = vld [vmem:[#allocation6 + $0x1c0] sm:$0xf] }
 0x1eb   :  { %v2950_v27 = vadd.f32 %v2949_v58, %v2937_v23  ;;  %v5737_v48 = vor.u32 %v6335_v4, %v5736_v54  ;;  %v5712_v58 = vld [vmem:[#allocation6 + $0x190] sm:$0xf] }
 0x1ec   :  { %v2977_v34 = vpop.f32.mrf.mxu0 }
 0x1ed   :  { %3602 = vmatmul.bf16.vlgmr.msrb.gmra.mxu1 %v3135_v45  ;;  %3608 = vmatpush.bf16.msrb.mxu2 %v5693_v16 }
 0x1ee   :  { %3571 = vmatpush.bf16.msra.mxu3 %v5737_v48 }
 0x1f0   :  { %v2962_v3 = vpop.f32.mrf.mxu3 }
 0x1f1   :  { %3609 = vmatpush.bf16.msrb.mxu2 %v5685_v62  ;;  %v2963_v33 = vadd.f32 %v2962_v3, %v2950_v27  ;;  %v6340_v62 = vld [vmem:[#allocation6 + $0x1f4] sm:$0xf]  ;;  %v5705_v3 = vor.u32 %v6327_v60, %v5704_v40  ;;  %v5722_v27 = vld [vmem:[#allocation6 + $0x1a8] sm:$0xf0] }
 0x1f2   :  { %v2951_v10 = vpop.f32.mrf.mxu2  ;;  %v2990_v11 = vpop.f32.mrf.mxu1  ;;  %3572 = vmatpush.bf16.msra.mxu3 %v5729_v52  ;;  %v5765_v6 = vor.u32 %v6340_v62, %v5762_v5  ;;  %v6349_v62 = vld [vmem:[#allocation7 + $0x38] sm:$0xff]  ;;  %v6348_v5 = vld [vmem:[#allocation7 + $0x30] sm:$0xff] }
 0x1f3   :  { %v2976_v36 = vadd.f32 %v2975_v55, %v2963_v33  ;;  %v5720_v55 = vld [vmem:[#allocation6 + $0x1a0] sm:$0xf]  ;;  %v6338_v10 = vld [vmem:[#allocation6 + $0x1e4] sm:$0xf]  ;;  %v5754_v11 = vld [vmem:[#allocation6 + $0x1e8] sm:$0xf0]  ;;  %3770 = vmatpush.bf16.msra.mxu0 %v6349_v62 }
 0x1f4   :  { %v5721_v24 = vor.u32 %v6331_v56, %v5720_v55  ;;  %v5757_v12 = vor.u32 %v6338_v10, %v5754_v11  ;;  %v6346_v11 = vld [vmem:[#allocation7 + $0x20] sm:$0xff] }
 0x1f5   :  { %3610 = vmatpush.bf16.msrb.mxu2 %v5677_v8  ;;  %v2989_v42 = vadd.f32 %v2988_v59, %v2976_v36  ;;  %v6329_v59 = vld [vmem:[#allocation6 + $0x194] sm:$0xf0]  ;;  %v5714_v36 = vld [vmem:[#allocation6 + $0x198] sm:$0xf0] }
 0x1f6   :  { %3573 = vmatpush.bf16.msra.mxu3 %v5721_v24  ;;  %v5713_v34 = vor.u32 %v6329_v59, %v5712_v58  ;;  %v5717_v35 = vor.u32 %v6328_v53, %v5714_v36  ;;  %v3206_v58 = vperm.slane %v5509_v51, 1 }
 0x1f7   :  { %3771 = vmatpush.bf16.msra.mxu0 %v6348_v5 }
 0x1f8   :  { %v2964_v18 = vpop.f32.mrf.mxu3 }
 0x1f9   :  { %3611 = vmatpush.bf16.msrb.mxu2 %v5669_v13  ;;  %v5749_v18 = vor.u32 %v6336_v15, %v5746_v61  ;;  %v6343_v61 = vld [vmem:[#allocation7 + $0x8] sm:$0xff] }
 0x1fa   :  { %3574 = vmatpush.bf16.msra.mxu3 %v5713_v34 }
 0x1fd   :  { %3612 = vmatpush.bf16.msrb.mxu2 %v5661_v19 }
 0x1fe   :  { %3575 = vmatpush.bf16.msra.mxu3 %v5705_v3  ;;  %v6357_v3 = vld [vmem:[#allocation7 + $0x78] sm:$0xff] }
 0x1ff   :  { %3783 = vmatpush.bf16.msra.mxu1 %v6357_v3 }
 0x201   :  { %3613 = vmatpush.bf16.msrb.mxu2 %v5653_v22 }
 0x202   :  { %3620 = vmatpush.bf16.msrb.mxu3 %v5765_v6  ;;  %v6356_v6 = vld [vmem:[#allocation7 + $0x70] sm:$0xff] }
 0x203   :  { %3784 = vmatpush.bf16.msra.mxu1 %v6356_v6  ;;  %v3898_v6 = vld [vmem:[%s6790_s7 + $0x5] ss:$0 sm:$0xff] }
 0x204   :  { %v6761_v32 = vpop.f32.mrf.mxu0 }
 0x205   :  { %3614 = vmatpush.bf16.msrb.mxu2 %v5645_v29  ;;  %v5725_v29 = vor.u32 %v6330_v26, %v5722_v27  ;;  %v3028_v50 = vadd.f32 %v6761_v32, %v1421_v30 }
 0x206   :  { %3621 = vmatpush.bf16.msrb.mxu3 %v5757_v12  ;;  %v6345_v12 = vld [vmem:[#allocation7 + $0x18] sm:$0xff] }
 0x20a   :  { %v3001_v37 = vpop.f32.mrf.mxu2  ;;  %v6763_v38 = vpop.f32.mrf.mxu1  ;;  %3622 = vmatpush.bf16.msrb.mxu3 %v5749_v18  ;;  %v6355_v18 = vld [vmem:[#allocation7 + $0x68] sm:$0xff] }
 0x20b   :  { %v3002_v43 = vadd.f32 %v3001_v37, %v2989_v42  ;;  %v3041_v37 = vadd.f32 %v6763_v38, %v3028_v50  ;;  %v5706_v42 = vld [vmem:[#allocation6 + $0x188] sm:$0xf0]  ;;  %3785 = vmatpush.bf16.msra.mxu1 %v6355_v18 }
 0x20c   :  { %v3029_v9 = vpop.f32.mrf.mxu0  ;;  %v5709_v1 = vor.u32 %v6326_v41, %v5706_v42  ;;  %v6363_v42 = vld [vmem:[#allocation9 + $0x28] sm:$0xff] }
 0x20e   :  { %3623 = vmatpush.bf16.msrb.mxu3 %v5741_v7  ;;  %v6352_v7 = vld [vmem:[#allocation7 + $0x50] sm:$0xff] }
 0x20f   :  { %3786 = vmatpush.bf16.msra.mxu1 %v6354_v20 }
 0x210   :  { %v3014_v45 = vpop.f32.mrf.mxu3 }
 0x211   :  { %v3015_v46 = vadd.f32 %v3014_v45, %v3002_v43 }
 0x212   :  { %v3003_v63 = vpop.f32.mrf.mxu2  ;;  %v3042_v44 = vpop.f32.mrf.mxu1  ;;  %3624 = vmatpush.bf16.msrb.mxu3 %v5733_v31 }
 0x213   :  { %vm3124_vm10 = vcmp.ge.f32.partialorder %v3015_v46, 0.0  ;;  %v3128_v49 = vmul.f32 0.01, %v3015_v46  ;;  %3787 = vmatpush.bf16.msra.mxu1 %v6353_v21 }
 0x215   :  { %v3132_v39 = vsel %vm3124_vm10, %v3015_v46, %v3128_v49 }
 0x216   :  { %v3136_v17 = vpack.c.bf16 %v3132_v39, %v3132_v39  ;;  %3625 = vmatpush.bf16.msrb.mxu3 %v5725_v29  ;;  %v3205_v39 = vperm.slane %v5509_v51, 0 }
 0x217   :  { %3788 = vmatpush.bf16.msra.mxu1 %v6352_v7 }
 0x218   :  { %v3016_v16 = vpop.f32.mrf.mxu3  ;;  %3563 = vmatmul.bf16.vlgmr.msra.gmra.mxu2 %v3136_v17 }
 0x219   :  { %3865 = vmatpush.bf16.msra.mxu2 %v6365_v25 }
 0x21a   :  { %3626 = vmatpush.bf16.msrb.mxu3 %v5717_v35 }
 0x21d   :  { %3866 = vmatpush.bf16.msra.mxu2 %v6364_v57 }
 0x21e   :  { %3627 = vmatpush.bf16.msrb.mxu3 %v5709_v1  ;;  %v6362_v1 = vld [vmem:[#allocation9 + $0x20] sm:$0xff] }
 0x221   :  { %3867 = vmatpush.bf16.msra.mxu2 %v6363_v42 }
 0x224   :  { %v3079_v8 = vpop.f32.mrf.mxu0 }
 0x225   :  { %3868 = vmatpush.bf16.msra.mxu2 %v6362_v1 }
 0x228   :  { %3615 = vmatmul.bf16.vlgmr.msrb.gmra.mxu2 %v3136_v17 }
 0x22a   :  { %v3053_v47 = vpop.f32.mrf.mxu2  ;;  %v3092_v13 = vpop.f32.mrf.mxu1 }
 0x22b   :  { %v3054_v9 = vadd.f32 %v3053_v47, %v3041_v37 }
 0x22c   :  { %v3081_v14 = vpop.f32.mrf.mxu0 }
 0x230   :  { %v3066_v19 = vpop.f32.mrf.mxu3 }
 0x231   :  { %v3067_v43 = vadd.f32 %v3066_v19, %v3054_v9  ;;  %v6342_v19 = vld [vmem:[#allocation7] sm:$0xff] }
 0x232   :  { %v3055_v22 = vpop.f32.mrf.mxu2  ;;  %v3094_v23 = vpop.f32.mrf.mxu1 }
 0x233   :  { %v3080_v45 = vadd.f32 %v3079_v8, %v3067_v43  ;;  %v6347_v8 = vld [vmem:[#allocation7 + $0x28] sm:$0xff]  ;;  %v6350_v23 = vld [vmem:[#allocation7 + $0x40] sm:$0xff]  ;;  %v6361_v43 = vld [vmem:[#allocation9 + $0x18] sm:$0xff] }
 0x234   :  { %3772 = vmatpush.bf16.msra.mxu0 %v6347_v8  ;;  %v6351_v22 = vld [vmem:[#allocation7 + $0x48] sm:$0xff]  ;;  %3869 = vmatpush.bf16.msra.mxu2 %v6361_v43 }
 0x235   :  { %v3093_v4 = vadd.f32 %v3092_v13, %v3080_v45  ;;  %v6344_v13 = vld [vmem:[#allocation7 + $0x10] sm:$0xff]  ;;  %3789 = vmatpush.bf16.msra.mxu1 %v6351_v22 }
 0x236   :  { %v6360_v45 = vld [vmem:[#allocation9 + $0x10] sm:$0xff] }
 0x238   :  { %v3068_v33 = vpop.f32.mrf.mxu3  ;;  %3773 = vmatpush.bf16.msra.mxu0 %v6346_v11  ;;  %3870 = vmatpush.bf16.msra.mxu2 %v6360_v45 }
 0x239   :  { %3790 = vmatpush.bf16.msra.mxu1 %v6350_v23 }
 0x23c   :  { %3774 = vmatpush.bf16.msra.mxu0 %v6345_v12 }
 0x240   :  { %3775 = vmatpush.bf16.msra.mxu0 %v6344_v13 }
 0x244   :  { %v3538_v0 = vpop.f32.mrf.mxu0  ;;  %3776 = vmatpush.bf16.msra.mxu0 %v6343_v61 }
 0x245   :  { %v3539_v55 = vadd.f32 %v3538_v0, %v3205_v39 }
 0x248   :  { %3777 = vmatpush.bf16.msra.mxu0 %v6342_v19 }
 0x24a   :  { %v3105_v54 = vpop.f32.mrf.mxu2 }
 0x24b   :  { %v3106_v46 = vadd.f32 %v3105_v54, %v3093_v4  ;;  %v6359_v54 = vld [vmem:[#allocation9 + $0x8] sm:$0xff]  ;;  %v6373_v4 = vld [vmem:[#allocation10 + $0x38] sm:$0xff] }
 0x24c   :  { %v3540_v28 = vpop.f32.mrf.mxu0  ;;  %3871 = vmatpush.bf16.msra.mxu2 %v6359_v54 }
 0x24d   :  { %v6358_v28 = vld [vmem:[#allocation9] sm:$0xff] }
 0x250   :  { %v3118_v48 = vpop.f32.mrf.mxu3  ;;  %3872 = vmatpush.bf16.msra.mxu2 %v6358_v28 }
 0x251   :  { %v3119_v32 = vadd.f32 %v3118_v48, %v3106_v46  ;;  %v6372_v46 = vld [vmem:[#allocation10 + $0x30] sm:$0xff]  ;;  %v6371_v48 = vld [vmem:[#allocation10 + $0x28] sm:$0xff] }
 0x252   :  { %v3107_v63 = vpop.f32.mrf.mxu2 }
 0x253   :  { %vm3125_vm11 = vcmp.ge.f32.partialorder %v3119_v32, 0.0  ;;  %v3129_v49 = vmul.f32 0.01, %v3119_v32  ;;  %v6369_v63 = vld [vmem:[#allocation10 + $0x18] sm:$0xff] }
 0x255   :  { %v3133_v44 = vsel %vm3125_vm11, %v3119_v32, %v3129_v49  ;;  %v6370_v49 = vld [vmem:[#allocation10 + $0x20] sm:$0xff] }
 0x256   :  { %v3137_v38 = vpack.c.bf16 %v3133_v44, %v3133_v44 }
 0x258   :  { %v3120_v2 = vpop.f32.mrf.mxu3  ;;  %3576 = vmatmul.bf16.vlgmr.msra.gmra.mxu3 %v3137_v38 }
 0x259   :  { %v3551_v56 = vpop.f32.mrf.mxu1  ;;  %3947 = vmatpush.bf16.msra.mxu3 %v6373_v4  ;;  %v3673_v2 = vld [vmem:[%s6790_s7 + $0x3] ss:$0 sm:$0xff] }
 0x25a   :  { %v3552_v17 = vadd.f32 %v3551_v56, %v3539_v55 }
 0x25d   :  { %3948 = vmatpush.bf16.msra.mxu3 %v6372_v46 }
 0x261   :  { %v3553_v16 = vpop.f32.mrf.mxu1  ;;  %3949 = vmatpush.bf16.msra.mxu3 %v6371_v48 }
 0x262   :  { %v6367_v16 = vld [vmem:[#allocation10 + $0x8] sm:$0xff] }
 0x264   :  { %v3590_v52 = vpop.f32.mrf.mxu0 }
 0x265   :  { %v3591_v59 = vadd.f32 %v3590_v52, %v3206_v58  ;;  %3950 = vmatpush.bf16.msra.mxu3 %v6370_v49  ;;  %v6366_v58 = vld [vmem:[#allocation10] sm:$0xff] }
 0x268   :  { %3628 = vmatmul.bf16.vlgmr.msrb.gmra.mxu3 %v3137_v38  ;;  %v6368_v38 = vld [vmem:[#allocation10 + $0x10] sm:$0xff] }
 0x269   :  { %3951 = vmatpush.bf16.msra.mxu3 %v6369_v63 }
 0x26a   :  { %v3603_v34 = vpop.f32.mrf.mxu1 }
 0x26b   :  { %v3604_v40 = vadd.f32 %v3603_v34, %v3591_v59  ;;  %v3816_v59 = vld [vmem:[%s6790_s7 + $0x4] ss:$0 sm:$0xff] }
 0x26c   :  { %v3592_v24 = vpop.f32.mrf.mxu0 }
 0x26d   :  { %3952 = vmatpush.bf16.msra.mxu3 %v6368_v38 }
 0x271   :  { %3953 = vmatpush.bf16.msra.mxu3 %v6367_v16 }
 0x272   :  { %v3605_v60 = vpop.f32.mrf.mxu1 }
 0x275   :  { %3954 = vmatpush.bf16.msra.mxu3 %v6366_v58 }
 0x29b   :  { %v3564_v10 = vpop.f32.mrf.mxu2 }
 0x29c   :  { %v3565_v31 = vadd.f32 %v3564_v10, %v3552_v17 }
 0x2a3   :  { %v3566_v47 = vpop.f32.mrf.mxu2 }
 0x2ab   :  { %v3616_v14 = vpop.f32.mrf.mxu2 }
 0x2ac   :  { %v3617_v53 = vadd.f32 %v3616_v14, %v3604_v40 }
 0x2b3   :  { %v3618_v15 = vpop.f32.mrf.mxu2 }
 0x2db   :  { %v3577_v26 = vpop.f32.mrf.mxu3 }
 0x2dc   :  { %v3578_v27 = vadd.f32 %v3577_v26, %v3565_v31 }
 0x2de   :  { %vm3633_vm12 = vcmp.ge.f32.partialorder %v3578_v27, 0.0  ;;  %v3635_v29 = vmul.f32 0.01, %v3578_v27 }
 0x2e0   :  { %v3637_v30 = vsel %vm3633_vm12, %v3578_v27, %v3635_v29 }
 0x2e1   :  { %v3639_v33 = vpack.c.bf16 %v3637_v30, %v3637_v30 }
 0x2e3   :  { %v3579_v50 = vpop.f32.mrf.mxu3  ;;  %3778 = vmatmul.bf16.vlgmr.msra.gmra.mxu0 %v3639_v33 }
 0x2eb   :  { %v3629_v36 = vpop.f32.mrf.mxu3 }
 0x2ec   :  { %v3630_v35 = vadd.f32 %v3629_v36, %v3617_v53 }
 0x2ee   :  { %vm3634_vm13 = vcmp.ge.f32.partialorder %v3630_v35, 0.0  ;;  %v3636_v37 = vmul.f32 0.01, %v3630_v35 }
 0x2f0   :  { %v3638_v9 = vsel %vm3634_vm13, %v3630_v35, %v3636_v37 }
 0x2f1   :  { %v3640_v0 = vpack.c.bf16 %v3638_v9, %v3638_v9 }
 0x2f3   :  { %v3631_v41 = vpop.f32.mrf.mxu3  ;;  %3791 = vmatmul.bf16.vlgmr.msra.gmra.mxu1 %v3640_v0 }
 0x360   :  { %v3779_v32 = vpop.f32.mrf.mxu0 }
 0x361   :  { %v3780_v51 = vadd.f32 %v3779_v32, %v3673_v2 }
 0x368   :  { %v3781_v44 = vpop.f32.mrf.mxu0 }
 0x370   :  { %v3792_v39 = vpop.f32.mrf.mxu1 }
 0x371   :  { %v3793_v52 = vadd.f32 %v3792_v39, %v3780_v51 }
 0x373   :  { %vm3796_vm14 = vcmp.ge.f32.partialorder %v3793_v52, 0.0  ;;  %v3797_v55 = vmul.f32 0.01, %v3793_v52 }
 0x375   :  { %v3798_v56 = vsel %vm3796_vm14, %v3793_v52, %v3797_v55 }
 0x376   :  { %v3799_v17 = vpack.c.bf16 %v3798_v56, %v3798_v56 }
 0x378   :  { %v3794_v24 = vpop.f32.mrf.mxu1  ;;  %3873 = vmatmul.bf16.vlgmr.msra.gmra.mxu2 %v3799_v17 }
 0x3fb   :  { %v3874_v34 = vpop.f32.mrf.mxu2 }
 0x3fc   :  { %v3875_v40 = vadd.f32 %v3874_v34, %v3816_v59 }
 0x3fe   :  { %vm3878_vm15 = vcmp.ge.f32.partialorder %v3875_v40, 0.0  ;;  %v3879_v60 = vmul.f32 0.01, %v3875_v40 }
 0x400   :  { %v3880_v62 = vsel %vm3878_vm15, %v3875_v40, %v3879_v60 }
 0x401   :  { %v3881_v3 = vpack.c.bf16 %v3880_v62, %v3880_v62 }
 0x403   :  { %v3876_v5 = vpop.f32.mrf.mxu2  ;;  %3955 = vmatmul.bf16.vlgmr.msra.gmra.mxu3 %v3881_v3 }
 0x486   :  { %v3956_v8 = vpop.f32.mrf.mxu3 }
 0x487   :  { %v3957_v10 = vadd.f32 %v3956_v8, %v3898_v6 }
 0x489   :  { %vm3960_vm0 = vcmp.ge.f32.partialorder %v3957_v10, 0.0  ;;  %v3961_v11 = vmul.f32 0.01, %v3957_v10 }
 0x48b   :  { %v3962_v12 = vsel %vm3960_vm0, %v3957_v10, %v3961_v11 }
 0x48c   :  { %3963 = vst [vmem:[%s6791_s8] sm:$0xff] %v3962_v12 }
 0x48e   :  { %v3958_v47 = vpop.f32.mrf.mxu3 }
 0x48f   :  { %3968 = vsyncpa [#allocation3], 1 }
 0x490   :  { %3969 = vsyncpa [#allocation5], 1 }
 0x491   :  { %3970 = vsyncpa [#allocation8], 1 }
 0x492   :  { %3971 = vsyncpa [#allocation11], 1 }

</bundles_post_ra>
